<compile_context>
chip_gen: v5e
topology: v5e:2x2
jax: 0.10.0
libtpu: 0.0.40
codegen_flags: <defaults>
</compile_context>

<pallas_src>
import functools

import jax
import jax.numpy as jnp
from jax.experimental import pallas as pl
from jax.experimental.pallas import tpu as pltpu

BN_EPS = 1e-5
LANE = 128                        # pad feature/hidden/class dims to this
TILE_NODE_MAX = 1024              # per-axis node tile cap (multiple of 256)
NEG_INF = -1e30                   # mask value for padded class lanes
VMEM_LIMIT = 48 * 1024 * 1024     # v7x-safe (64 MiB phys); fine on v5e/v6e


def _round_up(x, m):
    return ((x + m - 1) // m) * m


def _pad_to(x, shape):
    pads = [(0, s - d) for d, s in zip(x.shape, shape)]
    if all(p == (0, 0) for p in pads):
        return x
    return jnp.pad(x, pads)


# ---------------------------------------------------------------------------
# Pallas kernels (fused  H_out = epilogue(A_hat @ (H @ W') + b') )
# ---------------------------------------------------------------------------
def gcn_hidden_kernel(a_ref, h_ref, w_ref, b_ref, o_ref, acc_ref):
    """Hidden layer: relu(A_hat @ (H @ W') + b'), bf16 output, f32 accumulator.

    The (tk, F) activation tile is transformed by the VMEM-resident W' inside
    the k-loop (MXU has slack: kernel is bandwidth-bound on A_hat)."""
    k = pl.program_id(1)

    @pl.when(k == 0)
    def _():
        acc_ref[...] = jnp.zeros_like(acc_ref)

    hw = jnp.dot(h_ref[...], w_ref[...],
                 preferred_element_type=jnp.float32).astype(jnp.bfloat16)
    acc_ref[...] += jnp.dot(a_ref[...], hw,
                            preferred_element_type=jnp.float32)

    @pl.when(k == pl.num_programs(1) - 1)
    def _():
        o_ref[...] = jnp.maximum(acc_ref[...] + b_ref[...],
                                 0.0).astype(o_ref.dtype)


def gcn_final_kernel(a_ref, h_ref, w_ref, b_ref, o_ref, *, num_classes):
    """Final layer: log_softmax(A_hat @ (H @ W) + b); accumulates directly into
    the f32 output block (no scratch); padded class lanes masked."""
    k = pl.program_id(1)

    @pl.when(k == 0)
    def _():
        o_ref[...] = jnp.zeros_like(o_ref)

    hw = jnp.dot(h_ref[...], w_ref[...],
                 preferred_element_type=jnp.float32).astype(jnp.bfloat16)
    o_ref[...] += jnp.dot(a_ref[...], hw,
                          preferred_element_type=jnp.float32)

    @pl.when(k == pl.num_programs(1) - 1)
    def _():
        h = o_ref[...] + b_ref[...]
        lane = jax.lax.broadcasted_iota(jnp.int32, h.shape, 1)
        valid = lane < num_classes
        h = jnp.where(valid, h, NEG_INF)          # mask padded class lanes
        m = jnp.max(h, axis=-1, keepdims=True)
        s = h - m
        lse = jnp.log(jnp.sum(jnp.exp(s), axis=-1, keepdims=True))
        o_ref[...] = jnp.where(valid, s - lse, 0.0)


# ---------------------------------------------------------------------------
# pallas_call wrapper (one fused call per GCN layer)
# ---------------------------------------------------------------------------
def _gcn_layer(kernel, a, h, w, b, *, out_dtype, tm, tk, use_acc_scratch):
    n_pad = a.shape[0]
    fin_p, fout_p = w.shape
    scratch = [pltpu.VMEM((tm, fout_p), jnp.float32)] if use_acc_scratch else []
    return pl.pallas_call(
        kernel,
        out_shape=jax.ShapeDtypeStruct((n_pad, fout_p), out_dtype),
        grid=(pl.cdiv(n_pad, tm), pl.cdiv(n_pad, tk)),
        in_specs=[
            pl.BlockSpec((tm, tk), lambda i, k: (i, k)),        # A_hat tile
            pl.BlockSpec((tk, fin_p), lambda i, k: (k, 0)),     # H k-tile
            pl.BlockSpec((fin_p, fout_p), lambda i, k: (0, 0)),  # W' (resident)
            pl.BlockSpec((1, fout_p), lambda i, k: (0, 0)),     # b'
        ],
        out_specs=pl.BlockSpec((tm, fout_p), lambda i, k: (i, 0)),
        scratch_shapes=scratch,
        compiler_params=pltpu.CompilerParams(
            dimension_semantics=("parallel", "arbitrary"),
            vmem_limit_bytes=VMEM_LIMIT),
    )(a, h, w, b)


# ---------------------------------------------------------------------------
# Parameter construction, BN folding, padding
# ---------------------------------------------------------------------------
def init_params(key, num_features, hidden, num_classes, num_layers):
    dims = [num_features] + [hidden] * (num_layers - 1) + [num_classes]
    params = {"convs": [], "bns": []}
    for i in range(num_layers):
        key, kw, kg, kb, km, kv = jax.random.split(key, 6)
        fan_in, fan_out = dims[i], dims[i + 1]
        scale = jnp.sqrt(2.0 / (fan_in + fan_out))
        w = scale * jax.random.normal(kw, (fan_in, fan_out), jnp.float32)
        b = jnp.zeros((1, fan_out), jnp.float32)
        params["convs"].append((w, b))
        if i < num_layers - 1:
            gamma = 1.0 + 0.1 * jax.random.normal(kg, (1, fan_out), jnp.float32)
            beta = 0.1 * jax.random.normal(kb, (1, fan_out), jnp.float32)
            mean = 0.1 * jax.random.normal(km, (1, fan_out), jnp.float32)
            var = 1.0 + 0.1 * jax.random.uniform(kv, (1, fan_out), jnp.float32)
            params["bns"].append((gamma, beta, mean, var))
    return params


def fold_and_pad_params(params, num_layers):
    """Fold eval-mode BatchNorm into (W, b), zero-pad dims to LANE, store W' as
    bf16 (all casts happen here, outside the kernels)."""
    convs = []
    for i in range(num_layers):
        w, b = params["convs"][i]
        if i < num_layers - 1:
            gamma, beta, mean, var = params["bns"][i]
            s = gamma * jax.lax.rsqrt(var + BN_EPS)        # (1, fan_out)
            w = w * s                                      # column-wise scale
            b = (b - mean) * s + beta
        fin_p = _round_up(w.shape[0], LANE)
        fout_p = _round_up(w.shape[1], LANE)
        w = _pad_to(w, (fin_p, fout_p)).astype(jnp.bfloat16)
        b = _pad_to(b, (1, fout_p)).astype(jnp.float32)
        convs.append((w, b))
    return tuple(convs)


def make_norm_adj(key, n):
    """Dense symmetric random graph -> D^-1/2 (A + I) D^-1/2."""
    a = (jax.random.uniform(key, (n, n)) < 0.1).astype(jnp.float32)
    a = jnp.maximum(a, a.T)
    a = a + jnp.eye(n, dtype=jnp.float32)
    deg = jnp.sum(a, axis=1)
    d_inv_sqrt = jax.lax.rsqrt(deg)
    return a * d_inv_sqrt[:, None] * d_inv_sqrt[None, :]


# ---------------------------------------------------------------------------
# Forward pass
# ---------------------------------------------------------------------------
@functools.partial(jax.jit, static_argnums=(3, 4))
def gcn_forward(x, a_hat, convs, num_classes, tile_cap=TILE_NODE_MAX):
    n, f = x.shape
    # Node tiling: multiples of 256 (full-depth v6e/v7x MXU contraction),
    # capped for v7x's 64 MiB VMEM; small graphs collapse to a single tile.
    t = min(tile_cap, _round_up(n, 256))
    tm = tk = t
    n_pad = _round_up(n, t)

    # One-time padding + bf16 casts OUTSIDE the kernels: halves HBM bytes on
    # X / A_hat / inter-layer H and removes per-tile VPU cast work.
    # (Zero-padded A columns kill any junk in padded H rows; zero-padded W rows
    #  kill padded feature columns, so padding is numerically inert.)
    x = _pad_to(x, (n_pad, _round_up(f, LANE))).astype(jnp.bfloat16)
    a = _pad_to(a_hat, (n_pad, n_pad)).astype(jnp.bfloat16)

    h = x
    for i in range(len(convs) - 1):
        w, b = convs[i]                          # BN already folded into W'/b'
        h = _gcn_layer(gcn_hidden_kernel, a, h, w, b,
                       out_dtype=jnp.bfloat16, tm=tm, tk=tk,
                       use_acc_scratch=True)
        # dropout(p=0.5, training=False) == identity  (inference semantics)
    w, b = convs[-1]
    out = _gcn_layer(
        functools.partial(gcn_final_kernel, num_classes=num_classes),
        a, h, w, b, out_dtype=jnp.float32, tm=tm, tk=tk,
        use_acc_scratch=False)
    return out[:n, :num_classes]


# ---------------------------------------------------------------------------
# References
# ---------------------------------------------------------------------------
def reference_forward_f32(x, a_hat, params, num_layers):
    """Pure-JAX f32 reference (original unfused math)."""
    h = x
    for i in range(num_layers - 1):
        w, b = params["convs"][i]
        gamma, beta, mean, var = params["bns"][i]
        h = a_hat @ (h @ w) + b
        h = (h - mean) * jax.lax.rsqrt(var + BN_EPS) * gamma + beta
        h = jnp.maximum(h, 0.0)
    w, b = params["convs"][-1]
    h = a_hat @ (h @ w) + b
    return jax.nn.log_softmax(h, axis=1)


def reference_forward_bf16(x, a_hat, params, num_layers):
    """Pure-JAX reference with the SAME bf16 quantization the kernels use
    (bf16 operands, f32 accumulation, bf16 inter-layer activations)."""
    bf = jnp.bfloat16
    a = a_hat.astype(bf)
    h = x.astype(bf)
    for i in range(num_layers - 1):
        w, b = params["convs"][i]
        gamma, beta, mean, var = params["bns"][i]
        s = gamma * jax.lax.rsqrt(var + BN_EPS)
        wq = (w * s).astype(bf)
        bias = (b - mean) * s + beta
        hw = jnp.dot(h, wq, preferred_element_type=jnp.float32).astype(bf)
        z = jnp.dot(a, hw, preferred_element_type=jnp.float32) + bias
        h = jnp.maximum(z, 0.0).astype(bf)
    w, b = params["convs"][-1]
    hw = jnp.dot(h, w.astype(bf), preferred_element_type=jnp.float32).astype(bf)
    logits = jnp.dot(a, hw, preferred_element_type=jnp.float32) + b
    return jax.nn.log_softmax(logits, axis=1)


# ---------------------------------------------------------------------------
if __name__ == "__main__":
    NUM_NODES = 512
    NUM_FEATURES = 100     # deliberately not lane-aligned -> exercises padding
    HIDDEN = 128
    NUM_CLASSES = 8
    NUM_LAYERS = 3
    TEST_TILE = 256        # small cap so the test exercises a real (2, 2) grid

    key = jax.random.PRNGKey(0)
    k_x, k_adj, k_params = jax.random.split(key, 3)

    x = jax.random.normal(k_x, (NUM_NODES, NUM_FEATURES), jnp.float32)
    a_hat = make_norm_adj(k_adj, NUM_NODES)
    params = init_params(k_params, NUM_FEATURES, HIDDEN, NUM_CLASSES, NUM_LAYERS)
    convs = fold_and_pad_params(params, NUM_LAYERS)

    out = gcn_forward(x, a_hat, convs, NUM_CLASSES, TEST_TILE)
    out = jax.block_until_ready(out)

    assert out.shape == (NUM_NODES, NUM_CLASSES)
    assert bool(jnp.all(jnp.isfinite(out)))
    # log_softmax rows must sum (in prob space) to ~1.
    assert jnp.allclose(jnp.sum(jnp.exp(out), axis=1), 1.0, atol=1e-3)

    # Tight check against a reference using identical bf16 quantization.
    ref_q = reference_forward_bf16(x, a_hat, params, NUM_LAYERS)
    err_q = float(jnp.max(jnp.abs(out - ref_q)))
    assert err_q < 0.1, f"max |pallas - bf16 ref| too large: {err_q}"

    # Informational deviation from the exact f32 reference (bf16 operand noise).
    ref_f = reference_forward_f32(x, a_hat, params, NUM_LAYERS)
    err_f = float(jnp.max(jnp.abs(out - ref_f)))
    print(f"max |pallas - bf16-matched ref| = {err_q:.3e}, "
          f"max |pallas - f32 ref| = {err_f:.3e}")

    print("KERNEL_OK")
</pallas_src>

<mosaic_0001>
module attributes {stable_mosaic.version = 11 : i64} {
  func.func @gcn_hidden_kernel(%arg0: i32, %arg1: i32, %arg2: memref<256x256xbf16, #tpu.memory_space<vmem>>, %arg3: memref<256x128xbf16, #tpu.memory_space<vmem>>, %arg4: memref<128x128xbf16, #tpu.memory_space<vmem>>, %arg5: memref<1x128xf32, #tpu.memory_space<vmem>>, %arg6: memref<256x128xbf16, #tpu.memory_space<vmem>>, %arg7: memref<256x128xf32, #tpu.memory_space<vmem>>) attributes {dimension_semantics = [#tpu.dimension_semantics<parallel>, #tpu.dimension_semantics<arbitrary>], iteration_bounds = array<i64: 2, 2>, scalar_prefetch = 0 : i64, scratch_operands = 1 : i64, tpu.core_type = #tpu.core_type<tc>, window_params = [{transform_indices = @transform_0, window_bounds = array<i64: 256, 256>}, {transform_indices = @transform_1, window_bounds = array<i64: 256, 128>}, {pipeline_mode = #tpu.pipeline_mode<synchronous>, transform_indices = @transform_2, window_bounds = array<i64: 128, 128>}, {pipeline_mode = #tpu.pipeline_mode<synchronous>, transform_indices = @transform_3, window_bounds = array<i64: 1, 128>}, {transform_indices = @transform_4, window_bounds = array<i64: 256, 128>}]} {
    %c0_i32 = arith.constant 0 : i32
    %0 = arith.cmpi eq, %arg1, %c0_i32 : i32
    %1 = arith.extui %0 : i1 to i32
    %c0_i32_0 = arith.constant 0 : i32
    %2 = arith.cmpi ne, %1, %c0_i32_0 : i32
    scf.if %2 {
      %cst_12 = arith.constant 0.000000e+00 : f32
      %15 = vector.broadcast %cst_12 : f32 to vector<256x128xf32>
      %c0_13 = arith.constant 0 : index
      %c0_14 = arith.constant 0 : index
      %16 = vector.load %arg7[%c0_13, %c0_14] : memref<256x128xf32, #tpu.memory_space<vmem>>, vector<256x128xf32>
      tpu.vector_store %arg7[%c0_13, %c0_14], %15 {strides = array<i32>} : memref<256x128xf32, #tpu.memory_space<vmem>>, vector<256x128xf32>,
    } else {
    }
    %c0 = arith.constant 0 : index
    %c0_1 = arith.constant 0 : index
    %3 = vector.load %arg3[%c0, %c0_1] : memref<256x128xbf16, #tpu.memory_space<vmem>>, vector<256x128xbf16>
    %c0_2 = arith.constant 0 : index
    %c0_3 = arith.constant 0 : index
    %4 = vector.load %arg4[%c0_2, %c0_3] : memref<128x128xbf16, #tpu.memory_space<vmem>>, vector<128x128xbf16>
    %cst = arith.constant dense<0.000000e+00> : vector<256x128xf32>
    %5 = tpu.matmul %3, %4, %cst {dimension_numbers = #tpu.dot_dimension_numbers<[1], [0], [0], [1], [0, 0, 1, 1], [], []>} : vector<256x128xbf16>, vector<128x128xbf16>, vector<256x128xf32> -> vector<256x128xf32>
    %6 = arith.truncf %5 : vector<256x128xf32> to vector<256x128xbf16>
    %c0_4 = arith.constant 0 : index
    %c0_5 = arith.constant 0 : index
    %7 = vector.load %arg7[%c0_4, %c0_5] : memref<256x128xf32, #tpu.memory_space<vmem>>, vector<256x128xf32>
    %c0_6 = arith.constant 0 : index
    %c0_7 = arith.constant 0 : index
    %8 = vector.load %arg2[%c0_6, %c0_7] : memref<256x256xbf16, #tpu.memory_space<vmem>>, vector<256x256xbf16>
    %cst_8 = arith.constant dense<0.000000e+00> : vector<256x128xf32>
    %9 = tpu.matmul %8, %6, %cst_8 {dimension_numbers = #tpu.dot_dimension_numbers<[1], [0], [0], [1], [0, 0, 1, 1], [], []>} : vector<256x256xbf16>, vector<256x128xbf16>, vector<256x128xf32> -> vector<256x128xf32>
    %10 = arith.addf %7, %9 : vector<256x128xf32>
    %c0_9 = arith.constant 0 : index
    %c0_10 = arith.constant 0 : index
    %11 = vector.load %arg7[%c0_9, %c0_10] : memref<256x128xf32, #tpu.memory_space<vmem>>, vector<256x128xf32>
    tpu.vector_store %arg7[%c0_9, %c0_10], %10 {strides = array<i32>} : memref<256x128xf32, #tpu.memory_space<vmem>>, vector<256x128xf32>,
    %c1_i32 = arith.constant 1 : i32
    %12 = arith.cmpi eq, %arg1, %c1_i32 : i32
    %13 = arith.extui %12 : i1 to i32
    %c0_i32_11 = arith.constant 0 : i32
    %14 = arith.cmpi ne, %13, %c0_i32_11 : i32
    scf.if %14 {
      %c0_12 = arith.constant 0 : index
      %c0_13 = arith.constant 0 : index
      %15 = vector.load %arg7[%c0_12, %c0_13] : memref<256x128xf32, #tpu.memory_space<vmem>>, vector<256x128xf32>
      %c0_14 = arith.constant 0 : index
      %c0_15 = arith.constant 0 : index
      %16 = vector.load %arg5[%c0_14, %c0_15] : memref<1x128xf32, #tpu.memory_space<vmem>>, vector<1x128xf32>
      %17 = vector.broadcast %16 : vector<1x128xf32> to vector<256x128xf32>
      %18 = arith.addf %15, %17 : vector<256x128xf32>
      %cst_16 = arith.constant 0.000000e+00 : f32
      %19 = vector.broadcast %cst_16 : f32 to vector<256x128xf32>
      %20 = arith.maximumf %18, %19 : vector<256x128xf32>
      %21 = arith.truncf %20 : vector<256x128xf32> to vector<256x128xbf16>
      %c0_17 = arith.constant 0 : index
      %c0_18 = arith.constant 0 : index
      %22 = vector.load %arg6[%c0_17, %c0_18] : memref<256x128xbf16, #tpu.memory_space<vmem>>, vector<256x128xbf16>
      tpu.vector_store %arg6[%c0_17, %c0_18], %21 {strides = array<i32>} : memref<256x128xbf16, #tpu.memory_space<vmem>>, vector<256x128xbf16>,
    } else {
    }
    return
  }
  func.func @transform_0(%arg0: i32, %arg1: i32) -> (i32, i32) {
    %c0_i32 = arith.constant 0 : i32
    return %arg0, %arg1 : i32, i32
  }
  func.func @transform_1(%arg0: i32, %arg1: i32) -> (i32, i32) {
    %c0_i32 = arith.constant 0 : i32
    %c0_i32_0 = arith.constant 0 : i32
    return %arg1, %c0_i32 : i32, i32
  }
  func.func @transform_2(%arg0: i32, %arg1: i32) -> (i32, i32) {
    %c0_i32 = arith.constant 0 : i32
    %c0_i32_0 = arith.constant 0 : i32
    %c0_i32_1 = arith.constant 0 : i32
    return %c0_i32, %c0_i32_0 : i32, i32
  }
  func.func @transform_3(%arg0: i32, %arg1: i32) -> (i32, i32) {
    %c0_i32 = arith.constant 0 : i32
    %c0_i32_0 = arith.constant 0 : i32
    %c0_i32_1 = arith.constant 0 : i32
    return %c0_i32, %c0_i32_0 : i32, i32
  }
  func.func @transform_4(%arg0: i32, %arg1: i32) -> (i32, i32) {
    %c0_i32 = arith.constant 0 : i32
    %c0_i32_0 = arith.constant 0 : i32
    return %arg0, %c0_i32 : i32, i32
  }
}

module attributes {stable_mosaic.version = 11 : i64} {
  func.func @gcn_final_kernel(%arg0: i32, %arg1: i32, %arg2: memref<256x256xbf16, #tpu.memory_space<vmem>>, %arg3: memref<256x128xbf16, #tpu.memory_space<vmem>>, %arg4: memref<128x128xbf16, #tpu.memory_space<vmem>>, %arg5: memref<1x128xf32, #tpu.memory_space<vmem>>, %arg6: memref<256x128xf32, #tpu.memory_space<vmem>>) attributes {dimension_semantics = [#tpu.dimension_semantics<parallel>, #tpu.dimension_semantics<arbitrary>], iteration_bounds = array<i64: 2, 2>, scalar_prefetch = 0 : i64, scratch_operands = 0 : i64, tpu.core_type = #tpu.core_type<tc>, window_params = [{transform_indices = @transform_0, window_bounds = array<i64: 256, 256>}, {transform_indices = @transform_1, window_bounds = array<i64: 256, 128>}, {pipeline_mode = #tpu.pipeline_mode<synchronous>, transform_indices = @transform_2, window_bounds = array<i64: 128, 128>}, {pipeline_mode = #tpu.pipeline_mode<synchronous>, transform_indices = @transform_3, window_bounds = array<i64: 1, 128>}, {transform_indices = @transform_4, window_bounds = array<i64: 256, 128>}]} {
    %c0_i32 = arith.constant 0 : i32
    %0 = arith.cmpi eq, %arg1, %c0_i32 : i32
    %1 = arith.extui %0 : i1 to i32
    %c0_i32_0 = arith.constant 0 : i32
    %2 = arith.cmpi ne, %1, %c0_i32_0 : i32
    scf.if %2 {
      %cst_12 = arith.constant 0.000000e+00 : f32
      %15 = vector.broadcast %cst_12 : f32 to vector<256x128xf32>
      %c0_13 = arith.constant 0 : index
      %c0_14 = arith.constant 0 : index
      %16 = vector.load %arg6[%c0_13, %c0_14] : memref<256x128xf32, #tpu.memory_space<vmem>>, vector<256x128xf32>
      tpu.vector_store %arg6[%c0_13, %c0_14], %15 {strides = array<i32>} : memref<256x128xf32, #tpu.memory_space<vmem>>, vector<256x128xf32>,
    } else {
    }
    %c0 = arith.constant 0 : index
    %c0_1 = arith.constant 0 : index
    %3 = vector.load %arg3[%c0, %c0_1] : memref<256x128xbf16, #tpu.memory_space<vmem>>, vector<256x128xbf16>
    %c0_2 = arith.constant 0 : index
    %c0_3 = arith.constant 0 : index
    %4 = vector.load %arg4[%c0_2, %c0_3] : memref<128x128xbf16, #tpu.memory_space<vmem>>, vector<128x128xbf16>
    %cst = arith.constant dense<0.000000e+00> : vector<256x128xf32>
    %5 = tpu.matmul %3, %4, %cst {dimension_numbers = #tpu.dot_dimension_numbers<[1], [0], [0], [1], [0, 0, 1, 1], [], []>} : vector<256x128xbf16>, vector<128x128xbf16>, vector<256x128xf32> -> vector<256x128xf32>
    %6 = arith.truncf %5 : vector<256x128xf32> to vector<256x128xbf16>
    %c0_4 = arith.constant 0 : index
    %c0_5 = arith.constant 0 : index
    %7 = vector.load %arg6[%c0_4, %c0_5] : memref<256x128xf32, #tpu.memory_space<vmem>>, vector<256x128xf32>
    %c0_6 = arith.constant 0 : index
    %c0_7 = arith.constant 0 : index
    %8 = vector.load %arg2[%c0_6, %c0_7] : memref<256x256xbf16, #tpu.memory_space<vmem>>, vector<256x256xbf16>
    %cst_8 = arith.constant dense<0.000000e+00> : vector<256x128xf32>
    %9 = tpu.matmul %8, %6, %cst_8 {dimension_numbers = #tpu.dot_dimension_numbers<[1], [0], [0], [1], [0, 0, 1, 1], [], []>} : vector<256x256xbf16>, vector<256x128xbf16>, vector<256x128xf32> -> vector<256x128xf32>
    %10 = arith.addf %7, %9 : vector<256x128xf32>
    %c0_9 = arith.constant 0 : index
    %c0_10 = arith.constant 0 : index
    %11 = vector.load %arg6[%c0_9, %c0_10] : memref<256x128xf32, #tpu.memory_space<vmem>>, vector<256x128xf32>
    tpu.vector_store %arg6[%c0_9, %c0_10], %10 {strides = array<i32>} : memref<256x128xf32, #tpu.memory_space<vmem>>, vector<256x128xf32>,
    %c1_i32 = arith.constant 1 : i32
    %12 = arith.cmpi eq, %arg1, %c1_i32 : i32
    %13 = arith.extui %12 : i1 to i32
    %c0_i32_11 = arith.constant 0 : i32
    %14 = arith.cmpi ne, %13, %c0_i32_11 : i32
    scf.if %14 {
      %c0_12 = arith.constant 0 : index
      %c0_13 = arith.constant 0 : index
      %15 = vector.load %arg6[%c0_12, %c0_13] : memref<256x128xf32, #tpu.memory_space<vmem>>, vector<256x128xf32>
      %c0_14 = arith.constant 0 : index
      %c0_15 = arith.constant 0 : index
      %16 = vector.load %arg5[%c0_14, %c0_15] : memref<1x128xf32, #tpu.memory_space<vmem>>, vector<1x128xf32>
      %17 = vector.broadcast %16 : vector<1x128xf32> to vector<256x128xf32>
      %18 = arith.addf %15, %17 : vector<256x128xf32>
      %19 = tpu.iota {dimensions = array<i32: 1>} : vector<256x128xi32>
      %c8_i32 = arith.constant 8 : i32
      %20 = vector.broadcast %c8_i32 : i32 to vector<256x128xi32>
      %21 = arith.cmpi slt, %19, %20 : vector<256x128xi32>
      %cst_16 = arith.constant -1.000000e+30 : f32
      %22 = vector.broadcast %cst_16 : f32 to vector<256x128xf32>
      %23 = arith.select %21, %18, %22 : vector<256x128xi1>, vector<256x128xf32>
      %cst_17 = arith.constant dense<0xFF800000> : vector<256xf32>
      %24 = vector.multi_reduction <maximumf>, %23, %cst_17 [1] : vector<256x128xf32> to vector<256xf32>
      %25 = vector.shape_cast %24 : vector<256xf32> to vector<256x1xf32>
      %26 = vector.broadcast %25 : vector<256x1xf32> to vector<256x128xf32>
      %27 = arith.subf %23, %26 : vector<256x128xf32>
      %28 = math.exp %27 : vector<256x128xf32>
      %cst_18 = arith.constant dense<0.000000e+00> : vector<256xf32>
      %29 = vector.multi_reduction <add>, %28, %cst_18 [1] : vector<256x128xf32> to vector<256xf32>
      %30 = vector.shape_cast %29 : vector<256xf32> to vector<256x1xf32>
      %31 = math.log %30 : vector<256x1xf32>
      %32 = vector.broadcast %31 : vector<256x1xf32> to vector<256x128xf32>
      %33 = arith.subf %27, %32 : vector<256x128xf32>
      %cst_19 = arith.constant 0.000000e+00 : f32
      %34 = vector.broadcast %cst_19 : f32 to vector<256x128xf32>
      %35 = arith.select %21, %33, %34 : vector<256x128xi1>, vector<256x128xf32>
      %c0_20 = arith.constant 0 : index
      %c0_21 = arith.constant 0 : index
      %36 = vector.load %arg6[%c0_20, %c0_21] : memref<256x128xf32, #tpu.memory_space<vmem>>, vector<256x128xf32>
      tpu.vector_store %arg6[%c0_20, %c0_21], %35 {strides = array<i32>} : memref<256x128xf32, #tpu.memory_space<vmem>>, vector<256x128xf32>,
    } else {
    }
    return
  }
  func.func @transform_0(%arg0: i32, %arg1: i32) -> (i32, i32) {
    %c0_i32 = arith.constant 0 : i32
    return %arg0, %arg1 : i32, i32
  }
  func.func @transform_1(%arg0: i32, %arg1: i32) -> (i32, i32) {
    %c0_i32 = arith.constant 0 : i32
    %c0_i32_0 = arith.constant 0 : i32
    return %arg1, %c0_i32 : i32, i32
  }
  func.func @transform_2(%arg0: i32, %arg1: i32) -> (i32, i32) {
    %c0_i32 = arith.constant 0 : i32
    %c0_i32_0 = arith.constant 0 : i32
    %c0_i32_1 = arith.constant 0 : i32
    return %c0_i32, %c0_i32_0 : i32, i32
  }
  func.func @transform_3(%arg0: i32, %arg1: i32) -> (i32, i32) {
    %c0_i32 = arith.constant 0 : i32
    %c0_i32_0 = arith.constant 0 : i32
    %c0_i32_1 = arith.constant 0 : i32
    return %c0_i32, %c0_i32_0 : i32, i32
  }
  func.func @transform_4(%arg0: i32, %arg1: i32) -> (i32, i32) {
    %c0_i32 = arith.constant 0 : i32
    %c0_i32_0 = arith.constant 0 : i32
    return %arg0, %c0_i32 : i32, i32
  }
}

</mosaic_0001>

<bundles_post_ra>
// kernel: gcn_forward.5
= control target key start
LH: loop header
LB: loop body
LE: loop exit
PB: predicated region body
PF: predicated region fallthrough
CT: control target
= control target key end

     0   :  { %s2371_s15 = smov 0   ;;  %s2373_s16 = smov 0   ;;  %s3251_s0 = inlined_call_operand.vmem [shape: bf16[512,512], index: 0, kind: input, shape index: {}]   ;;  %s3252_s1 = inlined_call_operand.vmem [shape: bf16[512,128], index: 1, kind: input, shape index: {}]   ;;  %s3253_s2 = inlined_call_operand.vmem [shape: bf16[128,128], index: 2, kind: input, shape index: {}]   ;;  %s3254_s3 = inlined_call_operand.vmem [shape: f32[1,128], index: 3, kind: input, shape index: {}]   ;;  %s3255_s4 = inlined_call_operand.vmem [shape: f32[512,128], index: 4, kind: output, shape index: {}]  }
   0x1   :  { %s2375_s17 = smov 0   ;;  %s2377_s18 = smov 0  }
   0x2   :  { %s2379_s19 = smov 0   ;;  %s2381_s20 = smov 0  }
   0x3   :  { %s2383_s21 = smov 0  }
   0x4 LB: > { %s23_s22 = sadd.s32 1, %s2335_s19  ;;  %s26_s23 = sadd.s32 1, %s2339_s20  ;;  %s2343_s21 = sphi %s2383_s21, %s14_s21   ;;  %s2339_s20 = sphi %s2381_s20, %s3261_s20   ;;  %s2335_s19 = sphi %s2379_s19, %s3260_s19   ;;  %s2331_s18 = sphi %s2377_s18, %s3259_s18   ;;  %s2327_s17 = sphi %s2375_s17, %s3258_s17   ;;  %s2323_s16 = sphi %s2373_s16, %s3257_s16   ;;  %s2319_s15 = sphi %s2371_s15, %s3256_s15  }
   0x5   : > { %p24_p0 = scmp.ge.s32.totalorder %s23_s22, 2  ;;  %p42_p1 = scmp.ne.s32.totalorder %s2323_s16, %s2319_s15 }
   0x6   : > { %p43_p2 = scmp.eq.s32.totalorder %s2343_s21, 0  ;;  %s35_s27 = sadd.s32 1, %s2323_s16 }
   0x7   : > { %s3263_s22 = smov (%p24_p0, %s23_s22), 0  ;;  %s3265_s23 = smov (!%p24_p0, %s26_s23), %s2339_s20 }
   0x8   : > { %p44_p3 = por %p43_p2, %p42_p1  ;;  %p28_p4 = scmp.ge.s32.totalorder %s3265_s23, 2 }
   0x9   : > { %s31_s24 = ssub.s32 %s2335_s19, %s3263_s22  ;;  %p1782_p6 = scmp.ge.s32.totalorder %s2343_s21, 4 }
   0xa   : > { %s3267_s23 = smov (%p28_p4, %s3265_s23), 0 }
   0xb   : > { %s30_s25 = ssub.s32 %s2339_s20, %s3267_s23  ;;  %168 = sbr.rel (%p1782_p6) target bundleno = 55 (0x37), region = 24 }
   0xc   : > { %s32_s26 = sor.u32 %s31_s24, %s30_s25 }
   0xd   : > { %p33_p5 = scmp.eq.s32.totalorder %s32_s26, 0 }
   0xf   : > { %s2422_s28 = scalar_select %p33_p5, %s2323_s16, %s35_s27  }
  0x10   : > { %171 = sbr.rel (!%p44_p3) target bundleno = 55 (0x37), region = 28  ;;  %s173_s29 = sand.u32 (%p44_p3), 1, %s2323_s16  }
  0x11   : > { %s1785_s30 = sshll.u32 (%p44_p3), %s2335_s19, 1  ;;  %s1783_s5 = sshll.u32 (%p44_p3), %s173_s29, 8 }
  0x12   : > { %s2022_s6 = sshll.u32 (%p44_p3), %s2339_s20, 7  ;;  %s2436_s12 = scalar_lea.vmem (%p44_p3), [#allocation2], %s1783_s5 }
  0x13   : > { %s179_s7 = sadd.s32 (%p44_p3), %s2022_s6, %s1785_s30 }
  0x14   : > { %s1787_s8 = sshll.u32 (%p44_p3), %s179_s7, 2 }
  0x15   : > { %s2431_s11 = scalar_lea.vmem %s3251_s0, %s1787_s8 }
  0x16   : > { %v272_v0 = vld [vmem:[%s2431_s11] sm:$0xff]  ;;  %v274_v1 = vld [vmem:[%s2431_s11 + $0x10] sm:$0xff] }
  0x17   : > { %v276_v2 = vld [vmem:[%s2431_s11 + $0x20] sm:$0xff]  ;;  %273 = vst [vmem:[%s2436_s12] sm:$0xff] %v272_v0  ;;  %v278_v3 = vld [vmem:[%s2431_s11 + $0x30] sm:$0xff] }
  0x18   : > { %275 = vst [vmem:[%s2436_s12 + $0x8] sm:$0xff] %v274_v1  ;;  %v280_v4 = vld [vmem:[%s2431_s11 + $0x40] sm:$0xff]  ;;  %v282_v5 = vld [vmem:[%s2431_s11 + $0x50] sm:$0xff] }
  0x19   : > { %277 = vst [vmem:[%s2436_s12 + $0x10] sm:$0xff] %v276_v2  ;;  %v284_v6 = vld [vmem:[%s2431_s11 + $0x60] sm:$0xff]  ;;  %v286_v7 = vld [vmem:[%s2431_s11 + $0x70] sm:$0xff] }
  0x1a   : > { %279 = vst [vmem:[%s2436_s12 + $0x18] sm:$0xff] %v278_v3  ;;  %v288_v8 = vld [vmem:[%s2431_s11 + $0x80] sm:$0xff]  ;;  %v290_v9 = vld [vmem:[%s2431_s11 + $0x90] sm:$0xff] }
  0x1b   : > { %281 = vst [vmem:[%s2436_s12 + $0x20] sm:$0xff] %v280_v4  ;;  %v292_v10 = vld [vmem:[%s2431_s11 + $0xa0] sm:$0xff]  ;;  %v294_v11 = vld [vmem:[%s2431_s11 + $0xb0] sm:$0xff] }
  0x1c   : > { %283 = vst [vmem:[%s2436_s12 + $0x28] sm:$0xff] %v282_v5  ;;  %v296_v12 = vld [vmem:[%s2431_s11 + $0xc0] sm:$0xff]  ;;  %v298_v13 = vld [vmem:[%s2431_s11 + $0xd0] sm:$0xff] }
  0x1d   : > { %285 = vst [vmem:[%s2436_s12 + $0x30] sm:$0xff] %v284_v6  ;;  %v300_v14 = vld [vmem:[%s2431_s11 + $0xe0] sm:$0xff]  ;;  %v302_v15 = vld [vmem:[%s2431_s11 + $0xf0] sm:$0xff] }
  0x1e   : > { %287 = vst [vmem:[%s2436_s12 + $0x38] sm:$0xff] %v286_v7  ;;  %v304_v16 = vld [vmem:[%s2431_s11 + $0x100] sm:$0xff]  ;;  %v306_v17 = vld [vmem:[%s2431_s11 + $0x110] sm:$0xff] }
  0x1f   : > { %289 = vst [vmem:[%s2436_s12 + $0x40] sm:$0xff] %v288_v8  ;;  %v308_v18 = vld [vmem:[%s2431_s11 + $0x120] sm:$0xff]  ;;  %v310_v19 = vld [vmem:[%s2431_s11 + $0x130] sm:$0xff] }
  0x20   : > { %291 = vst [vmem:[%s2436_s12 + $0x48] sm:$0xff] %v290_v9  ;;  %v312_v20 = vld [vmem:[%s2431_s11 + $0x140] sm:$0xff]  ;;  %v314_v21 = vld [vmem:[%s2431_s11 + $0x150] sm:$0xff] }
  0x21   : > { %293 = vst [vmem:[%s2436_s12 + $0x50] sm:$0xff] %v292_v10  ;;  %v316_v22 = vld [vmem:[%s2431_s11 + $0x160] sm:$0xff]  ;;  %v318_v23 = vld [vmem:[%s2431_s11 + $0x170] sm:$0xff] }
  0x22   : > { %295 = vst [vmem:[%s2436_s12 + $0x58] sm:$0xff] %v294_v11  ;;  %v320_v24 = vld [vmem:[%s2431_s11 + $0x180] sm:$0xff]  ;;  %v322_v25 = vld [vmem:[%s2431_s11 + $0x190] sm:$0xff] }
  0x23   : > { %297 = vst [vmem:[%s2436_s12 + $0x60] sm:$0xff] %v296_v12  ;;  %v324_v26 = vld [vmem:[%s2431_s11 + $0x1a0] sm:$0xff]  ;;  %v326_v27 = vld [vmem:[%s2431_s11 + $0x1b0] sm:$0xff] }
  0x24   : > { %299 = vst [vmem:[%s2436_s12 + $0x68] sm:$0xff] %v298_v13  ;;  %v328_v28 = vld [vmem:[%s2431_s11 + $0x1c0] sm:$0xff]  ;;  %v330_v29 = vld [vmem:[%s2431_s11 + $0x1d0] sm:$0xff] }
  0x25   : > { %301 = vst [vmem:[%s2436_s12 + $0x70] sm:$0xff] %v300_v14  ;;  %v332_v30 = vld [vmem:[%s2431_s11 + $0x1e0] sm:$0xff]  ;;  %v334_v31 = vld [vmem:[%s2431_s11 + $0x1f0] sm:$0xff] }
  0x26   : > { %303 = vst [vmem:[%s2436_s12 + $0x78] sm:$0xff] %v302_v15 }
  0x27   : > { %305 = vst [vmem:[%s2436_s12 + $0x80] sm:$0xff] %v304_v16 }
  0x28   : > { %307 = vst [vmem:[%s2436_s12 + $0x88] sm:$0xff] %v306_v17 }
  0x29   : > { %309 = vst [vmem:[%s2436_s12 + $0x90] sm:$0xff] %v308_v18 }
  0x2a   : > { %311 = vst [vmem:[%s2436_s12 + $0x98] sm:$0xff] %v310_v19 }
  0x2b   : > { %313 = vst [vmem:[%s2436_s12 + $0xa0] sm:$0xff] %v312_v20 }
  0x2c   : > { %315 = vst [vmem:[%s2436_s12 + $0xa8] sm:$0xff] %v314_v21 }
  0x2d   : > { %317 = vst [vmem:[%s2436_s12 + $0xb0] sm:$0xff] %v316_v22 }
  0x2e   : > { %319 = vst [vmem:[%s2436_s12 + $0xb8] sm:$0xff] %v318_v23 }
  0x2f   : > { %321 = vst [vmem:[%s2436_s12 + $0xc0] sm:$0xff] %v320_v24 }
  0x30   : > { %323 = vst [vmem:[%s2436_s12 + $0xc8] sm:$0xff] %v322_v25 }
  0x31   : > { %325 = vst [vmem:[%s2436_s12 + $0xd0] sm:$0xff] %v324_v26 }
  0x32   : > { %327 = vst [vmem:[%s2436_s12 + $0xd8] sm:$0xff] %v326_v27 }
  0x33   : > { %329 = vst [vmem:[%s2436_s12 + $0xe0] sm:$0xff] %v328_v28 }
  0x34   : > { %331 = vst [vmem:[%s2436_s12 + $0xe8] sm:$0xff] %v330_v29 }
  0x35   : > { %333 = vst [vmem:[%s2436_s12 + $0xf0] sm:$0xff] %v332_v30 }
  0x36   : > { %335 = vst [vmem:[%s2436_s12 + $0xf8] sm:$0xff] %v334_v31 }
  0x37 PF: > { %p1788_p7 = scmp.ge.s32.totalorder %s2343_s21, 1  ;;  %p349_p8 = scmp.lt.s32.totalorder %s2343_s21, 5 }
  0x39   : > { %p350_p9 = pnand %p1788_p7, %p349_p8 }
  0x3a   : > { %s356_s13 = sand.u32 (!%p350_p9), 1, %s2319_s15   ;;  %s1790_s14 = sshll.u32 (!%p350_p9), %s2327_s17, 5 }
  0x3b   : > { %353 = sbr.rel (%p350_p9) target bundleno = 1137 (0x471), region = 70  ;;  %s1789_s24 = sshll.u32 (!%p350_p9), %s356_s13, 8 }
  0x3c   : > { %p389_p10 = scmp.lt.s32.totalorder (!%p350_p9), %s1790_s14, 63  ;;  %s1792_s25 = sshll.u32 (!%p350_p9), %s2331_s18, 5 }
  0x3d   : > { %p395_p11 = scmp.lt.s32.totalorder (!%p350_p9), %s1792_s25, 63  ;;  %s2514_s15 = scalar_lea.vmem (!%p350_p9), [#allocation2], %s1789_s24 }
  0x3e   : > { %p1794_p12 = scmp.ne.s32.totalorder (!%p350_p9), %s2327_s17, 0 }
  0x40   : > { %s3269_s14 = smov (!%p389_p10, %s1790_s14), 63  ;;  %s3271_s25 = smov (!%p395_p11, %s1792_s25), 63 }
  0x41   : > { %s1791_s26 = sshll.u32 %s3269_s14, 2  ;;  %s1793_s5 = sshll.u32 %s3271_s25, 3 }
  0x42   : > { %s2507_s30 = scalar_lea.vmem %s3252_s1, %s1791_s26  ;;  %s2512_s8 = scalar_lea.vmem %s3255_s4, %s1793_s5 }
  0x43   : > { %403 = sbr.rel (%p1794_p12) target bundleno = 105 (0x69), region = 78 }
  0x48   : > { %v2345_v32 = vmov 0.0  }
  0x49   : > { %404 = vst [vmem:[%s2512_s8] sm:$0xff] %v2345_v32 }
  0x4a   : > { %405 = vst [vmem:[%s2512_s8 + $0x8] sm:$0xff] %v2345_v32 }
  0x4b   : > { %406 = vst [vmem:[%s2512_s8 + $0x10] sm:$0xff] %v2345_v32 }
  0x4c   : > { %407 = vst [vmem:[%s2512_s8 + $0x18] sm:$0xff] %v2345_v32 }
  0x4d   : > { %408 = vst [vmem:[%s2512_s8 + $0x20] sm:$0xff] %v2345_v32 }
  0x4e   : > { %409 = vst [vmem:[%s2512_s8 + $0x28] sm:$0xff] %v2345_v32 }
  0x4f   : > { %410 = vst [vmem:[%s2512_s8 + $0x30] sm:$0xff] %v2345_v32 }
  0x50   : > { %411 = vst [vmem:[%s2512_s8 + $0x38] sm:$0xff] %v2345_v32 }
  0x51   : > { %412 = vst [vmem:[%s2512_s8 + $0x40] sm:$0xff] %v2345_v32 }
  0x52   : > { %413 = vst [vmem:[%s2512_s8 + $0x48] sm:$0xff] %v2345_v32 }
  0x53   : > { %414 = vst [vmem:[%s2512_s8 + $0x50] sm:$0xff] %v2345_v32 }
  0x54   : > { %415 = vst [vmem:[%s2512_s8 + $0x58] sm:$0xff] %v2345_v32 }
  0x55   : > { %416 = vst [vmem:[%s2512_s8 + $0x60] sm:$0xff] %v2345_v32 }
  0x56   : > { %417 = vst [vmem:[%s2512_s8 + $0x68] sm:$0xff] %v2345_v32 }
  0x57   : > { %418 = vst [vmem:[%s2512_s8 + $0x70] sm:$0xff] %v2345_v32 }
  0x58   : > { %419 = vst [vmem:[%s2512_s8 + $0x78] sm:$0xff] %v2345_v32 }
  0x59   : > { %420 = vst [vmem:[%s2512_s8 + $0x80] sm:$0xff] %v2345_v32 }
  0x5a   : > { %421 = vst [vmem:[%s2512_s8 + $0x88] sm:$0xff] %v2345_v32 }
  0x5b   : > { %422 = vst [vmem:[%s2512_s8 + $0x90] sm:$0xff] %v2345_v32 }
  0x5c   : > { %423 = vst [vmem:[%s2512_s8 + $0x98] sm:$0xff] %v2345_v32 }
  0x5d   : > { %424 = vst [vmem:[%s2512_s8 + $0xa0] sm:$0xff] %v2345_v32 }
  0x5e   : > { %425 = vst [vmem:[%s2512_s8 + $0xa8] sm:$0xff] %v2345_v32 }
  0x5f   : > { %426 = vst [vmem:[%s2512_s8 + $0xb0] sm:$0xff] %v2345_v32 }
  0x60   : > { %427 = vst [vmem:[%s2512_s8 + $0xb8] sm:$0xff] %v2345_v32 }
  0x61   : > { %428 = vst [vmem:[%s2512_s8 + $0xc0] sm:$0xff] %v2345_v32 }
  0x62   : > { %429 = vst [vmem:[%s2512_s8 + $0xc8] sm:$0xff] %v2345_v32 }
  0x63   : > { %430 = vst [vmem:[%s2512_s8 + $0xd0] sm:$0xff] %v2345_v32 }
  0x64   : > { %431 = vst [vmem:[%s2512_s8 + $0xd8] sm:$0xff] %v2345_v32 }
  0x65   : > { %432 = vst [vmem:[%s2512_s8 + $0xe0] sm:$0xff] %v2345_v32 }
  0x66   : > { %433 = vst [vmem:[%s2512_s8 + $0xe8] sm:$0xff] %v2345_v32 }
  0x67   : > { %434 = vst [vmem:[%s2512_s8 + $0xf0] sm:$0xff] %v2345_v32 }
  0x68   : > { %435 = vst [vmem:[%s2512_s8 + $0xf8] sm:$0xff] %v2345_v32 }
  0x69 PF: > { %v2046_v33 = vld [vmem:[%s3253_s2 + $0x38] sm:$0xff]  ;;  %v2045_v34 = vld [vmem:[%s3253_s2 + $0x30] sm:$0xff]  ;;  %v2044_v35 = vld [vmem:[%s3253_s2 + $0x28] sm:$0xff]  ;;  %p2019_p13 = scmp.ne.s32.totalorder %s2327_s17, 1 }
  0x6a   : > { %628 = vmatpush.bf16.msra.mxu0 %v2046_v33  ;;  %2079 = vmatpush.bf16.msra.mxu3 %v2046_v33  ;;  %v2043_v36 = vld [vmem:[%s3253_s2 + $0x20] sm:$0xff]  ;;  %v2042_v37 = vld [vmem:[%s3253_s2 + $0x18] sm:$0xff]  ;;  %v2041_v38 = vld [vmem:[%s3253_s2 + $0x10] sm:$0xff] }
  0x6b   : > { %v2040_v39 = vld [vmem:[%s3253_s2 + $0x8] sm:$0xff]  ;;  %v2039_v40 = vld [vmem:[%s3253_s2] sm:$0xff]  ;;  %v2025_v45 = vld [vmem:[%s2507_s30 + $0x10] sm:$0xff] }
  0x6c   : > { %v2023_v41 = vld [vmem:[%s2507_s30] sm:$0xff]  ;;  %v2024_v43 = vld [vmem:[%s2507_s30 + $0x8] sm:$0xff]  ;;  %v2037_v46 = vld [vmem:[%s2507_s30 + $0x70] sm:$0xff] }
  0x6d   : > { %v2035_v42 = vld [vmem:[%s2507_s30 + $0x60] sm:$0xff]  ;;  %v2036_v44 = vld [vmem:[%s2507_s30 + $0x68] sm:$0xff]  ;;  %v2026_v47 = vld [vmem:[%s2507_s30 + $0x18] sm:$0xff] }
  0x6e   : > { %629 = vmatpush.bf16.msra.mxu0 %v2045_v34  ;;  %2080 = vmatpush.bf16.msra.mxu3 %v2045_v34  ;;  %v2038_v48 = vld [vmem:[%s2507_s30 + $0x78] sm:$0xff]  ;;  %v2027_v49 = vld [vmem:[%s2507_s30 + $0x20] sm:$0xff]  ;;  %v2028_v50 = vld [vmem:[%s2507_s30 + $0x28] sm:$0xff] }
  0x6f   : > { %v2029_v51 = vld [vmem:[%s2507_s30 + $0x30] sm:$0xff]  ;;  %v2030_v52 = vld [vmem:[%s2507_s30 + $0x38] sm:$0xff]  ;;  %v2031_v53 = vld [vmem:[%s2507_s30 + $0x40] sm:$0xff] }
  0x70   : > { %v2032_v58 = vld [vmem:[%s2507_s30 + $0x48] sm:$0xff]  ;;  %v2033_v0 = vld [vmem:[%s2507_s30 + $0x50] sm:$0xff]  ;;  %v2034_v6 = vld [vmem:[%s2507_s30 + $0x58] sm:$0xff] }
  0x71   : > { %v1989_v33 = vld [vmem:[%s2514_s15 + $0xc0] sm:$0xf]  ;;  %v2072_v34 = vld [vmem:[%s2514_s15 + $0xc4] sm:$0xf0] }
  0x72   : > { %630 = vmatpush.bf16.msra.mxu0 %v2044_v35  ;;  %2081 = vmatpush.bf16.msra.mxu3 %v2044_v35 }
  0x76   : > { %631 = vmatpush.bf16.msra.mxu0 %v2043_v36  ;;  %2082 = vmatpush.bf16.msra.mxu3 %v2043_v36  ;;  %v1990_v36 = vor.u32 %v2072_v34, %v1989_v33  ;;  %v2077_v34 = vld [vmem:[%s2514_s15 + $0xf4] sm:$0xf] }
  0x7a   : > { %632 = vmatpush.bf16.msra.mxu0 %v2042_v37  ;;  %2083 = vmatpush.bf16.msra.mxu3 %v2042_v37  ;;  %v1893_v37 = vld [vmem:[%s2514_s15] sm:$0xf] }
  0x7e   : > { %633 = vmatpush.bf16.msra.mxu0 %v2041_v38  ;;  %2084 = vmatpush.bf16.msra.mxu3 %v2041_v38  ;;  %v2048_v38 = vld [vmem:[%s2514_s15 + $0x4] sm:$0xf0] }
  0x82   : > { %634 = vmatpush.bf16.msra.mxu0 %v2040_v39  ;;  %2085 = vmatpush.bf16.msra.mxu3 %v2040_v39  ;;  %v1894_v39 = vor.u32 %v2048_v38, %v1893_v37  ;;  %v1949_v37 = vld [vmem:[%s2514_s15 + $0x70] sm:$0xf]  ;;  %v2062_v38 = vld [vmem:[%s2514_s15 + $0x74] sm:$0xf0] }
  0x86   : > { %635 = vmatpush.bf16.msra.mxu0 %v2039_v40  ;;  %2086 = vmatpush.bf16.msra.mxu3 %v2039_v40 }
  0x89   : > { %636 = vmatmul.bf16.vlgmr.msra.gmra.mxu0 %v2023_v41  ;;  %696 = vmatmul.bf16.vlgmr.msra.gmra.mxu3 %v2035_v42  ;;  %v1997_v41 = vld [vmem:[%s2514_s15 + $0xd0] sm:$0xf]  ;;  %v2074_v42 = vld [vmem:[%s2514_s15 + $0xd4] sm:$0xf0] }
  0x99   : > { %641 = vmatmul.bf16.gmra.mxu0 %v2024_v43  ;;  %701 = vmatmul.bf16.gmra.mxu3 %v2036_v44  ;;  %v1998_v43 = vor.u32 %v2074_v42, %v1997_v41  ;;  %v1950_v41 = vor.u32 %v2062_v38, %v1949_v37 }
  0xa9   : > { %646 = vmatmul.bf16.gmra.mxu0 %v2025_v45  ;;  %706 = vmatmul.bf16.gmra.mxu3 %v2037_v46  ;;  %v1901_v45 = vld [vmem:[%s2514_s15 + $0x10] sm:$0xf]  ;;  %v2050_v46 = vld [vmem:[%s2514_s15 + $0x14] sm:$0xf0] }
  0xb9   : > { %651 = vmatmul.bf16.gmra.mxu0 %v2026_v47  ;;  %711 = vmatmul.bf16.gmra.mxu3 %v2038_v48  ;;  %v1902_v47 = vor.u32 %v2050_v46, %v1901_v45  ;;  %v2059_v45 = vld [vmem:[%s2514_s15 + $0x64] sm:$0xf]  ;;  %v1943_v46 = vld [vmem:[%s2514_s15 + $0x68] sm:$0xf0] }
  0xc9   : > { %656 = vmatmul.bf16.gmra.mxu0 %v2027_v49 }
  0xd9   : > { %661 = vmatmul.bf16.gmra.mxu0 %v2028_v50  ;;  %v2005_v50 = vld [vmem:[%s2514_s15 + $0xe0] sm:$0xf] }
  0xe9   : > { %666 = vmatmul.bf16.gmra.mxu0 %v2029_v51  ;;  %v2076_v51 = vld [vmem:[%s2514_s15 + $0xe4] sm:$0xf0] }
  0xf9   : > { %671 = vmatmul.bf16.gmra.mxu0 %v2030_v52 }
 0x106   : > { %v637_v54 = vpop.f32.mrf.mxu0 }
 0x109   : > { %676 = vmatmul.bf16.gmra.mxu0 %v2031_v53  ;;  %v2006_v53 = vor.u32 %v2076_v51, %v2005_v50  ;;  %v1946_v50 = vor.u32 %v2059_v45, %v1943_v46 }
 0x10c   : > { %v697_v57 = vpop.f32.mrf.mxu3 }
 0x10e   : > { %v639_v55 = vpop.f32.mrf.mxu0 }
 0x10f   : > { %v717_v56 = vpack.c.bf16 %v639_v55, %v637_v54  ;;  %v1909_v55 = vld [vmem:[%s2514_s15 + $0x20] sm:$0xf] }
 0x114   : > { %v699_v60 = vpop.f32.mrf.mxu3 }
 0x115   : > { %v729_v18 = vpack.c.bf16 %v699_v60, %v697_v57  ;;  %v2047_v57 = vld [vmem:[%s2514_s15 + $0x4] sm:$0xf] }
 0x116   : > { %v642_v59 = vpop.f32.mrf.mxu0 }
 0x119   : > { %681 = vmatmul.bf16.gmra.mxu0 %v2032_v58  ;;  %v1895_v58 = vld [vmem:[%s2514_s15 + $0x8] sm:$0xf0] }
 0x11c   : > { %v702_v63 = vpop.f32.mrf.mxu3 }
 0x11e   : > { %v644_v61 = vpop.f32.mrf.mxu0 }
 0x11f   : > { %v718_v62 = vpack.c.bf16 %v644_v61, %v642_v59  ;;  %v1898_v61 = vor.u32 %v2047_v57, %v1895_v58  ;;  %v1965_v57 = vld [vmem:[%s2514_s15 + $0x90] sm:$0xf]  ;;  %v2066_v58 = vld [vmem:[%s2514_s15 + $0x94] sm:$0xf0] }
 0x124   : > { %v704_v2 = vpop.f32.mrf.mxu3 }
 0x125   : > { %v730_v17 = vpack.c.bf16 %v704_v2, %v702_v63  ;;  %v2078_v63 = vld [vmem:[%s2514_s15 + $0xf4] sm:$0xf0] }
 0x126   : > { %v647_v1 = vpop.f32.mrf.mxu0  ;;  %v2054_v2 = vld [vmem:[%s2514_s15 + $0x34] sm:$0xf0] }
 0x129   : > { %686 = vmatmul.bf16.gmra.mxu0 %v2033_v0 }
 0x12c   : > { %v707_v5 = vpop.f32.mrf.mxu3 }
 0x12e   : > { %v649_v3 = vpop.f32.mrf.mxu0 }
 0x12f   : > { %v719_v4 = vpack.c.bf16 %v649_v3, %v647_v1  ;;  %v1917_v1 = vld [vmem:[%s2514_s15 + $0x30] sm:$0xf]  ;;  %v2049_v3 = vld [vmem:[%s2514_s15 + $0x14] sm:$0xf] }
 0x134   : > { %v709_v8 = vpop.f32.mrf.mxu3 }
 0x135   : > { %v731_v15 = vpack.c.bf16 %v709_v8, %v707_v5  ;;  %v1918_v5 = vor.u32 %v2054_v2, %v1917_v1  ;;  %v1991_v8 = vld [vmem:[%s2514_s15 + $0xc8] sm:$0xf0]  ;;  %v1973_v2 = vld [vmem:[%s2514_s15 + $0xa0] sm:$0xf] }
 0x136   : > { %v652_v7 = vpop.f32.mrf.mxu0 }
 0x139   : > { %691 = vmatmul.bf16.gmra.mxu0 %v2034_v6 }
 0x13c   : > { %v712_v11 = vpop.f32.mrf.mxu3 }
 0x13e   : > { %v654_v9 = vpop.f32.mrf.mxu0 }
 0x13f   : > { %v720_v10 = vpack.c.bf16 %v654_v9, %v652_v7  ;;  %v2071_v7 = vld [vmem:[%s2514_s15 + $0xc4] sm:$0xf] }
 0x140   : > { %v1994_v9 = vor.u32 %v2071_v7, %v1991_v8  ;;  %v733_v7 = vld [vmem:[%s2512_s8] sm:$0xff] }
 0x144   : > { %v714_v13 = vpop.f32.mrf.mxu3 }
 0x145   : > { %v732_v14 = vpack.c.bf16 %v714_v13, %v712_v11  ;;  %v2056_v11 = vld [vmem:[%s2514_s15 + $0x44] sm:$0xf0]  ;;  %v1911_v13 = vld [vmem:[%s2514_s15 + $0x28] sm:$0xf0] }
 0x146   : > { %v657_v12 = vpop.f32.mrf.mxu0 }
 0x147   : > { %1046 = vmatpush.bf16.msra.mxu2 %v732_v14 }
 0x14b   : > { %1047 = vmatpush.bf16.msra.mxu2 %v731_v15 }
 0x14e   : > { %v659_v16 = vpop.f32.mrf.mxu0 }
 0x14f   : > { %1048 = vmatpush.bf16.msra.mxu2 %v730_v17  ;;  %v721_v29 = vpack.c.bf16 %v659_v16, %v657_v12  ;;  %v2051_v12 = vld [vmem:[%s2514_s15 + $0x24] sm:$0xf]  ;;  %v2073_v16 = vld [vmem:[%s2514_s15 + $0xd4] sm:$0xf] }
 0x153   : > { %1049 = vmatpush.bf16.msra.mxu2 %v729_v18 }
 0x156   : > { %v662_v19 = vpop.f32.mrf.mxu0 }
 0x15e   : > { %v664_v20 = vpop.f32.mrf.mxu0 }
 0x15f   : > { %v722_v28 = vpack.c.bf16 %v664_v20, %v662_v19  ;;  %v1933_v19 = vld [vmem:[%s2514_s15 + $0x50] sm:$0xf]  ;;  %v2058_v20 = vld [vmem:[%s2514_s15 + $0x54] sm:$0xf0] }
 0x166   : > { %v667_v21 = vpop.f32.mrf.mxu0 }
 0x16e   : > { %v669_v22 = vpop.f32.mrf.mxu0 }
 0x16f   : > { %v723_v26 = vpack.c.bf16 %v669_v22, %v667_v21  ;;  %v2053_v21 = vld [vmem:[%s2514_s15 + $0x34] sm:$0xf]  ;;  %v1919_v22 = vld [vmem:[%s2514_s15 + $0x38] sm:$0xf0] }
 0x176   : > { %v672_v23 = vpop.f32.mrf.mxu0 }
 0x17e   : > { %v674_v24 = vpop.f32.mrf.mxu0 }
 0x17f   : > { %v724_v25 = vpack.c.bf16 %v674_v24, %v672_v23  ;;  %v1934_v23 = vor.u32 %v2058_v20, %v1933_v19  ;;  %v1922_v24 = vor.u32 %v2053_v21, %v1919_v22 }
 0x181   : > { %957 = vmatpush.bf16.msra.mxu1 %v724_v25  ;;  %2087 = vmatpush.bf16.msrb.mxu3 %v724_v25  ;;  %v2075_v25 = vld [vmem:[%s2514_s15 + $0xe4] sm:$0xf] }
 0x185   : > { %958 = vmatpush.bf16.msra.mxu1 %v723_v26  ;;  %2088 = vmatpush.bf16.msrb.mxu3 %v723_v26  ;;  %v2007_v26 = vld [vmem:[%s2514_s15 + $0xe8] sm:$0xf0] }
 0x186   : > { %v677_v27 = vpop.f32.mrf.mxu0 }
 0x189   : > { %959 = vmatpush.bf16.msra.mxu1 %v722_v28  ;;  %2089 = vmatpush.bf16.msrb.mxu3 %v722_v28  ;;  %v1941_v28 = vld [vmem:[%s2514_s15 + $0x60] sm:$0xf] }
 0x18d   : > { %960 = vmatpush.bf16.msra.mxu1 %v721_v29  ;;  %2090 = vmatpush.bf16.msrb.mxu3 %v721_v29  ;;  %v2060_v29 = vld [vmem:[%s2514_s15 + $0x64] sm:$0xf0] }
 0x18e   : > { %v679_v30 = vpop.f32.mrf.mxu0 }
 0x18f   : > { %v725_v60 = vpack.c.bf16 %v679_v30, %v677_v27  ;;  %v2010_v27 = vor.u32 %v2075_v25, %v2007_v26  ;;  %v2055_v30 = vld [vmem:[%s2514_s15 + $0x44] sm:$0xf]  ;;  %v735_v25 = vld [vmem:[%s2512_s8 + $0x10] sm:$0xff] }
 0x191   : > { %961 = vmatpush.bf16.msra.mxu1 %v720_v10  ;;  %2091 = vmatpush.bf16.msrb.mxu3 %v720_v10  ;;  %v1925_v10 = vld [vmem:[%s2514_s15 + $0x40] sm:$0xf] }
 0x195   : > { %962 = vmatpush.bf16.msra.mxu1 %v719_v4  ;;  %2092 = vmatpush.bf16.msrb.mxu3 %v719_v4  ;;  %v1903_v4 = vld [vmem:[%s2514_s15 + $0x18] sm:$0xf0] }
 0x196   : > { %v682_v31 = vpop.f32.mrf.mxu0  ;;  %v1906_v6 = vor.u32 %v2049_v3, %v1903_v4  ;;  %v2068_v3 = vld [vmem:[%s2514_s15 + $0xa4] sm:$0xf0] }
 0x199   : > { %963 = vmatpush.bf16.msra.mxu1 %v718_v62  ;;  %2093 = vmatpush.bf16.msrb.mxu3 %v718_v62  ;;  %v2013_v62 = vld [vmem:[%s2514_s15 + $0xf0] sm:$0xf] }
 0x19a   : > { %v2014_v0 = vor.u32 %v2078_v63, %v2013_v62  ;;  %v2063_v63 = vld [vmem:[%s2514_s15 + $0x84] sm:$0xf] }
 0x19d   : > { %964 = vmatpush.bf16.msra.mxu1 %v717_v56  ;;  %2094 = vmatpush.bf16.msrb.mxu3 %v717_v56  ;;  %v2052_v56 = vld [vmem:[%s2514_s15 + $0x24] sm:$0xf0] }
 0x19e   : > { %v684_v32 = vpop.f32.mrf.mxu0  ;;  %v1910_v59 = vor.u32 %v2052_v56, %v1909_v55 }
 0x19f   : > { %v726_v54 = vpack.c.bf16 %v684_v32, %v682_v31  ;;  %v1927_v31 = vld [vmem:[%s2514_s15 + $0x48] sm:$0xf0]  ;;  %v1942_v32 = vor.u32 %v2060_v29, %v1941_v28 }
 0x1a0   : > { %1025 = vmatmul.bf16.vlgmr.msrb.gmra.mxu3 %v1990_v36  ;;  %965 = vmatmul.bf16.vlgmr.msra.gmra.mxu1 %v1894_v39  ;;  %v1930_v33 = vor.u32 %v2055_v30, %v1927_v31  ;;  %v2057_v39 = vld [vmem:[%s2514_s15 + $0x54] sm:$0xf]  ;;  %v2067_v30 = vld [vmem:[%s2514_s15 + $0xa4] sm:$0xf]  ;;  %v1975_v31 = vld [vmem:[%s2514_s15 + $0xa8] sm:$0xf0] }
 0x1a1   : > { %2095 = vmatpush.bf16.msra.mxu3 %v732_v14  ;;  %v1926_v14 = vor.u32 %v2056_v11, %v1925_v10 }
 0x1a5   : > { %2096 = vmatpush.bf16.msra.mxu3 %v731_v15  ;;  %v1914_v15 = vor.u32 %v2051_v12, %v1911_v13  ;;  %v2065_v13 = vld [vmem:[%s2514_s15 + $0x94] sm:$0xf] }
 0x1a6   : > { %v687_v35 = vpop.f32.mrf.mxu0 }
 0x1a9   : > { %2097 = vmatpush.bf16.msra.mxu3 %v730_v17  ;;  %v1999_v17 = vld [vmem:[%s2514_s15 + $0xd8] sm:$0xf0] }
 0x1ad   : > { %2098 = vmatpush.bf16.msra.mxu3 %v729_v18  ;;  %v2002_v18 = vor.u32 %v2073_v16, %v1999_v17  ;;  %v1981_v17 = vld [vmem:[%s2514_s15 + $0xb0] sm:$0xf] }
 0x1ae   : > { %v689_v40 = vpop.f32.mrf.mxu0 }
 0x1af   : > { %v727_v52 = vpack.c.bf16 %v689_v40, %v687_v35  ;;  %v2015_v35 = vld [vmem:[%s2514_s15 + $0xf8] sm:$0xf0] }
 0x1b0   : > { %1030 = vmatmul.bf16.gmra.mxu3 %v1998_v43  ;;  %970 = vmatmul.bf16.gmra.mxu1 %v1902_v47  ;;  %v2018_v36 = vor.u32 %v2077_v34, %v2015_v35  ;;  %v1935_v40 = vld [vmem:[%s2514_s15 + $0x58] sm:$0xf0]  ;;  %v1957_v43 = vld [vmem:[%s2514_s15 + $0x80] sm:$0xf] }
 0x1b1   : > { %v1938_v42 = vor.u32 %v2057_v39, %v1935_v40  ;;  %v757_v39 = vld [vmem:[%s2512_s8 + $0xc0] sm:$0xff] }
 0x1b6   : > { %v692_v44 = vpop.f32.mrf.mxu0 }
 0x1be   : > { %v694_v48 = vpop.f32.mrf.mxu0 }
 0x1bf   : > { %v728_v49 = vpack.c.bf16 %v694_v48, %v692_v44  ;;  %v2064_v44 = vld [vmem:[%s2514_s15 + $0x84] sm:$0xf0] }
 0x1c0   : > { %1035 = vmatmul.bf16.gmra.mxu3 %v2006_v53  ;;  %975 = vmatmul.bf16.gmra.mxu1 %v1910_v59  ;;  %v1958_v47 = vor.u32 %v2064_v44, %v1957_v43  ;;  %v2061_v53 = vld [vmem:[%s2514_s15 + $0x74] sm:$0xf] }
 0x1c1   : > { %1050 = vmatpush.bf16.msra.mxu2 %v728_v49  ;;  %2099 = vmatpush.bf16.msra.mxu3 %v728_v49 }
 0x1c5   : > { %1051 = vmatpush.bf16.msra.mxu2 %v727_v52  ;;  %2100 = vmatpush.bf16.msra.mxu3 %v727_v52 }
 0x1c9   : > { %1052 = vmatpush.bf16.msra.mxu2 %v726_v54  ;;  %2101 = vmatpush.bf16.msra.mxu3 %v726_v54  ;;  %v1951_v54 = vld [vmem:[%s2514_s15 + $0x78] sm:$0xf0] }
 0x1ca   : > { %v1954_v59 = vor.u32 %v2061_v53, %v1951_v54  ;;  %v2069_v53 = vld [vmem:[%s2514_s15 + $0xb4] sm:$0xf]  ;;  %v1983_v54 = vld [vmem:[%s2514_s15 + $0xb8] sm:$0xf0] }
 0x1cd   : > { %1053 = vmatpush.bf16.msra.mxu2 %v725_v60  ;;  %2102 = vmatpush.bf16.msra.mxu3 %v725_v60  ;;  %v1966_v60 = vor.u32 %v2066_v58, %v1965_v57  ;;  %v1986_v58 = vor.u32 %v2069_v53, %v1983_v54  ;;  %v746_v54 = vld [vmem:[%s2512_s8 + $0x68] sm:$0xff] }
 0x1d0   : > { %1054 = vmatmul.bf16.vlgmr.msra.gmra.mxu2 %v1898_v61  ;;  %1040 = vmatmul.bf16.gmra.mxu3 %v2014_v0  ;;  %v1959_v0 = vld [vmem:[%s2514_s15 + $0x88] sm:$0xf0] }
 0x1d1   : > { %980 = vmatmul.bf16.gmra.mxu1 %v1918_v5  ;;  %v1962_v4 = vor.u32 %v2063_v63, %v1959_v0  ;;  %v1974_v5 = vor.u32 %v2068_v3, %v1973_v2  ;;  %v739_v2 = vld [vmem:[%s2512_s8 + $0x30] sm:$0xff] }
 0x1e0   : > { %1059 = vmatmul.bf16.gmra.mxu2 %v1906_v6  ;;  %1114 = vmatmul.bf16.vlgmr.msra.gmra.mxu3 %v1994_v9 }
 0x1e1   : > { %985 = vmatmul.bf16.gmra.mxu1 %v1926_v14  ;;  %v1967_v14 = vld [vmem:[%s2514_s15 + $0x98] sm:$0xf0] }
 0x1e2   : > { %v1970_v20 = vor.u32 %v2065_v13, %v1967_v14 }
 0x1f0   : > { %1064 = vmatmul.bf16.gmra.mxu2 %v1914_v15  ;;  %1119 = vmatmul.bf16.gmra.mxu3 %v2002_v18  ;;  %v734_v15 = vld [vmem:[%s2512_s8 + $0x8] sm:$0xff]  ;;  %v2070_v18 = vld [vmem:[%s2514_s15 + $0xb4] sm:$0xf0] }
 0x1f1   : > { %990 = vmatmul.bf16.gmra.mxu1 %v1934_v23  ;;  %v1982_v22 = vor.u32 %v2070_v18, %v1981_v17  ;;  %v741_v18 = vld [vmem:[%s2512_s8 + $0x40] sm:$0xff] }
 0x200   : > { %1069 = vmatmul.bf16.gmra.mxu2 %v1922_v24  ;;  %1124 = vmatmul.bf16.gmra.mxu3 %v2010_v27 }
 0x201   : > { %995 = vmatmul.bf16.gmra.mxu1 %v1942_v32  ;;  %v736_v32 = vld [vmem:[%s2512_s8 + $0x18] sm:$0xff] }
 0x210   : > { %1074 = vmatmul.bf16.gmra.mxu2 %v1930_v33  ;;  %1129 = vmatmul.bf16.gmra.mxu3 %v2018_v36  ;;  %v1978_v36 = vor.u32 %v2067_v30, %v1975_v31 }
 0x211   : > { %1000 = vmatmul.bf16.gmra.mxu1 %v1950_v41 }
 0x21d   : > { %v966_v48 = vpop.f32.mrf.mxu1 }
 0x220   : > { %1079 = vmatmul.bf16.gmra.mxu2 %v1938_v42  ;;  %v737_v42 = vld [vmem:[%s2512_s8 + $0x20] sm:$0xff] }
 0x221   : > { %1005 = vmatmul.bf16.gmra.mxu1 %v1958_v47  ;;  %v758_v47 = vld [vmem:[%s2512_s8 + $0xc8] sm:$0xff] }
 0x223   : > { %v2637_v49 = vpop.f32.mrf.mxu3 }
 0x225   : > { %v968_v51 = vpop.f32.mrf.mxu1 }
 0x22b   : > { %v2639_v52 = vpop.f32.mrf.mxu3 }
 0x22d   : > { %v971_v55 = vpop.f32.mrf.mxu1 }
 0x230   : > { %1084 = vmatmul.bf16.gmra.mxu2 %v1946_v50 }
 0x231   : > { %1010 = vmatmul.bf16.gmra.mxu1 %v1966_v60 }
 0x233   : > { %v2643_v56 = vpop.f32.mrf.mxu3 }
 0x235   : > { %v973_v61 = vpop.f32.mrf.mxu1 }
 0x23b   : > { %v2647_v62 = vpop.f32.mrf.mxu3 }
 0x23d   : > { %v976_v6 = vpop.f32.mrf.mxu1 }
 0x240   : > { %1089 = vmatmul.bf16.gmra.mxu2 %v1954_v59 }
 0x241   : > { %1015 = vmatmul.bf16.gmra.mxu1 %v1974_v5 }
 0x243   : > { %v2651_v1 = vpop.f32.mrf.mxu3 }
 0x245   : > { %v978_v12 = vpop.f32.mrf.mxu1 }
 0x24b   : > { %v2656_v10 = vpop.f32.mrf.mxu3 }
 0x24e   : > { %v981_v24 = vpop.f32.mrf.mxu1 }
 0x250   : > { %1094 = vmatmul.bf16.gmra.mxu2 %v1962_v4 }
 0x251   : > { %1020 = vmatmul.bf16.gmra.mxu1 %v1982_v22 }
 0x253   : > { %v1055_v8 = vpop.f32.mrf.mxu2  ;;  %v2664_v21 = vpop.f32.mrf.mxu3 }
 0x254   : > { %v1056_v9 = vadd.f32 %v1055_v8, %v966_v48 }
 0x256   : > { %v1135_v11 = vadd.f32 %v1056_v9, %v733_v7  ;;  %v983_v34 = vpop.f32.mrf.mxu1 }
 0x258   : > { %1167 = vst [vmem:[%s2512_s8] sm:$0xff] %v1135_v11 }
 0x25b   : > { %v1057_v16 = vpop.f32.mrf.mxu2  ;;  %v2668_v28 = vpop.f32.mrf.mxu3 }
 0x25c   : > { %v1058_v19 = vadd.f32 %v1057_v16, %v968_v51  ;;  %v761_v16 = vld [vmem:[%s2512_s8 + $0xe0] sm:$0xff] }
 0x25e   : > { %v1136_v23 = vadd.f32 %v1058_v19, %v734_v15  ;;  %v986_v46 = vpop.f32.mrf.mxu1 }
 0x260   : > { %1168 = vst [vmem:[%s2512_s8 + $0x8] sm:$0xff] %v1136_v23  ;;  %1099 = vmatmul.bf16.gmra.mxu2 %v1970_v20 }
 0x263   : > { %v1060_v26 = vpop.f32.mrf.mxu2  ;;  %v1115_v37 = vpop.f32.mrf.mxu3 }
 0x264   : > { %v1061_v27 = vadd.f32 %v1060_v26, %v971_v55  ;;  %v1116_v40 = vadd.f32 %v1115_v37, %v2637_v49  ;;  %v738_v49 = vld [vmem:[%s2512_s8 + $0x28] sm:$0xff] }
 0x266   : > { %v1137_v29 = vadd.f32 %v1061_v27, %v735_v25  ;;  %v1159_v41 = vadd.f32 %v1116_v40, %v757_v39  ;;  %v764_v40 = vld [vmem:[%s2512_s8 + $0xf8] sm:$0xff] }
 0x268   : > { %1169 = vst [vmem:[%s2512_s8 + $0x10] sm:$0xff] %v1137_v29 }
 0x269   : > { %1191 = vst [vmem:[%s2512_s8 + $0xc0] sm:$0xff] %v1159_v41 }
 0x26b   : > { %v1062_v33 = vpop.f32.mrf.mxu2  ;;  %v1117_v45 = vpop.f32.mrf.mxu3 }
 0x26c   : > { %v1063_v35 = vadd.f32 %v1062_v33, %v973_v61  ;;  %v1118_v48 = vadd.f32 %v1117_v45, %v2639_v52  ;;  %v988_v61 = vpop.f32.mrf.mxu1  ;;  %v759_v52 = vld [vmem:[%s2512_s8 + $0xd0] sm:$0xff]  ;;  %v744_v45 = vld [vmem:[%s2512_s8 + $0x58] sm:$0xff] }
 0x26e   : > { %v1138_v38 = vadd.f32 %v1063_v35, %v736_v32  ;;  %v1160_v51 = vadd.f32 %v1118_v48, %v758_v47 }
 0x270   : > { %1170 = vst [vmem:[%s2512_s8 + $0x18] sm:$0xff] %v1138_v38  ;;  %1104 = vmatmul.bf16.gmra.mxu2 %v1978_v36  ;;  %v743_v36 = vld [vmem:[%s2512_s8 + $0x50] sm:$0xff] }
 0x271   : > { %1192 = vst [vmem:[%s2512_s8 + $0xc8] sm:$0xff] %v1160_v51 }
 0x273   : > { %v1065_v43 = vpop.f32.mrf.mxu2  ;;  %v1120_v59 = vpop.f32.mrf.mxu3 }
 0x274   : > { %v1066_v44 = vadd.f32 %v1065_v43, %v976_v6  ;;  %v1121_v63 = vadd.f32 %v1120_v59, %v2643_v56  ;;  %v760_v6 = vld [vmem:[%s2512_s8 + $0xd8] sm:$0xff]  ;;  %v991_v11 = vpop.f32.mrf.mxu1  ;;  %v747_v59 = vld [vmem:[%s2512_s8 + $0x70] sm:$0xff] }
 0x275   : > { %v740_v56 = vld [vmem:[%s2512_s8 + $0x38] sm:$0xff] }
 0x276   : > { %v1139_v50 = vadd.f32 %v1066_v44, %v737_v42  ;;  %v1161_v0 = vadd.f32 %v1121_v63, %v759_v52 }
 0x278   : > { %1171 = vst [vmem:[%s2512_s8 + $0x20] sm:$0xff] %v1139_v50  ;;  %v745_v50 = vld [vmem:[%s2512_s8 + $0x60] sm:$0xff] }
 0x279   : > { %1193 = vst [vmem:[%s2512_s8 + $0xd0] sm:$0xff] %v1161_v0  ;;  %v748_v0 = vld [vmem:[%s2512_s8 + $0x78] sm:$0xff] }
 0x27b   : > { %v1067_v55 = vpop.f32.mrf.mxu2  ;;  %v1122_v5 = vpop.f32.mrf.mxu3 }
 0x27c   : > { %v1068_v57 = vadd.f32 %v1067_v55, %v978_v12  ;;  %v1123_v7 = vadd.f32 %v1122_v5, %v2647_v62  ;;  %v993_v20 = vpop.f32.mrf.mxu1 }
 0x27e   : > { %v1140_v60 = vadd.f32 %v1068_v57, %v738_v49  ;;  %v1162_v9 = vadd.f32 %v1123_v7, %v760_v6  ;;  %v749_v6 = vld [vmem:[%s2512_s8 + $0x80] sm:$0xff] }
 0x280   : > { %1172 = vst [vmem:[%s2512_s8 + $0x28] sm:$0xff] %v1140_v60  ;;  %1109 = vmatmul.bf16.gmra.mxu2 %v1986_v58 }
 0x281   : > { %1194 = vst [vmem:[%s2512_s8 + $0xd8] sm:$0xff] %v1162_v9 }
 0x283   : > { %v1070_v3 = vpop.f32.mrf.mxu2  ;;  %v1125_v14 = vpop.f32.mrf.mxu3 }
 0x284   : > { %v1071_v4 = vadd.f32 %v1070_v3, %v981_v24  ;;  %v1126_v17 = vadd.f32 %v1125_v14, %v2651_v1  ;;  %v762_v24 = vld [vmem:[%s2512_s8 + $0xe8] sm:$0xff]  ;;  %v996_v32 = vpop.f32.mrf.mxu1 }
 0x285   : > { %v742_v1 = vld [vmem:[%s2512_s8 + $0x48] sm:$0xff] }
 0x286   : > { %v1141_v8 = vadd.f32 %v1071_v4, %v739_v2  ;;  %v1163_v62 = vadd.f32 %v1126_v17, %v761_v16  ;;  %v751_v16 = vld [vmem:[%s2512_s8 + $0x90] sm:$0xff] }
 0x288   : > { %1173 = vst [vmem:[%s2512_s8 + $0x30] sm:$0xff] %v1141_v8 }
 0x289   : > { %1195 = vst [vmem:[%s2512_s8 + $0xe0] sm:$0xff] %v1163_v62 }
 0x28b   : > { %v1072_v12 = vpop.f32.mrf.mxu2  ;;  %v1127_v23 = vpop.f32.mrf.mxu3 }
 0x28c   : > { %v1073_v13 = vadd.f32 %v1072_v12, %v983_v34  ;;  %v1128_v25 = vadd.f32 %v1127_v23, %v2656_v10  ;;  %v763_v34 = vld [vmem:[%s2512_s8 + $0xf0] sm:$0xff]  ;;  %v998_v43 = vpop.f32.mrf.mxu1 }
 0x28e   : > { %v1142_v15 = vadd.f32 %v1073_v13, %v740_v56  ;;  %v1164_v27 = vadd.f32 %v1128_v25, %v762_v24  ;;  %v750_v56 = vld [vmem:[%s2512_s8 + $0x88] sm:$0xff]  ;;  %v753_v25 = vld [vmem:[%s2512_s8 + $0xa0] sm:$0xff] }
 0x290   : > { %1174 = vst [vmem:[%s2512_s8 + $0x38] sm:$0xff] %v1142_v15 }
 0x291   : > { %1196 = vst [vmem:[%s2512_s8 + $0xe8] sm:$0xff] %v1164_v27 }
 0x293   : > { %v1075_v19 = vpop.f32.mrf.mxu2  ;;  %v1130_v31 = vpop.f32.mrf.mxu3 }
 0x294   : > { %v1076_v22 = vadd.f32 %v1075_v19, %v986_v46  ;;  %v1131_v35 = vadd.f32 %v1130_v31, %v2664_v21  ;;  %v1001_v48 = vpop.f32.mrf.mxu1  ;;  %v752_v19 = vld [vmem:[%s2512_s8 + $0x98] sm:$0xff] }
 0x296   : > { %v1143_v26 = vadd.f32 %v1076_v22, %v741_v18  ;;  %v1165_v10 = vadd.f32 %v1131_v35, %v763_v34  ;;  %v755_v35 = vld [vmem:[%s2512_s8 + $0xb0] sm:$0xff] }
 0x298   : > { %1175 = vst [vmem:[%s2512_s8 + $0x40] sm:$0xff] %v1143_v26 }
 0x299   : > { %1197 = vst [vmem:[%s2512_s8 + $0xf0] sm:$0xff] %v1165_v10 }
 0x29b   : > { %v1077_v29 = vpop.f32.mrf.mxu2  ;;  %v1132_v39 = vpop.f32.mrf.mxu3 }
 0x29c   : > { %v1078_v30 = vadd.f32 %v1077_v29, %v988_v61  ;;  %v1133_v41 = vadd.f32 %v1132_v39, %v2668_v28  ;;  %v1003_v55 = vpop.f32.mrf.mxu1  ;;  %v756_v39 = vld [vmem:[%s2512_s8 + $0xb8] sm:$0xff] }
 0x29e   : > { %v1144_v33 = vadd.f32 %v1078_v30, %v742_v1  ;;  %v1166_v44 = vadd.f32 %v1133_v41, %v764_v40  ;;  %v754_v30 = vld [vmem:[%s2512_s8 + $0xa8] sm:$0xff] }
 0x2a0   : > { %1176 = vst [vmem:[%s2512_s8 + $0x48] sm:$0xff] %v1144_v33 }
 0x2a1   : > { %1198 = vst [vmem:[%s2512_s8 + $0xf8] sm:$0xff] %v1166_v44 }
 0x2a3   : > { %v1080_v37 = vpop.f32.mrf.mxu2 }
 0x2a4   : > { %v1081_v38 = vadd.f32 %v1080_v37, %v991_v11  ;;  %v1006_v52 = vpop.f32.mrf.mxu1 }
 0x2a6   : > { %v1145_v42 = vadd.f32 %v1081_v38, %v743_v36 }
 0x2a8   : > { %1177 = vst [vmem:[%s2512_s8 + $0x50] sm:$0xff] %v1145_v42 }
 0x2ab   : > { %v1082_v21 = vpop.f32.mrf.mxu2 }
 0x2ac   : > { %v1083_v46 = vadd.f32 %v1082_v21, %v993_v20  ;;  %v1008_v5 = vpop.f32.mrf.mxu1 }
 0x2ae   : > { %v1146_v47 = vadd.f32 %v1083_v46, %v744_v45 }
 0x2b0   : > { %1178 = vst [vmem:[%s2512_s8 + $0x58] sm:$0xff] %v1146_v47 }
 0x2b3   : > { %v1085_v51 = vpop.f32.mrf.mxu2 }
 0x2b4   : > { %v1086_v28 = vadd.f32 %v1085_v51, %v996_v32  ;;  %v1011_v11 = vpop.f32.mrf.mxu1 }
 0x2b6   : > { %v1147_v53 = vadd.f32 %v1086_v28, %v745_v50 }
 0x2b8   : > { %1179 = vst [vmem:[%s2512_s8 + $0x60] sm:$0xff] %v1147_v53 }
 0x2bb   : > { %v1087_v49 = vpop.f32.mrf.mxu2 }
 0x2bc   : > { %v1088_v57 = vadd.f32 %v1087_v49, %v998_v43  ;;  %v1013_v15 = vpop.f32.mrf.mxu1 }
 0x2be   : > { %v1148_v58 = vadd.f32 %v1088_v57, %v746_v54 }
 0x2c0   : > { %1180 = vst [vmem:[%s2512_s8 + $0x68] sm:$0xff] %v1148_v58 }
 0x2c3   : > { %v1090_v60 = vpop.f32.mrf.mxu2 }
 0x2c4   : > { %v1091_v61 = vadd.f32 %v1090_v60, %v1001_v48  ;;  %v1016_v23 = vpop.f32.mrf.mxu1 }
 0x2c6   : > { %v1149_v63 = vadd.f32 %v1091_v61, %v747_v59 }
 0x2c8   : > { %1181 = vst [vmem:[%s2512_s8 + $0x70] sm:$0xff] %v1149_v63 }
 0x2cb   : > { %v1092_v2 = vpop.f32.mrf.mxu2 }
 0x2cc   : > { %v1093_v3 = vadd.f32 %v1092_v2, %v1003_v55  ;;  %v1018_v29 = vpop.f32.mrf.mxu1 }
 0x2ce   : > { %v1150_v4 = vadd.f32 %v1093_v3, %v748_v0 }
 0x2d0   : > { %1182 = vst [vmem:[%s2512_s8 + $0x78] sm:$0xff] %v1150_v4 }
 0x2d3   : > { %v1095_v7 = vpop.f32.mrf.mxu2 }
 0x2d4   : > { %v1096_v8 = vadd.f32 %v1095_v7, %v1006_v52  ;;  %v1021_v34 = vpop.f32.mrf.mxu1 }
 0x2d6   : > { %v1151_v9 = vadd.f32 %v1096_v8, %v749_v6 }
 0x2d8   : > { %1183 = vst [vmem:[%s2512_s8 + $0x80] sm:$0xff] %v1151_v9 }
 0x2db   : > { %v1097_v12 = vpop.f32.mrf.mxu2 }
 0x2dc   : > { %v1098_v13 = vadd.f32 %v1097_v12, %v1008_v5  ;;  %v1023_v38 = vpop.f32.mrf.mxu1 }
 0x2de   : > { %v1152_v14 = vadd.f32 %v1098_v13, %v750_v56 }
 0x2e0   : > { %1184 = vst [vmem:[%s2512_s8 + $0x88] sm:$0xff] %v1152_v14 }
 0x2e3   : > { %v1100_v17 = vpop.f32.mrf.mxu2 }
 0x2e4   : > { %v1101_v62 = vadd.f32 %v1100_v17, %v1011_v11 }
 0x2e6   : > { %v1153_v18 = vadd.f32 %v1101_v62, %v751_v16 }
 0x2e8   : > { %1185 = vst [vmem:[%s2512_s8 + $0x90] sm:$0xff] %v1153_v18 }
 0x2eb   : > { %v1102_v20 = vpop.f32.mrf.mxu2 }
 0x2ec   : > { %v1103_v22 = vadd.f32 %v1102_v20, %v1013_v15 }
 0x2ee   : > { %v1154_v24 = vadd.f32 %v1103_v22, %v752_v19 }
 0x2f0   : > { %1186 = vst [vmem:[%s2512_s8 + $0x98] sm:$0xff] %v1154_v24 }
 0x2f3   : > { %v1105_v26 = vpop.f32.mrf.mxu2 }
 0x2f4   : > { %v1106_v27 = vadd.f32 %v1105_v26, %v1016_v23 }
 0x2f6   : > { %v1155_v1 = vadd.f32 %v1106_v27, %v753_v25 }
 0x2f8   : > { %1187 = vst [vmem:[%s2512_s8 + $0xa0] sm:$0xff] %v1155_v1 }
 0x2fb   : > { %v1107_v31 = vpop.f32.mrf.mxu2 }
 0x2fc   : > { %v1108_v32 = vadd.f32 %v1107_v31, %v1018_v29 }
 0x2fe   : > { %v1156_v33 = vadd.f32 %v1108_v32, %v754_v30 }
 0x300   : > { %1188 = vst [vmem:[%s2512_s8 + $0xa8] sm:$0xff] %v1156_v33 }
 0x303   : > { %v1110_v10 = vpop.f32.mrf.mxu2 }
 0x304   : > { %v1111_v36 = vadd.f32 %v1110_v10, %v1021_v34 }
 0x306   : > { %v1157_v37 = vadd.f32 %v1111_v36, %v755_v35 }
 0x308   : > { %1189 = vst [vmem:[%s2512_s8 + $0xb0] sm:$0xff] %v1157_v37 }
 0x30b   : > { %v1112_v40 = vpop.f32.mrf.mxu2 }
 0x30c   : > { %v1113_v41 = vadd.f32 %v1112_v40, %v1023_v38  ;;  %1202 = sbr.rel (%p2019_p13) target bundleno = 1137 (0x471), region = 82 }
 0x30e   : > { %v1158_v42 = vadd.f32 %v1113_v41, %v756_v39 }
 0x310   : > { %1190 = vst [vmem:[%s2512_s8 + $0xb8] sm:$0xff] %v1158_v42 }
 0x311   : > { %v1207_v43 = vld [vmem:[%s2512_s8 + $0x20] sm:$0xff]  ;;  %v1271_v45 = vlaneseq  ;;  %v1205_v21 = vld [vmem:[%s2512_s8 + $0x10] sm:$0xff]  ;;  %v1208_v28 = vld [vmem:[%s2512_s8 + $0x28] sm:$0xff] }
 0x312   : > { %v2746_v44 = vld [vmem:[%s3254_s3] ss:$0 sm:$0xff]  ;;  %v1206_v53 = vld [vmem:[%s2512_s8 + $0x18] sm:$0xff]  ;;  %v1204_v54 = vld [vmem:[%s2512_s8 + $0x8] sm:$0xff] }
 0x313   : > { %v1203_v46 = vld [vmem:[%s2512_s8] sm:$0xff]  ;;  %v1243_v47 = vadd.f32 %v2746_v44, %v1207_v43  ;;  %v2751_v48 = vand.u32 127, %v1271_v45  ;;  %v1241_v50 = vadd.f32 %v2746_v44, %v1205_v21  ;;  %v1244_v58 = vadd.f32 %v2746_v44, %v1208_v28  ;;  %v1210_v2 = vld [vmem:[%s2512_s8 + $0x38] sm:$0xff]  ;;  %v1209_v3 = vld [vmem:[%s2512_s8 + $0x30] sm:$0xff] }
 0x314   : > { %v1239_v51 = vadd.f32 %v2746_v44, %v1203_v46  ;;  %v1242_v59 = vadd.f32 %v2746_v44, %v1206_v53  ;;  %v1240_v60 = vadd.f32 %v2746_v44, %v1204_v54  ;;  %v1211_v0 = vld [vmem:[%s2512_s8 + $0x40] sm:$0xff]  ;;  %v1246_v5 = vadd.f32 %v2746_v44, %v1210_v2  ;;  %v1214_v11 = vld [vmem:[%s2512_s8 + $0x58] sm:$0xff]  ;;  %v1213_v56 = vld [vmem:[%s2512_s8 + $0x50] sm:$0xff] }
 0x315   : > { %vm1273_vm0 = vcmp.lt.s32.totalorder %v2751_v48, 8  ;;  %v1247_v4 = vadd.f32 %v2746_v44, %v1211_v0  ;;  %v1245_v6 = vadd.f32 %v2746_v44, %v1209_v3  ;;  %v1212_v12 = vld [vmem:[%s2512_s8 + $0x48] sm:$0xff]  ;;  %v1250_v13 = vadd.f32 %v2746_v44, %v1214_v11  ;;  %v1217_v18 = vld [vmem:[%s2512_s8 + $0x70] sm:$0xff]  ;;  %v1215_v20 = vld [vmem:[%s2512_s8 + $0x60] sm:$0xff] }
 0x316   : > { %v2761_v49 = vsel %vm1273_vm0, %v1243_v47, -1e+30  ;;  %v2765_v55 = vsel %vm1273_vm0, %v1241_v50, -1e+30  ;;  %v2769_v57 = vsel %vm1273_vm0, %v1239_v51, -1e+30  ;;  %v1249_v14 = vadd.f32 %v2746_v44, %v1213_v56 }
 0x317   : > { %1314 = vmax.xlane.f32.xlu2 %v2761_v49  ;;  %1310 = vmax.xlane.f32.xlu1 %v2765_v55  ;;  %v2779_v61 = vsel %vm1273_vm0, %v1244_v58, -1e+30  ;;  %v2783_v52 = vsel %vm1273_vm0, %v1242_v59, -1e+30  ;;  %v2787_v63 = vsel %vm1273_vm0, %v1240_v60, -1e+30  ;;  %v1248_v15 = vadd.f32 %v2746_v44, %v1212_v12 }
 0x318   : > { %1306 = vmax.xlane.f32.xlu0 %v2769_v57  ;;  %v2800_v7 = vsel %vm1273_vm0, %v1247_v4, -1e+30  ;;  %v2804_v8 = vsel %vm1273_vm0, %v1246_v5, -1e+30  ;;  %v2808_v9 = vsel %vm1273_vm0, %v1245_v6, -1e+30  ;;  %v1253_v22 = vadd.f32 %v2746_v44, %v1217_v18 }
 0x319   : > { %v2821_v16 = vsel %vm1273_vm0, %v1250_v13, -1e+30  ;;  %v2825_v17 = vsel %vm1273_vm0, %v1249_v14, -1e+30  ;;  %v2829_v62 = vsel %vm1273_vm0, %v1248_v15, -1e+30  ;;  %v1251_v24 = vadd.f32 %v2746_v44, %v1215_v20 }
 0x31a   : > { %v1216_v19 = vld [vmem:[%s2512_s8 + $0x68] sm:$0xff]  ;;  %v2842_v25 = vsel %vm1273_vm0, %v1253_v22, -1e+30  ;;  %v1219_v29 = vld [vmem:[%s2512_s8 + $0x80] sm:$0xff]  ;;  %v1218_v30 = vld [vmem:[%s2512_s8 + $0x78] sm:$0xff] }
 0x31b   : > { %v1252_v23 = vadd.f32 %v2746_v44, %v1216_v19  ;;  %v2850_v27 = vsel %vm1273_vm0, %v1251_v24, -1e+30  ;;  %v1220_v1 = vld [vmem:[%s2512_s8 + $0x88] sm:$0xff]  ;;  %v1255_v32 = vadd.f32 %v2746_v44, %v1219_v29  ;;  %v1254_v33 = vadd.f32 %v2746_v44, %v1218_v30  ;;  %v1223_v36 = vld [vmem:[%s2512_s8 + $0xa0] sm:$0xff]  ;;  %v1222_v37 = vld [vmem:[%s2512_s8 + $0x98] sm:$0xff] }
 0x31c   : > { %v1256_v31 = vadd.f32 %v2746_v44, %v1220_v1  ;;  %v1221_v38 = vld [vmem:[%s2512_s8 + $0x90] sm:$0xff]  ;;  %v1259_v39 = vadd.f32 %v2746_v44, %v1223_v36  ;;  %v1258_v40 = vadd.f32 %v2746_v44, %v1222_v37  ;;  %v1226_v21 = vld [vmem:[%s2512_s8 + $0xb8] sm:$0xff]  ;;  %v1224_v47 = vld [vmem:[%s2512_s8 + $0xa8] sm:$0xff] }
 0x31d   : > { %v2846_v26 = vsel %vm1273_vm0, %v1252_v23, -1e+30  ;;  %v2867_v35 = vsel %vm1273_vm0, %v1255_v32, -1e+30  ;;  %v2871_v10 = vsel %vm1273_vm0, %v1254_v33, -1e+30  ;;  %v1257_v41 = vadd.f32 %v2746_v44, %v1221_v38 }
 0x31e   : > { %v2863_v34 = vsel %vm1273_vm0, %v1256_v31, -1e+30  ;;  %v2884_v42 = vsel %vm1273_vm0, %v1259_v39, -1e+30  ;;  %v2888_v43 = vsel %vm1273_vm0, %v1258_v40, -1e+30  ;;  %v1262_v50 = vadd.f32 %v2746_v44, %v1226_v21 }
 0x31f   : > { %1316 = vmax.xlane.f32.xlu2 %v2779_v61  ;;  %1312 = vmax.xlane.f32.xlu1 %v2783_v52  ;;  %v2892_v45 = vsel %vm1273_vm0, %v1257_v41, -1e+30  ;;  %v1225_v46 = vld [vmem:[%s2512_s8 + $0xb0] sm:$0xff]  ;;  %v1260_v28 = vadd.f32 %v2746_v44, %v1224_v47  ;;  %v1228_v60 = vld [vmem:[%s2512_s8 + $0xc8] sm:$0xff]  ;;  %v1227_v0 = vld [vmem:[%s2512_s8 + $0xc0] sm:$0xff] }
 0x320   : > { %1308 = vmax.xlane.f32.xlu0 %v2787_v63  ;;  %v1261_v51 = vadd.f32 %v2746_v44, %v1225_v46  ;;  %v2905_v53 = vsel %vm1273_vm0, %v1262_v50, -1e+30  ;;  %v1229_v59 = vld [vmem:[%s2512_s8 + $0xd0] sm:$0xff]  ;;  %v1264_v3 = vadd.f32 %v2746_v44, %v1228_v60  ;;  %v1263_v4 = vadd.f32 %v2746_v44, %v1227_v0  ;;  %v1232_v56 = vld [vmem:[%s2512_s8 + $0xe8] sm:$0xff]  ;;  %v1231_v12 = vld [vmem:[%s2512_s8 + $0xe0] sm:$0xff] }
 0x321   : > { %v2913_v58 = vsel %vm1273_vm0, %v1260_v28, -1e+30  ;;  %v1265_v2 = vadd.f32 %v2746_v44, %v1229_v59  ;;  %v1230_v13 = vld [vmem:[%s2512_s8 + $0xd8] sm:$0xff]  ;;  %v1268_v14 = vadd.f32 %v2746_v44, %v1232_v56  ;;  %v1267_v15 = vadd.f32 %v2746_v44, %v1231_v12  ;;  %v1233_v24 = vld [vmem:[%s2512_s8 + $0xf0] sm:$0xff] }
 0x322   : > { %v2909_v54 = vsel %vm1273_vm0, %v1261_v51, -1e+30  ;;  %v2930_v6 = vsel %vm1273_vm0, %v1264_v3, -1e+30  ;;  %v2934_v11 = vsel %vm1273_vm0, %v1263_v4, -1e+30  ;;  %v1266_v18 = vadd.f32 %v2746_v44, %v1230_v13 }
 0x323   : > { %v2926_v5 = vsel %vm1273_vm0, %v1265_v2, -1e+30  ;;  %v2947_v19 = vsel %vm1273_vm0, %v1268_v14, -1e+30  ;;  %v2951_v20 = vsel %vm1273_vm0, %v1267_v15, -1e+30  ;;  %v1269_v29 = vadd.f32 %v2746_v44, %v1233_v24 }
 0x324   : > { %v2955_v22 = vsel %vm1273_vm0, %v1266_v18, -1e+30  ;;  %v1234_v23 = vld [vmem:[%s2512_s8 + $0xf8] sm:$0xff] }
 0x325   : > { %v1270_v1 = vadd.f32 %v2746_v44, %v1234_v23  ;;  %v2970_v31 = vsel %vm1273_vm0, %v1269_v29, -1e+30 }
 0x327   : > { %1322 = vmax.xlane.f32.xlu2 %v2800_v7  ;;  %1320 = vmax.xlane.f32.xlu1 %v2804_v8  ;;  %v2966_v30 = vsel %vm1273_vm0, %v1270_v1, -1e+30 }
 0x328   : > { %1318 = vmax.xlane.f32.xlu0 %v2808_v9 }
 0x32f   : > { %1328 = vmax.xlane.f32.xlu2 %v2821_v16  ;;  %1326 = vmax.xlane.f32.xlu1 %v2825_v17 }
 0x330   : > { %1324 = vmax.xlane.f32.xlu0 %v2829_v62 }
 0x337   : > { %1334 = vmax.xlane.f32.xlu2 %v2842_v25  ;;  %1332 = vmax.xlane.f32.xlu1 %v2846_v26 }
 0x338   : > { %1330 = vmax.xlane.f32.xlu0 %v2850_v27 }
 0x33f   : > { %1340 = vmax.xlane.f32.xlu2 %v2863_v34  ;;  %1338 = vmax.xlane.f32.xlu1 %v2867_v35 }
 0x340   : > { %1336 = vmax.xlane.f32.xlu0 %v2871_v10 }
 0x347   : > { %1346 = vmax.xlane.f32.xlu2 %v2884_v42  ;;  %1344 = vmax.xlane.f32.xlu1 %v2888_v43 }
 0x348   : > { %1342 = vmax.xlane.f32.xlu0 %v2892_v45 }
 0x34f   : > { %1352 = vmax.xlane.f32.xlu2 %v2905_v53  ;;  %1350 = vmax.xlane.f32.xlu1 %v2909_v54 }
 0x350   : > { %1348 = vmax.xlane.f32.xlu0 %v2913_v58 }
 0x357   : > { %1358 = vmax.xlane.f32.xlu2 %v2926_v5  ;;  %1356 = vmax.xlane.f32.xlu1 %v2930_v6 }
 0x358   : > { %1354 = vmax.xlane.f32.xlu0 %v2934_v11 }
 0x35f   : > { %1364 = vmax.xlane.f32.xlu2 %v2947_v19  ;;  %1362 = vmax.xlane.f32.xlu1 %v2951_v20 }
 0x360   : > { %1360 = vmax.xlane.f32.xlu0 %v2955_v22 }
 0x367   : > { %1368 = vmax.xlane.f32.xlu1 %v2966_v30 }
 0x368   : > { %1366 = vmax.xlane.f32.xlu0 %v2970_v31 }
 0x38a   : > { %v1315_v32 = vpop.xlane.xlu2 %1314  ;;  %v1311_v33 = vpop.xlane.xlu1 %1310 }
 0x38b   : > { %v2975_v36 = vsub.f32 %v2765_v55, %v1311_v33  ;;  %v1307_v37 = vpop.xlane.xlu0 %1306  ;;  %v2994_v28 = vsub.f32 %v2761_v49, %v1315_v32 }
 0x38c   : > { %v2978_v44 = vsub.f32 %v2769_v57, %v1307_v37 }
 0x38d   : > { %v1406_v38 = vmul.f32 1.442695, %v2975_v36 }
 0x38e   : > { %v1402_v39 = vmul.f32 1.442695, %v2978_v44 }
 0x38f   : > { %2161 = vpow2.f32 %v1406_v38 }
 0x390   : > { %2163 = vpow2.f32 %v1402_v39 }
 0x392   : > { %v1317_v40 = vpop.xlane.xlu2 %1316  ;;  %v1313_v41 = vpop.xlane.xlu1 %1312 }
 0x393   : > { %v2983_v21 = vsub.f32 %v2779_v61, %v1317_v40  ;;  %v2986_v46 = vsub.f32 %v2783_v52, %v1313_v41  ;;  %v1309_v55 = vpop.xlane.xlu0 %1308  ;;  %v1410_v61 = vmul.f32 1.442695, %v2994_v28 }
 0x394   : > { %v2989_v47 = vsub.f32 %v2787_v63, %v1309_v55 }
 0x395   : > { %v1412_v57 = vmul.f32 1.442695, %v2983_v21  ;;  %v1408_v50 = vmul.f32 1.442695, %v2986_v46  ;;  %v2162_v51 = vpop.eup %2161 }
 0x396   : > { %v1404_v59 = vmul.f32 1.442695, %v2989_v47  ;;  %v2164_v60 = vpop.eup %2163  ;;  %1470 = vadd.xlane.f32.xlu1 %v2162_v51 }
 0x397   : > { %2165 = vpow2.f32 %v1412_v57  ;;  %1466 = vadd.xlane.f32.xlu2 %v2164_v60 }
 0x398   : > { %2167 = vpow2.f32 %v1408_v50 }
 0x399   : > { %2169 = vpow2.f32 %v1404_v59 }
 0x39a   : > { %v1323_v52 = vpop.xlane.xlu2 %1322  ;;  %v1321_v63 = vpop.xlane.xlu1 %1320  ;;  %2171 = vpow2.f32 %v1410_v61 }
 0x39b   : > { %v2999_v0 = vsub.f32 %v2800_v7, %v1323_v52  ;;  %v1319_v2 = vpop.xlane.xlu0 %1318  ;;  %v3007_v13 = vsub.f32 %v2804_v8, %v1321_v63 }
 0x39c   : > { %v3002_v3 = vsub.f32 %v2808_v9, %v1319_v2 }
 0x39d   : > { %v2166_v49 = vpop.eup %2165  ;;  %v1418_v4 = vmul.f32 1.442695, %v2999_v0  ;;  %v1416_v9 = vmul.f32 1.442695, %v3007_v13 }
 0x39e   : > { %v2168_v56 = vpop.eup %2167  ;;  %v1414_v12 = vmul.f32 1.442695, %v3002_v3  ;;  %1476 = vadd.xlane.f32.xlu1 %v2166_v49 }
 0x39f   : > { %v2170_v14 = vpop.eup %2169  ;;  %2173 = vpow2.f32 %v1418_v4  ;;  %1472 = vadd.xlane.f32.xlu2 %v2168_v56 }
 0x3a0   : > { %2175 = vpow2.f32 %v1414_v12  ;;  %1468 = vadd.xlane.f32.xlu0 %v2170_v14  ;;  %v2172_v24 = vpop.eup %2171 }
 0x3a1   : > { %2177 = vpow2.f32 %v1416_v9 }
 0x3a2   : > { %v1329_v7 = vpop.xlane.xlu2 %1328  ;;  %v1327_v15 = vpop.xlane.xlu1 %1326 }
 0x3a3   : > { %v3011_v18 = vsub.f32 %v2821_v16, %v1329_v7  ;;  %v1325_v23 = vpop.xlane.xlu0 %1324  ;;  %v3019_v37 = vsub.f32 %v2825_v17, %v1327_v15 }
 0x3a4   : > { %v3014_v1 = vsub.f32 %v2829_v62, %v1325_v23 }
 0x3a5   : > { %v2174_v8 = vpop.eup %2173  ;;  %v1424_v29 = vmul.f32 1.442695, %v3011_v18  ;;  %v1422_v38 = vmul.f32 1.442695, %v3019_v37 }
 0x3a6   : > { %v2176_v32 = vpop.eup %2175  ;;  %v1420_v33 = vmul.f32 1.442695, %v3014_v1  ;;  %1482 = vadd.xlane.f32.xlu1 %v2174_v8 }
 0x3a7   : > { %2179 = vpow2.f32 %v1424_v29  ;;  %1478 = vadd.xlane.f32.xlu2 %v2176_v32  ;;  %v2178_v41 = vpop.eup %2177 }
 0x3a8   : > { %2181 = vpow2.f32 %v1420_v33  ;;  %1474 = vadd.xlane.f32.xlu0 %v2172_v24 }
 0x3a9   : > { %2183 = vpow2.f32 %v1422_v38 }
 0x3aa   : > { %v1335_v16 = vpop.xlane.xlu2 %1334  ;;  %v1333_v62 = vpop.xlane.xlu1 %1332 }
 0x3ab   : > { %v3023_v39 = vsub.f32 %v2842_v25, %v1335_v16  ;;  %v1331_v40 = vpop.xlane.xlu0 %1330  ;;  %v3031_v59 = vsub.f32 %v2846_v26, %v1333_v62 }
 0x3ac   : > { %v3026_v55 = vsub.f32 %v2850_v27, %v1331_v40 }
 0x3ad   : > { %v2180_v57 = vpop.eup %2179  ;;  %v1430_v17 = vmul.f32 1.442695, %v3023_v39  ;;  %v1428_v60 = vmul.f32 1.442695, %v3031_v59 }
 0x3ae   : > { %v2182_v50 = vpop.eup %2181  ;;  %v1426_v51 = vmul.f32 1.442695, %v3026_v55  ;;  %1488 = vadd.xlane.f32.xlu1 %v2180_v57 }
 0x3af   : > { %2185 = vpow2.f32 %v1430_v17  ;;  %1484 = vadd.xlane.f32.xlu2 %v2182_v50  ;;  %v2184_v63 = vpop.eup %2183 }
 0x3b0   : > { %2187 = vpow2.f32 %v1426_v51  ;;  %1480 = vadd.xlane.f32.xlu0 %v2178_v41 }
 0x3b1   : > { %2189 = vpow2.f32 %v1428_v60 }
 0x3b2   : > { %v1341_v25 = vpop.xlane.xlu2 %1340  ;;  %v1339_v27 = vpop.xlane.xlu1 %1338 }
 0x3b3   : > { %v3035_v61 = vsub.f32 %v2863_v34, %v1341_v25  ;;  %v1337_v52 = vpop.xlane.xlu0 %1336  ;;  %v3043_v12 = vsub.f32 %v2867_v35, %v1339_v27 }
 0x3b4   : > { %v3038_v2 = vsub.f32 %v2871_v10, %v1337_v52 }
 0x3b5   : > { %v2186_v49 = vpop.eup %2185  ;;  %v1436_v26 = vmul.f32 1.442695, %v3035_v61  ;;  %v1434_v14 = vmul.f32 1.442695, %v3043_v12 }
 0x3b6   : > { %v2188_v4 = vpop.eup %2187  ;;  %v1432_v56 = vmul.f32 1.442695, %v3038_v2  ;;  %1494 = vadd.xlane.f32.xlu1 %v2186_v49 }
 0x3b7   : > { %2191 = vpow2.f32 %v1436_v26  ;;  %1490 = vadd.xlane.f32.xlu2 %v2188_v4  ;;  %v2190_v15 = vpop.eup %2189 }
 0x3b8   : > { %2193 = vpow2.f32 %v1432_v56  ;;  %1486 = vadd.xlane.f32.xlu0 %v2184_v63 }
 0x3b9   : > { %2195 = vpow2.f32 %v1434_v14 }
 0x3ba   : > { %v1347_v34 = vpop.xlane.xlu2 %1346  ;;  %v1345_v10 = vpop.xlane.xlu1 %1344 }
 0x3bb   : > { %v3047_v7 = vsub.f32 %v2884_v42, %v1347_v34  ;;  %v1343_v9 = vpop.xlane.xlu0 %1342  ;;  %v3055_v32 = vsub.f32 %v2888_v43, %v1345_v10 }
 0x3bc   : > { %v3050_v23 = vsub.f32 %v2892_v45, %v1343_v9 }
 0x3bd   : > { %v2192_v24 = vpop.eup %2191  ;;  %v1442_v35 = vmul.f32 1.442695, %v3047_v7  ;;  %v1440_v33 = vmul.f32 1.442695, %v3055_v32 }
 0x3be   : > { %v2194_v8 = vpop.eup %2193  ;;  %v1438_v29 = vmul.f32 1.442695, %v3050_v23  ;;  %1500 = vadd.xlane.f32.xlu1 %v2192_v24 }
 0x3bf   : > { %2197 = vpow2.f32 %v1442_v35  ;;  %1496 = vadd.xlane.f32.xlu2 %v2194_v8  ;;  %v2196_v62 = vpop.eup %2195 }
 0x3c0   : > { %2199 = vpow2.f32 %v1438_v29  ;;  %1492 = vadd.xlane.f32.xlu0 %v2190_v15 }
 0x3c1   : > { %2201 = vpow2.f32 %v1440_v33 }
 0x3c2   : > { %v1353_v42 = vpop.xlane.xlu2 %1352  ;;  %v1351_v45 = vpop.xlane.xlu1 %1350 }
 0x3c3   : > { %v3059_v16 = vsub.f32 %v2905_v53, %v1353_v42  ;;  %v1349_v38 = vpop.xlane.xlu0 %1348  ;;  %v3067_v50 = vsub.f32 %v2909_v54, %v1351_v45 }
 0x3c4   : > { %v3062_v40 = vsub.f32 %v2913_v58, %v1349_v38 }
 0x3c5   : > { %v2198_v41 = vpop.eup %2197  ;;  %v1448_v43 = vmul.f32 1.442695, %v3059_v16  ;;  %v1446_v51 = vmul.f32 1.442695, %v3067_v50 }
 0x3c6   : > { %v2200_v57 = vpop.eup %2199  ;;  %v1444_v17 = vmul.f32 1.442695, %v3062_v40  ;;  %1506 = vadd.xlane.f32.xlu1 %v2198_v41 }
 0x3c7   : > { %2203 = vpow2.f32 %v1448_v43  ;;  %1502 = vadd.xlane.f32.xlu2 %v2200_v57  ;;  %v2202_v27 = vpop.eup %2201 }
 0x3c8   : > { %2205 = vpow2.f32 %v1444_v17  ;;  %1498 = vadd.xlane.f32.xlu0 %v2196_v62 }
 0x3c9   : > { %2207 = vpow2.f32 %v1446_v51 }
 0x3ca   : > { %v1359_v53 = vpop.xlane.xlu2 %1358  ;;  %v1357_v58 = vpop.xlane.xlu1 %1356 }
 0x3cb   : > { %v3071_v25 = vsub.f32 %v2926_v5, %v1359_v53  ;;  %v1355_v60 = vpop.xlane.xlu0 %1354  ;;  %v3079_v4 = vsub.f32 %v2930_v6, %v1357_v58 }
 0x3cc   : > { %v3074_v52 = vsub.f32 %v2934_v11, %v1355_v60 }
 0x3cd   : > { %v2204_v63 = vpop.eup %2203  ;;  %v1454_v54 = vmul.f32 1.442695, %v3071_v25  ;;  %v1452_v56 = vmul.f32 1.442695, %v3079_v4 }
 0x3ce   : > { %v2206_v49 = vpop.eup %2205  ;;  %v1450_v26 = vmul.f32 1.442695, %v3074_v52  ;;  %1512 = vadd.xlane.f32.xlu1 %v2204_v63 }
 0x3cf   : > { %2209 = vpow2.f32 %v1454_v54  ;;  %1508 = vadd.xlane.f32.xlu2 %v2206_v49  ;;  %v2208_v10 = vpop.eup %2207 }
 0x3d0   : > { %2211 = vpow2.f32 %v1450_v26  ;;  %1504 = vadd.xlane.f32.xlu0 %v2202_v27 }
 0x3d1   : > { %2213 = vpow2.f32 %v1452_v56 }
 0x3d2   : > { %v1365_v5 = vpop.xlane.xlu2 %1364  ;;  %v1363_v11 = vpop.xlane.xlu1 %1362 }
 0x3d3   : > { %v3083_v34 = vsub.f32 %v2947_v19, %v1365_v5  ;;  %v1361_v14 = vpop.xlane.xlu0 %1360  ;;  %v3091_v8 = vsub.f32 %v2951_v20, %v1363_v11 }
 0x3d4   : > { %v3086_v9 = vsub.f32 %v2955_v22, %v1361_v14 }
 0x3d5   : > { %v2210_v15 = vpop.eup %2209  ;;  %v1460_v6 = vmul.f32 1.442695, %v3083_v34  ;;  %v1458_v19 = vmul.f32 1.442695, %v3091_v8 }
 0x3d6   : > { %v2212_v24 = vpop.eup %2211  ;;  %v1456_v35 = vmul.f32 1.442695, %v3086_v9  ;;  %1518 = vadd.xlane.f32.xlu1 %v2210_v15 }
 0x3d7   : > { %2215 = vpow2.f32 %v1460_v6  ;;  %1514 = vadd.xlane.f32.xlu2 %v2212_v24  ;;  %v2214_v22 = vpop.eup %2213 }
 0x3d8   : > { %2217 = vpow2.f32 %v1456_v35  ;;  %1510 = vadd.xlane.f32.xlu0 %v2208_v10 }
 0x3d9   : > { %2219 = vpow2.f32 %v1458_v19 }
 0x3da   : > { %v1369_v33 = vpop.xlane.xlu1 %1368 }
 0x3db   : > { %v1367_v29 = vpop.xlane.xlu0 %1366  ;;  %v3099_v20 = vsub.f32 %v2966_v30, %v1369_v33 }
 0x3dc   : > { %v3095_v42 = vsub.f32 %v2970_v31, %v1367_v29 }
 0x3dd   : > { %v2216_v45 = vpop.eup %2215  ;;  %v1464_v41 = vmul.f32 1.442695, %v3099_v20 }
 0x3de   : > { %v2218_v38 = vpop.eup %2217  ;;  %v1462_v62 = vmul.f32 1.442695, %v3095_v42  ;;  %1524 = vadd.xlane.f32.xlu1 %v2216_v45 }
 0x3df   : > { %1520 = vadd.xlane.f32.xlu2 %v2218_v38  ;;  %v2220_v43 = vpop.eup %2219 }
 0x3e0   : > { %2221 = vpow2.f32 %v1462_v62  ;;  %1516 = vadd.xlane.f32.xlu0 %v2214_v22 }
 0x3e1   : > { %2223 = vpow2.f32 %v1464_v41 }
 0x3e6   : > { %v2222_v57 = vpop.eup %2221 }
 0x3e7   : > { %1526 = vadd.xlane.f32.xlu2 %v2222_v57  ;;  %v2224_v31 = vpop.eup %2223 }
 0x3e8   : > { %1522 = vadd.xlane.f32.xlu0 %v2220_v43 }
 0x3f0   : > { %1528 = vadd.xlane.f32.xlu0 %v2224_v31 }
 0x409   : > { %v1471_v17 = vpop.xlane.xlu1 %1470 }
 0x40a   : > { %2225 = vlog2.f32 %v1471_v17  ;;  %v1467_v53 = vpop.xlane.xlu2 %1466 }
 0x40b   : > { %2227 = vlog2.f32 %v1467_v53 }
 0x410   : > { %v2226_v30 = vpop.eup %2225 }
 0x411   : > { %v2228_v51 = vpop.eup %2227  ;;  %v1535_v58 = vmul.f32 0.6931472, %v2226_v30  ;;  %v1477_v60 = vpop.xlane.xlu1 %1476 }
 0x412   : > { %v1531_v27 = vmul.f32 0.6931472, %v2228_v51  ;;  %2229 = vlog2.f32 %v1477_v60  ;;  %v1473_v63 = vpop.xlane.xlu2 %1472 }
 0x413   : > { %v1469_v54 = vpop.xlane.xlu0 %1468  ;;  %v1596_v49 = vsub.f32 %v2975_v36, %v1535_v58  ;;  %2231 = vlog2.f32 %v1473_v63 }
 0x414   : > { %v1594_v26 = vsub.f32 %v2978_v44, %v1531_v27  ;;  %2233 = vlog2.f32 %v1469_v54 }
 0x415   : > { %v1628_v5 = vsel %vm1273_vm0, %v1596_v49, 0.0 }
 0x416   : > { %1660 = vst [vmem:[%s2512_s8 + $0x10] sm:$0xff] %v1628_v5  ;;  %v1626_v56 = vsel %vm1273_vm0, %v1594_v26, 0.0 }
 0x417   : > { %1658 = vst [vmem:[%s2512_s8] sm:$0xff] %v1626_v56 }
 0x418   : > { %v2230_v11 = vpop.eup %2229 }
 0x419   : > { %v2232_v14 = vpop.eup %2231  ;;  %v1541_v10 = vmul.f32 0.6931472, %v2230_v11  ;;  %v1483_v15 = vpop.xlane.xlu1 %1482 }
 0x41a   : > { %v2234_v6 = vpop.eup %2233  ;;  %v1537_v36 = vmul.f32 0.6931472, %v2232_v14  ;;  %2235 = vlog2.f32 %v1483_v15  ;;  %v1479_v44 = vpop.xlane.xlu2 %1478 }
 0x41b   : > { %v1475_v24 = vpop.xlane.xlu0 %1474  ;;  %v1599_v35 = vsub.f32 %v2983_v21, %v1541_v10  ;;  %v1533_v19 = vmul.f32 0.6931472, %v2234_v6  ;;  %2237 = vlog2.f32 %v1479_v44 }
 0x41c   : > { %v1597_v29 = vsub.f32 %v2986_v46, %v1537_v36  ;;  %2239 = vlog2.f32 %v1475_v24 }
 0x41d   : > { %v1631_v22 = vsel %vm1273_vm0, %v1599_v35, 0.0  ;;  %v1595_v33 = vsub.f32 %v2989_v47, %v1533_v19 }
 0x41e   : > { %1663 = vst [vmem:[%s2512_s8 + $0x28] sm:$0xff] %v1631_v22  ;;  %v1629_v45 = vsel %vm1273_vm0, %v1597_v29, 0.0 }
 0x41f   : > { %1661 = vst [vmem:[%s2512_s8 + $0x18] sm:$0xff] %v1629_v45  ;;  %v1627_v38 = vsel %vm1273_vm0, %v1595_v33, 0.0 }
 0x420   : > { %v2236_v62 = vpop.eup %2235  ;;  %1659 = vst [vmem:[%s2512_s8 + $0x8] sm:$0xff] %v1627_v38 }
 0x421   : > { %v2238_v21 = vpop.eup %2237  ;;  %v1547_v41 = vmul.f32 0.6931472, %v2236_v62  ;;  %v1489_v46 = vpop.xlane.xlu1 %1488 }
 0x422   : > { %v2240_v43 = vpop.eup %2239  ;;  %v1543_v57 = vmul.f32 0.6931472, %v2238_v21  ;;  %2241 = vlog2.f32 %v1489_v46  ;;  %v1485_v47 = vpop.xlane.xlu2 %1484 }
 0x423   : > { %v1481_v31 = vpop.xlane.xlu0 %1480  ;;  %v1602_v17 = vsub.f32 %v2999_v0, %v1547_v41  ;;  %v1539_v53 = vmul.f32 0.6931472, %v2240_v43  ;;  %2243 = vlog2.f32 %v1485_v47 }
 0x424   : > { %v1600_v30 = vsub.f32 %v3002_v3, %v1543_v57  ;;  %2245 = vlog2.f32 %v1481_v31 }
 0x425   : > { %v1634_v51 = vsel %vm1273_vm0, %v1602_v17, 0.0  ;;  %v1598_v58 = vsub.f32 %v2994_v28, %v1539_v53 }
 0x426   : > { %1666 = vst [vmem:[%s2512_s8 + $0x40] sm:$0xff] %v1634_v51  ;;  %v1632_v60 = vsel %vm1273_vm0, %v1600_v30, 0.0 }
 0x427   : > { %1664 = vst [vmem:[%s2512_s8 + $0x30] sm:$0xff] %v1632_v60  ;;  %v1630_v27 = vsel %vm1273_vm0, %v1598_v58, 0.0 }
 0x428   : > { %v2242_v63 = vpop.eup %2241  ;;  %1662 = vst [vmem:[%s2512_s8 + $0x20] sm:$0xff] %v1630_v27 }
 0x429   : > { %v2244_v0 = vpop.eup %2243  ;;  %v1553_v54 = vmul.f32 0.6931472, %v2242_v63  ;;  %v1495_v3 = vpop.xlane.xlu1 %1494 }
 0x42a   : > { %v2246_v49 = vpop.eup %2245  ;;  %v1549_v26 = vmul.f32 0.6931472, %v2244_v0  ;;  %2247 = vlog2.f32 %v1495_v3  ;;  %v1491_v28 = vpop.xlane.xlu2 %1490 }
 0x42b   : > { %v1487_v5 = vpop.xlane.xlu0 %1486  ;;  %v1605_v56 = vsub.f32 %v3011_v18, %v1553_v54  ;;  %v1545_v11 = vmul.f32 0.6931472, %v2246_v49  ;;  %2249 = vlog2.f32 %v1491_v28 }
 0x42c   : > { %v1603_v14 = vsub.f32 %v3014_v1, %v1549_v26  ;;  %2251 = vlog2.f32 %v1487_v5 }
 0x42d   : > { %v1637_v10 = vsel %vm1273_vm0, %v1605_v56, 0.0  ;;  %v1601_v15 = vsub.f32 %v3007_v13, %v1545_v11 }
 0x42e   : > { %1669 = vst [vmem:[%s2512_s8 + $0x58] sm:$0xff] %v1637_v10  ;;  %v1635_v6 = vsel %vm1273_vm0, %v1603_v14, 0.0 }
 0x42f   : > { %1667 = vst [vmem:[%s2512_s8 + $0x48] sm:$0xff] %v1635_v6  ;;  %v1633_v36 = vsel %vm1273_vm0, %v1601_v15, 0.0 }
 0x430   : > { %v2248_v44 = vpop.eup %2247  ;;  %1665 = vst [vmem:[%s2512_s8 + $0x38] sm:$0xff] %v1633_v36 }
 0x431   : > { %v2250_v18 = vpop.eup %2249  ;;  %v1559_v24 = vmul.f32 0.6931472, %v2248_v44  ;;  %v1501_v1 = vpop.xlane.xlu1 %1500 }
 0x432   : > { %v2252_v35 = vpop.eup %2251  ;;  %v1555_v19 = vmul.f32 0.6931472, %v2250_v18  ;;  %2253 = vlog2.f32 %v1501_v1  ;;  %v1497_v13 = vpop.xlane.xlu2 %1496 }
 0x433   : > { %v1493_v29 = vpop.xlane.xlu0 %1492  ;;  %v1608_v22 = vsub.f32 %v3023_v39, %v1559_v24  ;;  %v1551_v33 = vmul.f32 0.6931472, %v2252_v35  ;;  %2255 = vlog2.f32 %v1497_v13 }
 0x434   : > { %v1606_v45 = vsub.f32 %v3026_v55, %v1555_v19  ;;  %2257 = vlog2.f32 %v1493_v29 }
 0x435   : > { %v1640_v38 = vsel %vm1273_vm0, %v1608_v22, 0.0  ;;  %v1604_v62 = vsub.f32 %v3019_v37, %v1551_v33 }
 0x436   : > { %1672 = vst [vmem:[%s2512_s8 + $0x70] sm:$0xff] %v1640_v38  ;;  %v1638_v21 = vsel %vm1273_vm0, %v1606_v45, 0.0 }
 0x437   : > { %1670 = vst [vmem:[%s2512_s8 + $0x60] sm:$0xff] %v1638_v21  ;;  %v1636_v41 = vsel %vm1273_vm0, %v1604_v62, 0.0 }
 0x438   : > { %v2254_v46 = vpop.eup %2253  ;;  %1668 = vst [vmem:[%s2512_s8 + $0x50] sm:$0xff] %v1636_v41 }
 0x439   : > { %v2256_v39 = vpop.eup %2255  ;;  %v1565_v43 = vmul.f32 0.6931472, %v2254_v46  ;;  %v1507_v55 = vpop.xlane.xlu1 %1506 }
 0x43a   : > { %v2258_v57 = vpop.eup %2257  ;;  %v1561_v47 = vmul.f32 0.6931472, %v2256_v39  ;;  %2259 = vlog2.f32 %v1507_v55  ;;  %v1503_v37 = vpop.xlane.xlu2 %1502 }
 0x43b   : > { %v1499_v31 = vpop.xlane.xlu0 %1498  ;;  %v1611_v17 = vsub.f32 %v3035_v61, %v1565_v43  ;;  %v1557_v53 = vmul.f32 0.6931472, %v2258_v57  ;;  %2261 = vlog2.f32 %v1503_v37 }
 0x43c   : > { %v1609_v30 = vsub.f32 %v3038_v2, %v1561_v47  ;;  %2263 = vlog2.f32 %v1499_v31 }
 0x43d   : > { %v1643_v51 = vsel %vm1273_vm0, %v1611_v17, 0.0  ;;  %v1607_v58 = vsub.f32 %v3031_v59, %v1557_v53 }
 0x43e   : > { %1675 = vst [vmem:[%s2512_s8 + $0x88] sm:$0xff] %v1643_v51  ;;  %v1641_v60 = vsel %vm1273_vm0, %v1609_v30, 0.0 }
 0x43f   : > { %1673 = vst [vmem:[%s2512_s8 + $0x78] sm:$0xff] %v1641_v60  ;;  %v1639_v27 = vsel %vm1273_vm0, %v1607_v58, 0.0 }
 0x440   : > { %v2260_v63 = vpop.eup %2259  ;;  %1671 = vst [vmem:[%s2512_s8 + $0x68] sm:$0xff] %v1639_v27 }
 0x441   : > { %v2262_v61 = vpop.eup %2261  ;;  %v1571_v0 = vmul.f32 0.6931472, %v2260_v63  ;;  %v1513_v2 = vpop.xlane.xlu1 %1512 }
 0x442   : > { %v2264_v54 = vpop.eup %2263  ;;  %v1567_v3 = vmul.f32 0.6931472, %v2262_v61  ;;  %2265 = vlog2.f32 %v1513_v2  ;;  %v1509_v59 = vpop.xlane.xlu2 %1508 }
 0x443   : > { %v1505_v49 = vpop.xlane.xlu0 %1504  ;;  %v1614_v26 = vsub.f32 %v3047_v7, %v1571_v0  ;;  %v1563_v28 = vmul.f32 0.6931472, %v2264_v54  ;;  %2267 = vlog2.f32 %v1509_v59 }
 0x444   : > { %v1612_v5 = vsub.f32 %v3050_v23, %v1567_v3  ;;  %2269 = vlog2.f32 %v1505_v49 }
 0x445   : > { %v1646_v56 = vsel %vm1273_vm0, %v1614_v26, 0.0  ;;  %v1610_v11 = vsub.f32 %v3043_v12, %v1563_v28 }
 0x446   : > { %1678 = vst [vmem:[%s2512_s8 + $0xa0] sm:$0xff] %v1646_v56  ;;  %v1644_v14 = vsel %vm1273_vm0, %v1612_v5, 0.0 }
 0x447   : > { %1676 = vst [vmem:[%s2512_s8 + $0x90] sm:$0xff] %v1644_v14  ;;  %v1642_v10 = vsel %vm1273_vm0, %v1610_v11, 0.0 }
 0x448   : > { %v2266_v15 = vpop.eup %2265  ;;  %1674 = vst [vmem:[%s2512_s8 + $0x80] sm:$0xff] %v1642_v10 }
 0x449   : > { %v2268_v7 = vpop.eup %2267  ;;  %v1577_v6 = vmul.f32 0.6931472, %v2266_v15  ;;  %v1519_v23 = vpop.xlane.xlu1 %1518 }
 0x44a   : > { %v2270_v36 = vpop.eup %2269  ;;  %v1573_v44 = vmul.f32 0.6931472, %v2268_v7  ;;  %2271 = vlog2.f32 %v1519_v23  ;;  %v1515_v12 = vpop.xlane.xlu2 %1514 }
 0x44b   : > { %v1511_v18 = vpop.xlane.xlu0 %1510  ;;  %v1617_v24 = vsub.f32 %v3059_v16, %v1577_v6  ;;  %v1569_v1 = vmul.f32 0.6931472, %v2270_v36  ;;  %2273 = vlog2.f32 %v1515_v12 }
 0x44c   : > { %v1615_v35 = vsub.f32 %v3062_v40, %v1573_v44  ;;  %2275 = vlog2.f32 %v1511_v18 }
 0x44d   : > { %v1649_v19 = vsel %vm1273_vm0, %v1617_v24, 0.0  ;;  %v1613_v13 = vsub.f32 %v3055_v32, %v1569_v1 }
 0x44e   : > { %1681 = vst [vmem:[%s2512_s8 + $0xb8] sm:$0xff] %v1649_v19  ;;  %v1647_v29 = vsel %vm1273_vm0, %v1615_v35, 0.0 }
 0x44f   : > { %1679 = vst [vmem:[%s2512_s8 + $0xa8] sm:$0xff] %v1647_v29  ;;  %v1645_v22 = vsel %vm1273_vm0, %v1613_v13, 0.0 }
 0x450   : > { %v2272_v33 = vpop.eup %2271  ;;  %1677 = vst [vmem:[%s2512_s8 + $0x98] sm:$0xff] %v1645_v22 }
 0x451   : > { %v2274_v16 = vpop.eup %2273  ;;  %v1583_v45 = vmul.f32 0.6931472, %v2272_v33  ;;  %v1525_v40 = vpop.xlane.xlu1 %1524 }
 0x452   : > { %v2276_v38 = vpop.eup %2275  ;;  %v1579_v62 = vmul.f32 0.6931472, %v2274_v16  ;;  %2277 = vlog2.f32 %v1525_v40  ;;  %v1521_v32 = vpop.xlane.xlu2 %1520 }
 0x453   : > { %v1517_v21 = vpop.xlane.xlu0 %1516  ;;  %v1620_v41 = vsub.f32 %v3071_v25, %v1583_v45  ;;  %v1575_v46 = vmul.f32 0.6931472, %v2276_v38  ;;  %2279 = vlog2.f32 %v1521_v32 }
 0x454   : > { %v1618_v39 = vsub.f32 %v3074_v52, %v1579_v62  ;;  %2281 = vlog2.f32 %v1517_v21 }
 0x455   : > { %v1652_v43 = vsel %vm1273_vm0, %v1620_v41, 0.0  ;;  %v1616_v55 = vsub.f32 %v3067_v50, %v1575_v46 }
 0x456   : > { %1684 = vst [vmem:[%s2512_s8 + $0xd0] sm:$0xff] %v1652_v43  ;;  %v1650_v57 = vsel %vm1273_vm0, %v1618_v39, 0.0 }
 0x457   : > { %1682 = vst [vmem:[%s2512_s8 + $0xc0] sm:$0xff] %v1650_v57  ;;  %v1648_v47 = vsel %vm1273_vm0, %v1616_v55, 0.0 }
 0x458   : > { %v2278_v25 = vpop.eup %2277  ;;  %1680 = vst [vmem:[%s2512_s8 + $0xb0] sm:$0xff] %v1648_v47 }
 0x459   : > { %v2280_v37 = vpop.eup %2279  ;;  %v1589_v52 = vmul.f32 0.6931472, %v2278_v25 }
 0x45a   : > { %v2282_v31 = vpop.eup %2281  ;;  %v1585_v17 = vmul.f32 0.6931472, %v2280_v37  ;;  %v1527_v53 = vpop.xlane.xlu2 %1526 }
 0x45b   : > { %v1523_v30 = vpop.xlane.xlu0 %1522  ;;  %v1623_v50 = vsub.f32 %v3083_v34, %v1589_v52  ;;  %v1581_v51 = vmul.f32 0.6931472, %v2282_v31  ;;  %2283 = vlog2.f32 %v1527_v53 }
 0x45c   : > { %v1621_v58 = vsub.f32 %v3086_v9, %v1585_v17  ;;  %2285 = vlog2.f32 %v1523_v30 }
 0x45d   : > { %v1655_v60 = vsel %vm1273_vm0, %v1623_v50, 0.0  ;;  %v1619_v27 = vsub.f32 %v3079_v4, %v1581_v51 }
 0x45e   : > { %1687 = vst [vmem:[%s2512_s8 + $0xe8] sm:$0xff] %v1655_v60  ;;  %v1653_v63 = vsel %vm1273_vm0, %v1621_v58, 0.0 }
 0x45f   : > { %1685 = vst [vmem:[%s2512_s8 + $0xd8] sm:$0xff] %v1653_v63  ;;  %v1651_v34 = vsel %vm1273_vm0, %v1619_v27, 0.0 }
 0x460   : > { %1683 = vst [vmem:[%s2512_s8 + $0xc8] sm:$0xff] %v1651_v34 }
 0x461   : > { %v2284_v61 = vpop.eup %2283 }
 0x462   : > { %v2286_v9 = vpop.eup %2285  ;;  %v1591_v0 = vmul.f32 0.6931472, %v2284_v61 }
 0x463   : > { %v1529_v2 = vpop.xlane.xlu0 %1528  ;;  %v1587_v54 = vmul.f32 0.6931472, %v2286_v9 }
 0x464   : > { %2287 = vlog2.f32 %v1529_v2  ;;  %v1624_v3 = vsub.f32 %v3095_v42, %v1591_v0 }
 0x465   : > { %v1622_v4 = vsub.f32 %v3091_v8, %v1587_v54 }
 0x466   : > { %v1656_v59 = vsel %vm1273_vm0, %v1624_v3, 0.0 }
 0x467   : > { %1688 = vst [vmem:[%s2512_s8 + $0xf0] sm:$0xff] %v1656_v59  ;;  %v1654_v49 = vsel %vm1273_vm0, %v1622_v4, 0.0 }
 0x468   : > { %1686 = vst [vmem:[%s2512_s8 + $0xe0] sm:$0xff] %v1654_v49 }
 0x46a   : > { %v2288_v26 = vpop.eup %2287 }
 0x46b   : > { %v1593_v28 = vmul.f32 0.6931472, %v2288_v26 }
 0x46d   : > { %v1625_v5 = vsub.f32 %v3099_v20, %v1593_v28 }
 0x46f   : > { %v1657_v56 = vsel %vm1273_vm0, %v1625_v5, 0.0 }
 0x470   : > { %1689 = vst [vmem:[%s2512_s8 + $0xf8] sm:$0xff] %v1657_v56 }
 0x471 PF: > { %s14_s21 = sadd.s32 1, %s2343_s21   ;;  %s3256_s15 = smov %s2323_s16 }
 0x472   : > { %p11_p0 = scmp.ge.s32.totalorder %s14_s21, 6   ;;  %s3257_s16 = smov %s2422_s28 }
 0x473   : > { %s3258_s17 = smov %s2335_s19  ;;  %s3259_s18 = smov %s2339_s20 }
 0x474   : > { %s3260_s19 = smov %s3263_s22  ;;  %s3261_s20 = smov %s3267_s23 }
 0x475   :  { %13 = sbr.rel (!%p11_p0) target bundleno = 4 (0x4), region = 120 }

// kernel: gcn_forward.3
= control target key start
LH: loop header
LB: loop body
LE: loop exit
PB: predicated region body
PF: predicated region fallthrough
CT: control target
= control target key end

     0   :  { %s2015_s15 = smov 0   ;;  %s2017_s16 = smov 0   ;;  %s2364_s0 = inlined_call_operand.vmem [shape: bf16[512,512], index: 0, kind: input, shape index: {}]   ;;  %s2365_s1 = inlined_call_operand.vmem [shape: bf16[512,128], index: 1, kind: input, shape index: {}]   ;;  %s2366_s2 = inlined_call_operand.vmem [shape: bf16[128,128], index: 2, kind: input, shape index: {}]   ;;  %s2367_s3 = inlined_call_operand.vmem [shape: f32[1,128], index: 3, kind: input, shape index: {}]   ;;  %s2368_s4 = inlined_call_operand.vmem [shape: bf16[512,128], index: 4, kind: output, shape index: {}]  }
   0x1   :  { %s2019_s17 = smov 0   ;;  %s2021_s18 = smov 0  }
   0x2   :  { %s2023_s19 = smov 0   ;;  %s2025_s20 = smov 0  }
   0x3   :  { %s2027_s21 = smov 0  }
   0x4 LB: > { %s23_s22 = sadd.s32 1, %s1979_s19  ;;  %s26_s23 = sadd.s32 1, %s1983_s20  ;;  %s1987_s21 = sphi %s2027_s21, %s14_s21   ;;  %s1983_s20 = sphi %s2025_s20, %s2374_s20   ;;  %s1979_s19 = sphi %s2023_s19, %s2373_s19   ;;  %s1975_s18 = sphi %s2021_s18, %s2372_s18   ;;  %s1971_s17 = sphi %s2019_s17, %s2371_s17   ;;  %s1967_s16 = sphi %s2017_s16, %s2370_s16   ;;  %s1963_s15 = sphi %s2015_s15, %s2369_s15  }
   0x5   : > { %p24_p0 = scmp.ge.s32.totalorder %s23_s22, 2  ;;  %p42_p1 = scmp.ne.s32.totalorder %s1967_s16, %s1963_s15 }
   0x6   : > { %p43_p2 = scmp.eq.s32.totalorder %s1987_s21, 0  ;;  %s35_s27 = sadd.s32 1, %s1967_s16 }
   0x7   : > { %s2376_s22 = smov (%p24_p0, %s23_s22), 0  ;;  %s2378_s23 = smov (!%p24_p0, %s26_s23), %s1983_s20 }
   0x8   : > { %p44_p3 = por %p43_p2, %p42_p1  ;;  %p28_p4 = scmp.ge.s32.totalorder %s2378_s23, 2 }
   0x9   : > { %s31_s24 = ssub.s32 %s1979_s19, %s2376_s22  ;;  %p1459_p6 = scmp.ge.s32.totalorder %s1987_s21, 4 }
   0xa   : > { %s2380_s23 = smov (%p28_p4, %s2378_s23), 0 }
   0xb   : > { %s30_s25 = ssub.s32 %s1983_s20, %s2380_s23  ;;  %168 = sbr.rel (%p1459_p6) target bundleno = 55 (0x37), region = 24 }
   0xc   : > { %s32_s26 = sor.u32 %s31_s24, %s30_s25 }
   0xd   : > { %p33_p5 = scmp.eq.s32.totalorder %s32_s26, 0 }
   0xf   : > { %s2066_s28 = scalar_select %p33_p5, %s1967_s16, %s35_s27  }
  0x10   : > { %171 = sbr.rel (!%p44_p3) target bundleno = 55 (0x37), region = 28  ;;  %s173_s29 = sand.u32 (%p44_p3), 1, %s1967_s16  }
  0x11   : > { %s1462_s30 = sshll.u32 (%p44_p3), %s1979_s19, 1  ;;  %s1460_s5 = sshll.u32 (%p44_p3), %s173_s29, 8 }
  0x12   : > { %s1699_s6 = sshll.u32 (%p44_p3), %s1983_s20, 7  ;;  %s2080_s12 = scalar_lea.vmem (%p44_p3), [#allocation3], %s1460_s5 }
  0x13   : > { %s179_s7 = sadd.s32 (%p44_p3), %s1699_s6, %s1462_s30 }
  0x14   : > { %s1464_s8 = sshll.u32 (%p44_p3), %s179_s7, 2 }
  0x15   : > { %s2075_s11 = scalar_lea.vmem %s2364_s0, %s1464_s8 }
  0x16   : > { %v272_v0 = vld [vmem:[%s2075_s11] sm:$0xff]  ;;  %v274_v1 = vld [vmem:[%s2075_s11 + $0x10] sm:$0xff] }
  0x17   : > { %v276_v2 = vld [vmem:[%s2075_s11 + $0x20] sm:$0xff]  ;;  %273 = vst [vmem:[%s2080_s12] sm:$0xff] %v272_v0  ;;  %v278_v3 = vld [vmem:[%s2075_s11 + $0x30] sm:$0xff] }
  0x18   : > { %275 = vst [vmem:[%s2080_s12 + $0x8] sm:$0xff] %v274_v1  ;;  %v280_v4 = vld [vmem:[%s2075_s11 + $0x40] sm:$0xff]  ;;  %v282_v5 = vld [vmem:[%s2075_s11 + $0x50] sm:$0xff] }
  0x19   : > { %277 = vst [vmem:[%s2080_s12 + $0x10] sm:$0xff] %v276_v2  ;;  %v284_v6 = vld [vmem:[%s2075_s11 + $0x60] sm:$0xff]  ;;  %v286_v7 = vld [vmem:[%s2075_s11 + $0x70] sm:$0xff] }
  0x1a   : > { %279 = vst [vmem:[%s2080_s12 + $0x18] sm:$0xff] %v278_v3  ;;  %v288_v8 = vld [vmem:[%s2075_s11 + $0x80] sm:$0xff]  ;;  %v290_v9 = vld [vmem:[%s2075_s11 + $0x90] sm:$0xff] }
  0x1b   : > { %281 = vst [vmem:[%s2080_s12 + $0x20] sm:$0xff] %v280_v4  ;;  %v292_v10 = vld [vmem:[%s2075_s11 + $0xa0] sm:$0xff]  ;;  %v294_v11 = vld [vmem:[%s2075_s11 + $0xb0] sm:$0xff] }
  0x1c   : > { %283 = vst [vmem:[%s2080_s12 + $0x28] sm:$0xff] %v282_v5  ;;  %v296_v12 = vld [vmem:[%s2075_s11 + $0xc0] sm:$0xff]  ;;  %v298_v13 = vld [vmem:[%s2075_s11 + $0xd0] sm:$0xff] }
  0x1d   : > { %285 = vst [vmem:[%s2080_s12 + $0x30] sm:$0xff] %v284_v6  ;;  %v300_v14 = vld [vmem:[%s2075_s11 + $0xe0] sm:$0xff]  ;;  %v302_v15 = vld [vmem:[%s2075_s11 + $0xf0] sm:$0xff] }
  0x1e   : > { %287 = vst [vmem:[%s2080_s12 + $0x38] sm:$0xff] %v286_v7  ;;  %v304_v16 = vld [vmem:[%s2075_s11 + $0x100] sm:$0xff]  ;;  %v306_v17 = vld [vmem:[%s2075_s11 + $0x110] sm:$0xff] }
  0x1f   : > { %289 = vst [vmem:[%s2080_s12 + $0x40] sm:$0xff] %v288_v8  ;;  %v308_v18 = vld [vmem:[%s2075_s11 + $0x120] sm:$0xff]  ;;  %v310_v19 = vld [vmem:[%s2075_s11 + $0x130] sm:$0xff] }
  0x20   : > { %291 = vst [vmem:[%s2080_s12 + $0x48] sm:$0xff] %v290_v9  ;;  %v312_v20 = vld [vmem:[%s2075_s11 + $0x140] sm:$0xff]  ;;  %v314_v21 = vld [vmem:[%s2075_s11 + $0x150] sm:$0xff] }
  0x21   : > { %293 = vst [vmem:[%s2080_s12 + $0x50] sm:$0xff] %v292_v10  ;;  %v316_v22 = vld [vmem:[%s2075_s11 + $0x160] sm:$0xff]  ;;  %v318_v23 = vld [vmem:[%s2075_s11 + $0x170] sm:$0xff] }
  0x22   : > { %295 = vst [vmem:[%s2080_s12 + $0x58] sm:$0xff] %v294_v11  ;;  %v320_v24 = vld [vmem:[%s2075_s11 + $0x180] sm:$0xff]  ;;  %v322_v25 = vld [vmem:[%s2075_s11 + $0x190] sm:$0xff] }
  0x23   : > { %297 = vst [vmem:[%s2080_s12 + $0x60] sm:$0xff] %v296_v12  ;;  %v324_v26 = vld [vmem:[%s2075_s11 + $0x1a0] sm:$0xff]  ;;  %v326_v27 = vld [vmem:[%s2075_s11 + $0x1b0] sm:$0xff] }
  0x24   : > { %299 = vst [vmem:[%s2080_s12 + $0x68] sm:$0xff] %v298_v13  ;;  %v328_v28 = vld [vmem:[%s2075_s11 + $0x1c0] sm:$0xff]  ;;  %v330_v29 = vld [vmem:[%s2075_s11 + $0x1d0] sm:$0xff] }
  0x25   : > { %301 = vst [vmem:[%s2080_s12 + $0x70] sm:$0xff] %v300_v14  ;;  %v332_v30 = vld [vmem:[%s2075_s11 + $0x1e0] sm:$0xff]  ;;  %v334_v31 = vld [vmem:[%s2075_s11 + $0x1f0] sm:$0xff] }
  0x26   : > { %303 = vst [vmem:[%s2080_s12 + $0x78] sm:$0xff] %v302_v15 }
  0x27   : > { %305 = vst [vmem:[%s2080_s12 + $0x80] sm:$0xff] %v304_v16 }
  0x28   : > { %307 = vst [vmem:[%s2080_s12 + $0x88] sm:$0xff] %v306_v17 }
  0x29   : > { %309 = vst [vmem:[%s2080_s12 + $0x90] sm:$0xff] %v308_v18 }
  0x2a   : > { %311 = vst [vmem:[%s2080_s12 + $0x98] sm:$0xff] %v310_v19 }
  0x2b   : > { %313 = vst [vmem:[%s2080_s12 + $0xa0] sm:$0xff] %v312_v20 }
  0x2c   : > { %315 = vst [vmem:[%s2080_s12 + $0xa8] sm:$0xff] %v314_v21 }
  0x2d   : > { %317 = vst [vmem:[%s2080_s12 + $0xb0] sm:$0xff] %v316_v22 }
  0x2e   : > { %319 = vst [vmem:[%s2080_s12 + $0xb8] sm:$0xff] %v318_v23 }
  0x2f   : > { %321 = vst [vmem:[%s2080_s12 + $0xc0] sm:$0xff] %v320_v24 }
  0x30   : > { %323 = vst [vmem:[%s2080_s12 + $0xc8] sm:$0xff] %v322_v25 }
  0x31   : > { %325 = vst [vmem:[%s2080_s12 + $0xd0] sm:$0xff] %v324_v26 }
  0x32   : > { %327 = vst [vmem:[%s2080_s12 + $0xd8] sm:$0xff] %v326_v27 }
  0x33   : > { %329 = vst [vmem:[%s2080_s12 + $0xe0] sm:$0xff] %v328_v28 }
  0x34   : > { %331 = vst [vmem:[%s2080_s12 + $0xe8] sm:$0xff] %v330_v29 }
  0x35   : > { %333 = vst [vmem:[%s2080_s12 + $0xf0] sm:$0xff] %v332_v30 }
  0x36   : > { %335 = vst [vmem:[%s2080_s12 + $0xf8] sm:$0xff] %v334_v31 }
  0x37 PF: > { %p1465_p7 = scmp.ge.s32.totalorder %s1987_s21, 1  ;;  %p349_p8 = scmp.lt.s32.totalorder %s1987_s21, 5 }
  0x39   : > { %p350_p9 = pnand %p1465_p7, %p349_p8 }
  0x3a   : > { %s356_s13 = sand.u32 (!%p350_p9), 1, %s1963_s15   ;;  %s1467_s14 = sshll.u32 (!%p350_p9), %s1971_s17, 5 }
  0x3b   : > { %353 = sbr.rel (%p350_p9) target bundleno = 811 (0x32b), region = 70  ;;  %s1466_s24 = sshll.u32 (!%p350_p9), %s356_s13, 8 }
  0x3c   : > { %p389_p10 = scmp.lt.s32.totalorder (!%p350_p9), %s1467_s14, 63  ;;  %s1469_s25 = sshll.u32 (!%p350_p9), %s1975_s18, 5 }
  0x3d   : > { %p395_p11 = scmp.lt.s32.totalorder (!%p350_p9), %s1469_s25, 63  ;;  %s2158_s15 = scalar_lea.vmem (!%p350_p9), [#allocation3], %s1466_s24 }
  0x3e   : > { %p1471_p12 = scmp.ne.s32.totalorder (!%p350_p9), %s1971_s17, 0 }
  0x40   : > { %s2382_s14 = smov (!%p389_p10, %s1467_s14), 63  ;;  %s2384_s25 = smov (!%p395_p11, %s1469_s25), 63 }
  0x41   : > { %s1468_s26 = sshll.u32 %s2382_s14, 2  ;;  %s1470_s5 = sshll.u32 %s2384_s25, 2 }
  0x42   : > { %s2151_s30 = scalar_lea.vmem %s2365_s1, %s1468_s26  ;;  %s2156_s8 = scalar_lea.vmem %s2368_s4, %s1470_s5 }
  0x43   : > { %403 = sbr.rel (%p1471_p12) target bundleno = 105 (0x69), region = 78 }
  0x48   : > { %v1989_v32 = vmov 0.0  }
  0x49   : > { %404 = vst [vmem:[#allocation2 + $0xb0] sm:$0xff] %v1989_v32 }
  0x4a   : > { %405 = vst [vmem:[#allocation2] sm:$0xff] %v1989_v32 }
  0x4b   : > { %406 = vst [vmem:[#allocation2 + $0xd8] sm:$0xff] %v1989_v32 }
  0x4c   : > { %407 = vst [vmem:[#allocation2 + $0x18] sm:$0xff] %v1989_v32 }
  0x4d   : > { %408 = vst [vmem:[#allocation2 + $0x50] sm:$0xff] %v1989_v32 }
  0x4e   : > { %409 = vst [vmem:[#allocation2 + $0x68] sm:$0xff] %v1989_v32 }
  0x4f   : > { %410 = vst [vmem:[#allocation2 + $0x30] sm:$0xff] %v1989_v32 }
  0x50   : > { %411 = vst [vmem:[#allocation2 + $0x48] sm:$0xff] %v1989_v32 }
  0x51   : > { %412 = vst [vmem:[#allocation2 + $0x80] sm:$0xff] %v1989_v32 }
  0x52   : > { %413 = vst [vmem:[#allocation2 + $0x88] sm:$0xff] %v1989_v32 }
  0x53   : > { %414 = vst [vmem:[#allocation2 + $0xe8] sm:$0xff] %v1989_v32 }
  0x54   : > { %415 = vst [vmem:[#allocation2 + $0xb8] sm:$0xff] %v1989_v32 }
  0x55   : > { %416 = vst [vmem:[#allocation2 + $0x60] sm:$0xff] %v1989_v32 }
  0x56   : > { %417 = vst [vmem:[#allocation2 + $0xf0] sm:$0xff] %v1989_v32 }
  0x57   : > { %418 = vst [vmem:[#allocation2 + $0x8] sm:$0xff] %v1989_v32 }
  0x58   : > { %419 = vst [vmem:[#allocation2 + $0x78] sm:$0xff] %v1989_v32 }
  0x59   : > { %420 = vst [vmem:[#allocation2 + $0x38] sm:$0xff] %v1989_v32 }
  0x5a   : > { %421 = vst [vmem:[#allocation2 + $0x58] sm:$0xff] %v1989_v32 }
  0x5b   : > { %422 = vst [vmem:[#allocation2 + $0x40] sm:$0xff] %v1989_v32 }
  0x5c   : > { %423 = vst [vmem:[#allocation2 + $0xc8] sm:$0xff] %v1989_v32 }
  0x5d   : > { %424 = vst [vmem:[#allocation2 + $0xe0] sm:$0xff] %v1989_v32 }
  0x5e   : > { %425 = vst [vmem:[#allocation2 + $0x90] sm:$0xff] %v1989_v32 }
  0x5f   : > { %426 = vst [vmem:[#allocation2 + $0x70] sm:$0xff] %v1989_v32 }
  0x60   : > { %427 = vst [vmem:[#allocation2 + $0xc0] sm:$0xff] %v1989_v32 }
  0x61   : > { %428 = vst [vmem:[#allocation2 + $0xa8] sm:$0xff] %v1989_v32 }
  0x62   : > { %429 = vst [vmem:[#allocation2 + $0xd0] sm:$0xff] %v1989_v32 }
  0x63   : > { %430 = vst [vmem:[#allocation2 + $0x10] sm:$0xff] %v1989_v32 }
  0x64   : > { %431 = vst [vmem:[#allocation2 + $0x28] sm:$0xff] %v1989_v32 }
  0x65   : > { %432 = vst [vmem:[#allocation2 + $0xa0] sm:$0xff] %v1989_v32 }
  0x66   : > { %433 = vst [vmem:[#allocation2 + $0xf8] sm:$0xff] %v1989_v32 }
  0x67   : > { %434 = vst [vmem:[#allocation2 + $0x20] sm:$0xff] %v1989_v32 }
  0x68   : > { %435 = vst [vmem:[#allocation2 + $0x98] sm:$0xff] %v1989_v32 }
  0x69 PF: > { %v1723_v33 = vld [vmem:[%s2366_s2 + $0x38] sm:$0xff]  ;;  %v1722_v34 = vld [vmem:[%s2366_s2 + $0x30] sm:$0xff]  ;;  %v1721_v35 = vld [vmem:[%s2366_s2 + $0x28] sm:$0xff]  ;;  %p1696_p13 = scmp.ne.s32.totalorder %s1971_s17, 1 }
  0x6a   : > { %628 = vmatpush.bf16.msra.mxu0 %v1723_v33  ;;  %1851 = vmatpush.bf16.msra.mxu3 %v1723_v33  ;;  %v1720_v36 = vld [vmem:[%s2366_s2 + $0x20] sm:$0xff]  ;;  %v1719_v37 = vld [vmem:[%s2366_s2 + $0x18] sm:$0xff]  ;;  %v1718_v38 = vld [vmem:[%s2366_s2 + $0x10] sm:$0xff] }
  0x6b   : > { %v1717_v39 = vld [vmem:[%s2366_s2 + $0x8] sm:$0xff]  ;;  %v1716_v40 = vld [vmem:[%s2366_s2] sm:$0xff]  ;;  %v1702_v45 = vld [vmem:[%s2151_s30 + $0x10] sm:$0xff] }
  0x6c   : > { %v1700_v41 = vld [vmem:[%s2151_s30] sm:$0xff]  ;;  %v1701_v43 = vld [vmem:[%s2151_s30 + $0x8] sm:$0xff]  ;;  %v1714_v46 = vld [vmem:[%s2151_s30 + $0x70] sm:$0xff] }
  0x6d   : > { %v1712_v42 = vld [vmem:[%s2151_s30 + $0x60] sm:$0xff]  ;;  %v1713_v44 = vld [vmem:[%s2151_s30 + $0x68] sm:$0xff]  ;;  %v1703_v47 = vld [vmem:[%s2151_s30 + $0x18] sm:$0xff] }
  0x6e   : > { %629 = vmatpush.bf16.msra.mxu0 %v1722_v34  ;;  %1852 = vmatpush.bf16.msra.mxu3 %v1722_v34  ;;  %v1715_v48 = vld [vmem:[%s2151_s30 + $0x78] sm:$0xff]  ;;  %v1704_v49 = vld [vmem:[%s2151_s30 + $0x20] sm:$0xff]  ;;  %v1705_v50 = vld [vmem:[%s2151_s30 + $0x28] sm:$0xff] }
  0x6f   : > { %v1706_v51 = vld [vmem:[%s2151_s30 + $0x30] sm:$0xff]  ;;  %v1707_v52 = vld [vmem:[%s2151_s30 + $0x38] sm:$0xff]  ;;  %v1708_v53 = vld [vmem:[%s2151_s30 + $0x40] sm:$0xff] }
  0x70   : > { %v1709_v58 = vld [vmem:[%s2151_s30 + $0x48] sm:$0xff]  ;;  %v1710_v0 = vld [vmem:[%s2151_s30 + $0x50] sm:$0xff]  ;;  %v1711_v6 = vld [vmem:[%s2151_s30 + $0x58] sm:$0xff] }
  0x71   : > { %v1666_v33 = vld [vmem:[%s2158_s15 + $0xc0] sm:$0xf]  ;;  %v1749_v34 = vld [vmem:[%s2158_s15 + $0xc4] sm:$0xf0] }
  0x72   : > { %630 = vmatpush.bf16.msra.mxu0 %v1721_v35  ;;  %1853 = vmatpush.bf16.msra.mxu3 %v1721_v35 }
  0x76   : > { %631 = vmatpush.bf16.msra.mxu0 %v1720_v36  ;;  %1854 = vmatpush.bf16.msra.mxu3 %v1720_v36  ;;  %v1667_v36 = vor.u32 %v1749_v34, %v1666_v33  ;;  %v1754_v34 = vld [vmem:[%s2158_s15 + $0xf4] sm:$0xf] }
  0x7a   : > { %632 = vmatpush.bf16.msra.mxu0 %v1719_v37  ;;  %1855 = vmatpush.bf16.msra.mxu3 %v1719_v37  ;;  %v1570_v37 = vld [vmem:[%s2158_s15] sm:$0xf] }
  0x7e   : > { %633 = vmatpush.bf16.msra.mxu0 %v1718_v38  ;;  %1856 = vmatpush.bf16.msra.mxu3 %v1718_v38  ;;  %v1725_v38 = vld [vmem:[%s2158_s15 + $0x4] sm:$0xf0] }
  0x82   : > { %634 = vmatpush.bf16.msra.mxu0 %v1717_v39  ;;  %1857 = vmatpush.bf16.msra.mxu3 %v1717_v39  ;;  %v1571_v39 = vor.u32 %v1725_v38, %v1570_v37  ;;  %v1626_v37 = vld [vmem:[%s2158_s15 + $0x70] sm:$0xf]  ;;  %v1739_v38 = vld [vmem:[%s2158_s15 + $0x74] sm:$0xf0] }
  0x86   : > { %635 = vmatpush.bf16.msra.mxu0 %v1716_v40  ;;  %1858 = vmatpush.bf16.msra.mxu3 %v1716_v40 }
  0x89   : > { %636 = vmatmul.bf16.vlgmr.msra.gmra.mxu0 %v1700_v41  ;;  %696 = vmatmul.bf16.vlgmr.msra.gmra.mxu3 %v1712_v42  ;;  %v1674_v41 = vld [vmem:[%s2158_s15 + $0xd0] sm:$0xf]  ;;  %v1751_v42 = vld [vmem:[%s2158_s15 + $0xd4] sm:$0xf0] }
  0x99   : > { %641 = vmatmul.bf16.gmra.mxu0 %v1701_v43  ;;  %701 = vmatmul.bf16.gmra.mxu3 %v1713_v44  ;;  %v1675_v43 = vor.u32 %v1751_v42, %v1674_v41  ;;  %v1627_v41 = vor.u32 %v1739_v38, %v1626_v37 }
  0xa9   : > { %646 = vmatmul.bf16.gmra.mxu0 %v1702_v45  ;;  %706 = vmatmul.bf16.gmra.mxu3 %v1714_v46  ;;  %v1578_v45 = vld [vmem:[%s2158_s15 + $0x10] sm:$0xf]  ;;  %v1727_v46 = vld [vmem:[%s2158_s15 + $0x14] sm:$0xf0] }
  0xb9   : > { %651 = vmatmul.bf16.gmra.mxu0 %v1703_v47  ;;  %711 = vmatmul.bf16.gmra.mxu3 %v1715_v48  ;;  %v1579_v47 = vor.u32 %v1727_v46, %v1578_v45  ;;  %v1736_v45 = vld [vmem:[%s2158_s15 + $0x64] sm:$0xf]  ;;  %v1620_v46 = vld [vmem:[%s2158_s15 + $0x68] sm:$0xf0] }
  0xc9   : > { %656 = vmatmul.bf16.gmra.mxu0 %v1704_v49 }
  0xd9   : > { %661 = vmatmul.bf16.gmra.mxu0 %v1705_v50  ;;  %v1682_v50 = vld [vmem:[%s2158_s15 + $0xe0] sm:$0xf] }
  0xe9   : > { %666 = vmatmul.bf16.gmra.mxu0 %v1706_v51  ;;  %v1753_v51 = vld [vmem:[%s2158_s15 + $0xe4] sm:$0xf0] }
  0xf9   : > { %671 = vmatmul.bf16.gmra.mxu0 %v1707_v52 }
 0x106   : > { %v637_v54 = vpop.f32.mrf.mxu0 }
 0x109   : > { %676 = vmatmul.bf16.gmra.mxu0 %v1708_v53  ;;  %v1683_v53 = vor.u32 %v1753_v51, %v1682_v50  ;;  %v1623_v50 = vor.u32 %v1736_v45, %v1620_v46 }
 0x10c   : > { %v697_v57 = vpop.f32.mrf.mxu3 }
 0x10e   : > { %v639_v55 = vpop.f32.mrf.mxu0 }
 0x10f   : > { %v717_v56 = vpack.c.bf16 %v639_v55, %v637_v54  ;;  %v1586_v55 = vld [vmem:[%s2158_s15 + $0x20] sm:$0xf] }
 0x114   : > { %v699_v60 = vpop.f32.mrf.mxu3 }
 0x115   : > { %v729_v18 = vpack.c.bf16 %v699_v60, %v697_v57  ;;  %v1724_v57 = vld [vmem:[%s2158_s15 + $0x4] sm:$0xf] }
 0x116   : > { %v642_v59 = vpop.f32.mrf.mxu0 }
 0x119   : > { %681 = vmatmul.bf16.gmra.mxu0 %v1709_v58  ;;  %v1572_v58 = vld [vmem:[%s2158_s15 + $0x8] sm:$0xf0] }
 0x11c   : > { %v702_v63 = vpop.f32.mrf.mxu3 }
 0x11e   : > { %v644_v61 = vpop.f32.mrf.mxu0 }
 0x11f   : > { %v718_v62 = vpack.c.bf16 %v644_v61, %v642_v59  ;;  %v1575_v61 = vor.u32 %v1724_v57, %v1572_v58  ;;  %v1642_v57 = vld [vmem:[%s2158_s15 + $0x90] sm:$0xf]  ;;  %v1743_v58 = vld [vmem:[%s2158_s15 + $0x94] sm:$0xf0] }
 0x124   : > { %v704_v2 = vpop.f32.mrf.mxu3 }
 0x125   : > { %v730_v17 = vpack.c.bf16 %v704_v2, %v702_v63  ;;  %v1755_v63 = vld [vmem:[%s2158_s15 + $0xf4] sm:$0xf0] }
 0x126   : > { %v647_v1 = vpop.f32.mrf.mxu0  ;;  %v1731_v2 = vld [vmem:[%s2158_s15 + $0x34] sm:$0xf0] }
 0x129   : > { %686 = vmatmul.bf16.gmra.mxu0 %v1710_v0 }
 0x12c   : > { %v707_v5 = vpop.f32.mrf.mxu3 }
 0x12e   : > { %v649_v3 = vpop.f32.mrf.mxu0 }
 0x12f   : > { %v719_v4 = vpack.c.bf16 %v649_v3, %v647_v1  ;;  %v1594_v1 = vld [vmem:[%s2158_s15 + $0x30] sm:$0xf]  ;;  %v1726_v3 = vld [vmem:[%s2158_s15 + $0x14] sm:$0xf] }
 0x134   : > { %v709_v8 = vpop.f32.mrf.mxu3 }
 0x135   : > { %v731_v15 = vpack.c.bf16 %v709_v8, %v707_v5  ;;  %v1595_v5 = vor.u32 %v1731_v2, %v1594_v1  ;;  %v1668_v8 = vld [vmem:[%s2158_s15 + $0xc8] sm:$0xf0]  ;;  %v1650_v2 = vld [vmem:[%s2158_s15 + $0xa0] sm:$0xf] }
 0x136   : > { %v652_v7 = vpop.f32.mrf.mxu0 }
 0x139   : > { %691 = vmatmul.bf16.gmra.mxu0 %v1711_v6 }
 0x13c   : > { %v712_v11 = vpop.f32.mrf.mxu3 }
 0x13e   : > { %v654_v9 = vpop.f32.mrf.mxu0 }
 0x13f   : > { %v720_v10 = vpack.c.bf16 %v654_v9, %v652_v7  ;;  %v1748_v7 = vld [vmem:[%s2158_s15 + $0xc4] sm:$0xf] }
 0x140   : > { %v1671_v9 = vor.u32 %v1748_v7, %v1668_v8  ;;  %v733_v7 = vld [vmem:[#allocation2 + $0xb0] sm:$0xff] }
 0x144   : > { %v714_v13 = vpop.f32.mrf.mxu3 }
 0x145   : > { %v732_v14 = vpack.c.bf16 %v714_v13, %v712_v11  ;;  %v1733_v11 = vld [vmem:[%s2158_s15 + $0x44] sm:$0xf0]  ;;  %v1588_v13 = vld [vmem:[%s2158_s15 + $0x28] sm:$0xf0] }
 0x146   : > { %v657_v12 = vpop.f32.mrf.mxu0 }
 0x147   : > { %1046 = vmatpush.bf16.msra.mxu2 %v732_v14 }
 0x14b   : > { %1047 = vmatpush.bf16.msra.mxu2 %v731_v15 }
 0x14e   : > { %v659_v16 = vpop.f32.mrf.mxu0 }
 0x14f   : > { %1048 = vmatpush.bf16.msra.mxu2 %v730_v17  ;;  %v721_v29 = vpack.c.bf16 %v659_v16, %v657_v12  ;;  %v1728_v12 = vld [vmem:[%s2158_s15 + $0x24] sm:$0xf]  ;;  %v1750_v16 = vld [vmem:[%s2158_s15 + $0xd4] sm:$0xf] }
 0x153   : > { %1049 = vmatpush.bf16.msra.mxu2 %v729_v18 }
 0x156   : > { %v662_v19 = vpop.f32.mrf.mxu0 }
 0x15e   : > { %v664_v20 = vpop.f32.mrf.mxu0 }
 0x15f   : > { %v722_v28 = vpack.c.bf16 %v664_v20, %v662_v19  ;;  %v1610_v19 = vld [vmem:[%s2158_s15 + $0x50] sm:$0xf]  ;;  %v1735_v20 = vld [vmem:[%s2158_s15 + $0x54] sm:$0xf0] }
 0x166   : > { %v667_v21 = vpop.f32.mrf.mxu0 }
 0x16e   : > { %v669_v22 = vpop.f32.mrf.mxu0 }
 0x16f   : > { %v723_v26 = vpack.c.bf16 %v669_v22, %v667_v21  ;;  %v1730_v21 = vld [vmem:[%s2158_s15 + $0x34] sm:$0xf]  ;;  %v1596_v22 = vld [vmem:[%s2158_s15 + $0x38] sm:$0xf0] }
 0x176   : > { %v672_v23 = vpop.f32.mrf.mxu0 }
 0x17e   : > { %v674_v24 = vpop.f32.mrf.mxu0 }
 0x17f   : > { %v724_v25 = vpack.c.bf16 %v674_v24, %v672_v23  ;;  %v1611_v23 = vor.u32 %v1735_v20, %v1610_v19  ;;  %v1599_v24 = vor.u32 %v1730_v21, %v1596_v22 }
 0x181   : > { %957 = vmatpush.bf16.msra.mxu1 %v724_v25  ;;  %1859 = vmatpush.bf16.msrb.mxu3 %v724_v25  ;;  %v1752_v25 = vld [vmem:[%s2158_s15 + $0xe4] sm:$0xf] }
 0x185   : > { %958 = vmatpush.bf16.msra.mxu1 %v723_v26  ;;  %1860 = vmatpush.bf16.msrb.mxu3 %v723_v26  ;;  %v1684_v26 = vld [vmem:[%s2158_s15 + $0xe8] sm:$0xf0] }
 0x186   : > { %v677_v27 = vpop.f32.mrf.mxu0 }
 0x189   : > { %959 = vmatpush.bf16.msra.mxu1 %v722_v28  ;;  %1861 = vmatpush.bf16.msrb.mxu3 %v722_v28  ;;  %v1618_v28 = vld [vmem:[%s2158_s15 + $0x60] sm:$0xf] }
 0x18d   : > { %960 = vmatpush.bf16.msra.mxu1 %v721_v29  ;;  %1862 = vmatpush.bf16.msrb.mxu3 %v721_v29  ;;  %v1737_v29 = vld [vmem:[%s2158_s15 + $0x64] sm:$0xf0] }
 0x18e   : > { %v679_v30 = vpop.f32.mrf.mxu0 }
 0x18f   : > { %v725_v60 = vpack.c.bf16 %v679_v30, %v677_v27  ;;  %v1687_v27 = vor.u32 %v1752_v25, %v1684_v26  ;;  %v1732_v30 = vld [vmem:[%s2158_s15 + $0x44] sm:$0xf]  ;;  %v735_v25 = vld [vmem:[#allocation2 + $0xd8] sm:$0xff] }
 0x191   : > { %961 = vmatpush.bf16.msra.mxu1 %v720_v10  ;;  %1863 = vmatpush.bf16.msrb.mxu3 %v720_v10  ;;  %v1602_v10 = vld [vmem:[%s2158_s15 + $0x40] sm:$0xf] }
 0x195   : > { %962 = vmatpush.bf16.msra.mxu1 %v719_v4  ;;  %1864 = vmatpush.bf16.msrb.mxu3 %v719_v4  ;;  %v1580_v4 = vld [vmem:[%s2158_s15 + $0x18] sm:$0xf0] }
 0x196   : > { %v682_v31 = vpop.f32.mrf.mxu0  ;;  %v1583_v6 = vor.u32 %v1726_v3, %v1580_v4  ;;  %v1745_v3 = vld [vmem:[%s2158_s15 + $0xa4] sm:$0xf0] }
 0x199   : > { %963 = vmatpush.bf16.msra.mxu1 %v718_v62  ;;  %1865 = vmatpush.bf16.msrb.mxu3 %v718_v62  ;;  %v1690_v62 = vld [vmem:[%s2158_s15 + $0xf0] sm:$0xf] }
 0x19a   : > { %v1691_v0 = vor.u32 %v1755_v63, %v1690_v62  ;;  %v1740_v63 = vld [vmem:[%s2158_s15 + $0x84] sm:$0xf] }
 0x19d   : > { %964 = vmatpush.bf16.msra.mxu1 %v717_v56  ;;  %1866 = vmatpush.bf16.msrb.mxu3 %v717_v56  ;;  %v1729_v56 = vld [vmem:[%s2158_s15 + $0x24] sm:$0xf0] }
 0x19e   : > { %v684_v32 = vpop.f32.mrf.mxu0  ;;  %v1587_v59 = vor.u32 %v1729_v56, %v1586_v55 }
 0x19f   : > { %v726_v54 = vpack.c.bf16 %v684_v32, %v682_v31  ;;  %v1604_v31 = vld [vmem:[%s2158_s15 + $0x48] sm:$0xf0]  ;;  %v1619_v32 = vor.u32 %v1737_v29, %v1618_v28 }
 0x1a0   : > { %1025 = vmatmul.bf16.vlgmr.msrb.gmra.mxu3 %v1667_v36  ;;  %965 = vmatmul.bf16.vlgmr.msra.gmra.mxu1 %v1571_v39  ;;  %v1607_v33 = vor.u32 %v1732_v30, %v1604_v31  ;;  %v1734_v39 = vld [vmem:[%s2158_s15 + $0x54] sm:$0xf]  ;;  %v1744_v30 = vld [vmem:[%s2158_s15 + $0xa4] sm:$0xf]  ;;  %v1652_v31 = vld [vmem:[%s2158_s15 + $0xa8] sm:$0xf0] }
 0x1a1   : > { %1867 = vmatpush.bf16.msra.mxu3 %v732_v14  ;;  %v1603_v14 = vor.u32 %v1733_v11, %v1602_v10 }
 0x1a5   : > { %1868 = vmatpush.bf16.msra.mxu3 %v731_v15  ;;  %v1591_v15 = vor.u32 %v1728_v12, %v1588_v13  ;;  %v1742_v13 = vld [vmem:[%s2158_s15 + $0x94] sm:$0xf] }
 0x1a6   : > { %v687_v35 = vpop.f32.mrf.mxu0 }
 0x1a9   : > { %1869 = vmatpush.bf16.msra.mxu3 %v730_v17  ;;  %v1676_v17 = vld [vmem:[%s2158_s15 + $0xd8] sm:$0xf0] }
 0x1ad   : > { %1870 = vmatpush.bf16.msra.mxu3 %v729_v18  ;;  %v1679_v18 = vor.u32 %v1750_v16, %v1676_v17  ;;  %v1658_v17 = vld [vmem:[%s2158_s15 + $0xb0] sm:$0xf] }
 0x1ae   : > { %v689_v40 = vpop.f32.mrf.mxu0 }
 0x1af   : > { %v727_v52 = vpack.c.bf16 %v689_v40, %v687_v35  ;;  %v1692_v35 = vld [vmem:[%s2158_s15 + $0xf8] sm:$0xf0] }
 0x1b0   : > { %1030 = vmatmul.bf16.gmra.mxu3 %v1675_v43  ;;  %970 = vmatmul.bf16.gmra.mxu1 %v1579_v47  ;;  %v1695_v36 = vor.u32 %v1754_v34, %v1692_v35  ;;  %v1612_v40 = vld [vmem:[%s2158_s15 + $0x58] sm:$0xf0]  ;;  %v1634_v43 = vld [vmem:[%s2158_s15 + $0x80] sm:$0xf] }
 0x1b1   : > { %v1615_v42 = vor.u32 %v1734_v39, %v1612_v40  ;;  %v757_v39 = vld [vmem:[#allocation2 + $0xa8] sm:$0xff] }
 0x1b6   : > { %v692_v44 = vpop.f32.mrf.mxu0 }
 0x1be   : > { %v694_v48 = vpop.f32.mrf.mxu0 }
 0x1bf   : > { %v728_v49 = vpack.c.bf16 %v694_v48, %v692_v44  ;;  %v1741_v44 = vld [vmem:[%s2158_s15 + $0x84] sm:$0xf0] }
 0x1c0   : > { %1035 = vmatmul.bf16.gmra.mxu3 %v1683_v53  ;;  %975 = vmatmul.bf16.gmra.mxu1 %v1587_v59  ;;  %v1635_v47 = vor.u32 %v1741_v44, %v1634_v43  ;;  %v1738_v53 = vld [vmem:[%s2158_s15 + $0x74] sm:$0xf] }
 0x1c1   : > { %1050 = vmatpush.bf16.msra.mxu2 %v728_v49  ;;  %1871 = vmatpush.bf16.msra.mxu3 %v728_v49 }
 0x1c5   : > { %1051 = vmatpush.bf16.msra.mxu2 %v727_v52  ;;  %1872 = vmatpush.bf16.msra.mxu3 %v727_v52 }
 0x1c9   : > { %1052 = vmatpush.bf16.msra.mxu2 %v726_v54  ;;  %1873 = vmatpush.bf16.msra.mxu3 %v726_v54  ;;  %v1628_v54 = vld [vmem:[%s2158_s15 + $0x78] sm:$0xf0] }
 0x1ca   : > { %v1631_v59 = vor.u32 %v1738_v53, %v1628_v54  ;;  %v1746_v53 = vld [vmem:[%s2158_s15 + $0xb4] sm:$0xf]  ;;  %v1660_v54 = vld [vmem:[%s2158_s15 + $0xb8] sm:$0xf0] }
 0x1cd   : > { %1053 = vmatpush.bf16.msra.mxu2 %v725_v60  ;;  %1874 = vmatpush.bf16.msra.mxu3 %v725_v60  ;;  %v1643_v60 = vor.u32 %v1743_v58, %v1642_v57 }
 0x1d0   : > { %1054 = vmatmul.bf16.vlgmr.msra.gmra.mxu2 %v1575_v61  ;;  %1040 = vmatmul.bf16.gmra.mxu3 %v1691_v0  ;;  %v1636_v0 = vld [vmem:[%s2158_s15 + $0x88] sm:$0xf0] }
 0x1d1   : > { %980 = vmatmul.bf16.gmra.mxu1 %v1595_v5  ;;  %v1639_v4 = vor.u32 %v1740_v63, %v1636_v0  ;;  %v1651_v5 = vor.u32 %v1745_v3, %v1650_v2  ;;  %v759_v63 = vld [vmem:[#allocation2 + $0x10] sm:$0xff] }
 0x1e0   : > { %1059 = vmatmul.bf16.gmra.mxu2 %v1583_v6  ;;  %1114 = vmatmul.bf16.vlgmr.msra.gmra.mxu3 %v1671_v9 }
 0x1e1   : > { %985 = vmatmul.bf16.gmra.mxu1 %v1603_v14  ;;  %v1644_v14 = vld [vmem:[%s2158_s15 + $0x98] sm:$0xf0] }
 0x1e2   : > { %v1647_v20 = vor.u32 %v1742_v13, %v1644_v14 }
 0x1f0   : > { %1064 = vmatmul.bf16.gmra.mxu2 %v1591_v15  ;;  %1119 = vmatmul.bf16.gmra.mxu3 %v1679_v18  ;;  %v734_v15 = vld [vmem:[#allocation2] sm:$0xff]  ;;  %v1747_v18 = vld [vmem:[%s2158_s15 + $0xb4] sm:$0xf0] }
 0x1f1   : > { %990 = vmatmul.bf16.gmra.mxu1 %v1611_v23  ;;  %v1659_v22 = vor.u32 %v1747_v18, %v1658_v17 }
 0x200   : > { %1069 = vmatmul.bf16.gmra.mxu2 %v1599_v24  ;;  %1124 = vmatmul.bf16.gmra.mxu3 %v1687_v27 }
 0x201   : > { %995 = vmatmul.bf16.gmra.mxu1 %v1619_v32  ;;  %v736_v32 = vld [vmem:[#allocation2 + $0x18] sm:$0xff] }
 0x210   : > { %1074 = vmatmul.bf16.gmra.mxu2 %v1607_v33  ;;  %1129 = vmatmul.bf16.gmra.mxu3 %v1695_v36  ;;  %v1655_v36 = vor.u32 %v1744_v30, %v1652_v31 }
 0x211   : > { %1000 = vmatmul.bf16.gmra.mxu1 %v1627_v41 }
 0x21d   : > { %v966_v48 = vpop.f32.mrf.mxu1 }
 0x220   : > { %1079 = vmatmul.bf16.gmra.mxu2 %v1615_v42  ;;  %v737_v42 = vld [vmem:[#allocation2 + $0x50] sm:$0xff] }
 0x221   : > { %1005 = vmatmul.bf16.gmra.mxu1 %v1635_v47  ;;  %v758_v47 = vld [vmem:[#allocation2 + $0xd0] sm:$0xff] }
 0x223   : > { %v2249_v49 = vpop.f32.mrf.mxu3 }
 0x225   : > { %v968_v51 = vpop.f32.mrf.mxu1 }
 0x22b   : > { %v2251_v52 = vpop.f32.mrf.mxu3 }
 0x22d   : > { %v971_v55 = vpop.f32.mrf.mxu1 }
 0x230   : > { %1084 = vmatmul.bf16.gmra.mxu2 %v1623_v50 }
 0x231   : > { %1010 = vmatmul.bf16.gmra.mxu1 %v1643_v60 }
 0x233   : > { %v2255_v56 = vpop.f32.mrf.mxu3 }
 0x235   : > { %v973_v61 = vpop.f32.mrf.mxu1 }
 0x23b   : > { %v2259_v62 = vpop.f32.mrf.mxu3 }
 0x23d   : > { %v976_v6 = vpop.f32.mrf.mxu1 }
 0x240   : > { %1089 = vmatmul.bf16.gmra.mxu2 %v1631_v59 }
 0x241   : > { %1015 = vmatmul.bf16.gmra.mxu1 %v1651_v5 }
 0x243   : > { %v2263_v1 = vpop.f32.mrf.mxu3 }
 0x245   : > { %v978_v12 = vpop.f32.mrf.mxu1 }
 0x24b   : > { %v2267_v10 = vpop.f32.mrf.mxu3 }
 0x24e   : > { %v981_v24 = vpop.f32.mrf.mxu1 }
 0x250   : > { %1094 = vmatmul.bf16.gmra.mxu2 %v1639_v4 }
 0x251   : > { %1020 = vmatmul.bf16.gmra.mxu1 %v1659_v22 }
 0x253   : > { %v1055_v8 = vpop.f32.mrf.mxu2  ;;  %v2273_v21 = vpop.f32.mrf.mxu3 }
 0x254   : > { %v1056_v9 = vadd.f32 %v1055_v8, %v966_v48 }
 0x256   : > { %v1135_v11 = vadd.f32 %v1056_v9, %v733_v7  ;;  %v983_v34 = vpop.f32.mrf.mxu1 }
 0x258   : > { %1167 = vst [vmem:[#allocation2 + $0xb0] sm:$0xff] %v1135_v11 }
 0x25b   : > { %v1057_v16 = vpop.f32.mrf.mxu2  ;;  %v2275_v28 = vpop.f32.mrf.mxu3 }
 0x25c   : > { %v1058_v19 = vadd.f32 %v1057_v16, %v968_v51 }
 0x25e   : > { %v1136_v23 = vadd.f32 %v1058_v19, %v734_v15  ;;  %v986_v46 = vpop.f32.mrf.mxu1  ;;  %v741_v19 = vld [vmem:[#allocation2 + $0x80] sm:$0xff] }
 0x260   : > { %1168 = vst [vmem:[#allocation2] sm:$0xff] %v1136_v23  ;;  %1099 = vmatmul.bf16.gmra.mxu2 %v1647_v20 }
 0x263   : > { %v1060_v26 = vpop.f32.mrf.mxu2  ;;  %v1115_v37 = vpop.f32.mrf.mxu3 }
 0x264   : > { %v1061_v27 = vadd.f32 %v1060_v26, %v971_v55  ;;  %v1116_v40 = vadd.f32 %v1115_v37, %v2249_v49  ;;  %v738_v55 = vld [vmem:[#allocation2 + $0x68] sm:$0xff]  ;;  %v1663_v49 = vor.u32 %v1746_v53, %v1660_v54 }
 0x265   : > { %v743_v37 = vld [vmem:[#allocation2 + $0xe8] sm:$0xff] }
 0x266   : > { %v1137_v29 = vadd.f32 %v1061_v27, %v735_v25  ;;  %v1159_v41 = vadd.f32 %v1116_v40, %v757_v39  ;;  %v764_v40 = vld [vmem:[#allocation2 + $0x98] sm:$0xff] }
 0x268   : > { %1169 = vst [vmem:[#allocation2 + $0xd8] sm:$0xff] %v1137_v29  ;;  %v742_v29 = vld [vmem:[#allocation2 + $0x88] sm:$0xff] }
 0x269   : > { %1191 = vst [vmem:[#allocation2 + $0xa8] sm:$0xff] %v1159_v41 }
 0x26b   : > { %v1062_v33 = vpop.f32.mrf.mxu2  ;;  %v1117_v45 = vpop.f32.mrf.mxu3 }
 0x26c   : > { %v1063_v35 = vadd.f32 %v1062_v33, %v973_v61  ;;  %v1118_v48 = vadd.f32 %v1117_v45, %v2251_v52  ;;  %v988_v61 = vpop.f32.mrf.mxu1  ;;  %v739_v52 = vld [vmem:[#allocation2 + $0x30] sm:$0xff]  ;;  %v744_v45 = vld [vmem:[#allocation2 + $0xb8] sm:$0xff] }
 0x26e   : > { %v1138_v38 = vadd.f32 %v1063_v35, %v736_v32  ;;  %v1160_v51 = vadd.f32 %v1118_v48, %v758_v47 }
 0x270   : > { %1170 = vst [vmem:[#allocation2 + $0x18] sm:$0xff] %v1138_v38  ;;  %1104 = vmatmul.bf16.gmra.mxu2 %v1655_v36 }
 0x271   : > { %1192 = vst [vmem:[#allocation2 + $0xd0] sm:$0xff] %v1160_v51 }
 0x273   : > { %v1065_v43 = vpop.f32.mrf.mxu2  ;;  %v1120_v59 = vpop.f32.mrf.mxu3 }
 0x274   : > { %v1066_v44 = vadd.f32 %v1065_v43, %v976_v6  ;;  %v1121_v0 = vadd.f32 %v1120_v59, %v2255_v56  ;;  %v760_v6 = vld [vmem:[#allocation2 + $0x28] sm:$0xff]  ;;  %v991_v11 = vpop.f32.mrf.mxu1  ;;  %v761_v56 = vld [vmem:[#allocation2 + $0xa0] sm:$0xff] }
 0x275   : > { %v747_v59 = vld [vmem:[#allocation2 + $0x8] sm:$0xff] }
 0x276   : > { %v1139_v50 = vadd.f32 %v1066_v44, %v737_v42  ;;  %v1161_v2 = vadd.f32 %v1121_v0, %v759_v63 }
 0x278   : > { %1171 = vst [vmem:[#allocation2 + $0x50] sm:$0xff] %v1139_v50  ;;  %v745_v50 = vld [vmem:[#allocation2 + $0x60] sm:$0xff] }
 0x279   : > { %1193 = vst [vmem:[#allocation2 + $0x10] sm:$0xff] %v1161_v2  ;;  %v748_v2 = vld [vmem:[#allocation2 + $0x78] sm:$0xff] }
 0x27b   : > { %v1067_v57 = vpop.f32.mrf.mxu2  ;;  %v1122_v5 = vpop.f32.mrf.mxu3 }
 0x27c   : > { %v1068_v58 = vadd.f32 %v1067_v57, %v978_v12  ;;  %v1123_v7 = vadd.f32 %v1122_v5, %v2259_v62  ;;  %v740_v12 = vld [vmem:[#allocation2 + $0x48] sm:$0xff]  ;;  %v993_v22 = vpop.f32.mrf.mxu1 }
 0x27e   : > { %v1140_v60 = vadd.f32 %v1068_v58, %v738_v55  ;;  %v1162_v9 = vadd.f32 %v1123_v7, %v760_v6  ;;  %v746_v55 = vld [vmem:[#allocation2 + $0xf0] sm:$0xff]  ;;  %v749_v6 = vld [vmem:[#allocation2 + $0x38] sm:$0xff] }
 0x280   : > { %1172 = vst [vmem:[#allocation2 + $0x68] sm:$0xff] %v1140_v60  ;;  %1109 = vmatmul.bf16.gmra.mxu2 %v1663_v49 }
 0x281   : > { %1194 = vst [vmem:[#allocation2 + $0x28] sm:$0xff] %v1162_v9 }
 0x283   : > { %v1070_v3 = vpop.f32.mrf.mxu2  ;;  %v1125_v15 = vpop.f32.mrf.mxu3 }
 0x284   : > { %v1071_v4 = vadd.f32 %v1070_v3, %v981_v24  ;;  %v1126_v17 = vadd.f32 %v1125_v15, %v2263_v1  ;;  %v762_v24 = vld [vmem:[#allocation2 + $0xf8] sm:$0xff]  ;;  %v996_v33 = vpop.f32.mrf.mxu1 }
 0x286   : > { %v1141_v8 = vadd.f32 %v1071_v4, %v739_v52  ;;  %v1163_v18 = vadd.f32 %v1126_v17, %v761_v56  ;;  %v751_v56 = vld [vmem:[#allocation2 + $0x40] sm:$0xff] }
 0x288   : > { %1173 = vst [vmem:[#allocation2 + $0x30] sm:$0xff] %v1141_v8 }
 0x289   : > { %1195 = vst [vmem:[#allocation2 + $0xa0] sm:$0xff] %v1163_v18 }
 0x28b   : > { %v1072_v13 = vpop.f32.mrf.mxu2  ;;  %v1127_v62 = vpop.f32.mrf.mxu3 }
 0x28c   : > { %v1073_v14 = vadd.f32 %v1072_v13, %v983_v34  ;;  %v1128_v25 = vadd.f32 %v1127_v62, %v2267_v10  ;;  %v763_v34 = vld [vmem:[#allocation2 + $0x20] sm:$0xff]  ;;  %v998_v43 = vpop.f32.mrf.mxu1 }
 0x28e   : > { %v1142_v16 = vadd.f32 %v1073_v14, %v740_v12  ;;  %v1164_v27 = vadd.f32 %v1128_v25, %v762_v24  ;;  %v750_v12 = vld [vmem:[#allocation2 + $0x58] sm:$0xff]  ;;  %v753_v25 = vld [vmem:[#allocation2 + $0xe0] sm:$0xff] }
 0x290   : > { %1174 = vst [vmem:[#allocation2 + $0x48] sm:$0xff] %v1142_v16 }
 0x291   : > { %1196 = vst [vmem:[#allocation2 + $0xf8] sm:$0xff] %v1164_v27 }
 0x293   : > { %v1075_v20 = vpop.f32.mrf.mxu2  ;;  %v1130_v32 = vpop.f32.mrf.mxu3 }
 0x294   : > { %v1076_v23 = vadd.f32 %v1075_v20, %v986_v46  ;;  %v1131_v35 = vadd.f32 %v1130_v32, %v2273_v21  ;;  %v1001_v21 = vpop.f32.mrf.mxu1  ;;  %v752_v20 = vld [vmem:[#allocation2 + $0xc8] sm:$0xff] }
 0x296   : > { %v1143_v26 = vadd.f32 %v1076_v23, %v741_v19  ;;  %v1165_v36 = vadd.f32 %v1131_v35, %v763_v34  ;;  %v755_v35 = vld [vmem:[#allocation2 + $0x70] sm:$0xff] }
 0x298   : > { %1175 = vst [vmem:[#allocation2 + $0x80] sm:$0xff] %v1143_v26 }
 0x299   : > { %1197 = vst [vmem:[#allocation2 + $0x20] sm:$0xff] %v1165_v36 }
 0x29b   : > { %v1077_v30 = vpop.f32.mrf.mxu2  ;;  %v1132_v10 = vpop.f32.mrf.mxu3 }
 0x29c   : > { %v1078_v31 = vadd.f32 %v1077_v30, %v988_v61  ;;  %v1133_v41 = vadd.f32 %v1132_v10, %v2275_v28  ;;  %v1003_v58 = vpop.f32.mrf.mxu1  ;;  %v756_v10 = vld [vmem:[#allocation2 + $0xc0] sm:$0xff] }
 0x29e   : > { %v1144_v1 = vadd.f32 %v1078_v31, %v742_v29  ;;  %v1166_v44 = vadd.f32 %v1133_v41, %v764_v40  ;;  %v754_v31 = vld [vmem:[#allocation2 + $0x90] sm:$0xff] }
 0x2a0   : > { %1176 = vst [vmem:[#allocation2 + $0x88] sm:$0xff] %v1144_v1 }
 0x2a1   : > { %1198 = vst [vmem:[#allocation2 + $0x98] sm:$0xff] %v1166_v44 }
 0x2a3   : > { %v1080_v38 = vpop.f32.mrf.mxu2 }
 0x2a4   : > { %v1081_v39 = vadd.f32 %v1080_v38, %v991_v11  ;;  %v1006_v63 = vpop.f32.mrf.mxu1 }
 0x2a6   : > { %v1145_v42 = vadd.f32 %v1081_v39, %v743_v37 }
 0x2a8   : > { %1177 = vst [vmem:[#allocation2 + $0xe8] sm:$0xff] %v1145_v42 }
 0x2ab   : > { %v1082_v46 = vpop.f32.mrf.mxu2 }
 0x2ac   : > { %v1083_v47 = vadd.f32 %v1082_v46, %v993_v22  ;;  %v1008_v5 = vpop.f32.mrf.mxu1 }
 0x2ae   : > { %v1146_v48 = vadd.f32 %v1083_v47, %v744_v45 }
 0x2b0   : > { %1178 = vst [vmem:[#allocation2 + $0xb8] sm:$0xff] %v1146_v48 }
 0x2b3   : > { %v1085_v51 = vpop.f32.mrf.mxu2 }
 0x2b4   : > { %v1086_v53 = vadd.f32 %v1085_v51, %v996_v33  ;;  %v1011_v11 = vpop.f32.mrf.mxu1 }
 0x2b6   : > { %v1147_v54 = vadd.f32 %v1086_v53, %v745_v50 }
 0x2b8   : > { %1179 = vst [vmem:[#allocation2 + $0x60] sm:$0xff] %v1147_v54 }
 0x2bb   : > { %v1087_v57 = vpop.f32.mrf.mxu2 }
 0x2bc   : > { %v1088_v28 = vadd.f32 %v1087_v57, %v998_v43  ;;  %v1013_v16 = vpop.f32.mrf.mxu1 }
 0x2be   : > { %v1148_v49 = vadd.f32 %v1088_v28, %v746_v55 }
 0x2c0   : > { %1180 = vst [vmem:[#allocation2 + $0xf0] sm:$0xff] %v1148_v49 }
 0x2c3   : > { %v1090_v60 = vpop.f32.mrf.mxu2 }
 0x2c4   : > { %v1091_v61 = vadd.f32 %v1090_v60, %v1001_v21  ;;  %v1016_v62 = vpop.f32.mrf.mxu1 }
 0x2c6   : > { %v1149_v0 = vadd.f32 %v1091_v61, %v747_v59 }
 0x2c8   : > { %1181 = vst [vmem:[#allocation2 + $0x8] sm:$0xff] %v1149_v0 }
 0x2cb   : > { %v1092_v52 = vpop.f32.mrf.mxu2 }
 0x2cc   : > { %v1093_v3 = vadd.f32 %v1092_v52, %v1003_v58  ;;  %v1018_v30 = vpop.f32.mrf.mxu1 }
 0x2ce   : > { %v1150_v4 = vadd.f32 %v1093_v3, %v748_v2 }
 0x2d0   : > { %1182 = vst [vmem:[#allocation2 + $0x78] sm:$0xff] %v1150_v4 }
 0x2d3   : > { %v1095_v7 = vpop.f32.mrf.mxu2 }
 0x2d4   : > { %v1096_v8 = vadd.f32 %v1095_v7, %v1006_v63  ;;  %v1021_v34 = vpop.f32.mrf.mxu1 }
 0x2d6   : > { %v1151_v9 = vadd.f32 %v1096_v8, %v749_v6 }
 0x2d8   : > { %1183 = vst [vmem:[#allocation2 + $0x38] sm:$0xff] %v1151_v9 }
 0x2db   : > { %v1097_v13 = vpop.f32.mrf.mxu2 }
 0x2dc   : > { %v1098_v14 = vadd.f32 %v1097_v13, %v1008_v5  ;;  %v1023_v39 = vpop.f32.mrf.mxu1 }
 0x2de   : > { %v1152_v15 = vadd.f32 %v1098_v14, %v750_v12 }
 0x2e0   : > { %1184 = vst [vmem:[#allocation2 + $0x58] sm:$0xff] %v1152_v15 }
 0x2e3   : > { %v1100_v17 = vpop.f32.mrf.mxu2 }
 0x2e4   : > { %v1101_v18 = vadd.f32 %v1100_v17, %v1011_v11 }
 0x2e6   : > { %v1153_v19 = vadd.f32 %v1101_v18, %v751_v56 }
 0x2e8   : > { %1185 = vst [vmem:[#allocation2 + $0x40] sm:$0xff] %v1153_v19 }
 0x2eb   : > { %v1102_v22 = vpop.f32.mrf.mxu2 }
 0x2ec   : > { %v1103_v23 = vadd.f32 %v1102_v22, %v1013_v16 }
 0x2ee   : > { %v1154_v24 = vadd.f32 %v1103_v23, %v752_v20 }
 0x2f0   : > { %1186 = vst [vmem:[#allocation2 + $0xc8] sm:$0xff] %v1154_v24 }
 0x2f3   : > { %v1105_v26 = vpop.f32.mrf.mxu2 }
 0x2f4   : > { %v1106_v27 = vadd.f32 %v1105_v26, %v1016_v62 }
 0x2f6   : > { %v1155_v29 = vadd.f32 %v1106_v27, %v753_v25 }
 0x2f8   : > { %1187 = vst [vmem:[#allocation2 + $0xe0] sm:$0xff] %v1155_v29 }
 0x2fb   : > { %v1107_v32 = vpop.f32.mrf.mxu2 }
 0x2fc   : > { %v1108_v33 = vadd.f32 %v1107_v32, %v1018_v30 }
 0x2fe   : > { %v1156_v1 = vadd.f32 %v1108_v33, %v754_v31 }
 0x300   : > { %1188 = vst [vmem:[#allocation2 + $0x90] sm:$0xff] %v1156_v1 }
 0x303   : > { %v1110_v36 = vpop.f32.mrf.mxu2 }
 0x304   : > { %v1111_v37 = vadd.f32 %v1110_v36, %v1021_v34 }
 0x306   : > { %v1157_v38 = vadd.f32 %v1111_v37, %v755_v35 }
 0x308   : > { %1189 = vst [vmem:[#allocation2 + $0x70] sm:$0xff] %v1157_v38 }
 0x30b   : > { %v1112_v40 = vpop.f32.mrf.mxu2 }
 0x30c   : > { %v1113_v41 = vadd.f32 %v1112_v40, %v1023_v39  ;;  %1202 = sbr.rel (%p1696_p13) target bundleno = 811 (0x32b), region = 82 }
 0x30e   : > { %v1158_v42 = vadd.f32 %v1113_v41, %v756_v10 }
 0x310   : > { %1190 = vst [vmem:[#allocation2 + $0xc0] sm:$0xff] %v1158_v42 }
 0x311   : > { %v1203_v43 = vld [vmem:[#allocation2 + $0xb0] sm:$0xff]  ;;  %v1204_v44 = vld [vmem:[#allocation2] sm:$0xff]  ;;  %v1205_v46 = vld [vmem:[#allocation2 + $0xd8] sm:$0xff] }
 0x312   : > { %v2293_v45 = vld [vmem:[%s2367_s3] ss:$0 sm:$0xff]  ;;  %v1206_v47 = vld [vmem:[#allocation2 + $0x18] sm:$0xff]  ;;  %v1207_v48 = vld [vmem:[#allocation2 + $0x50] sm:$0xff] }
 0x313   : > { %v1208_v21 = vld [vmem:[#allocation2 + $0x68] sm:$0xff]  ;;  %v1209_v50 = vld [vmem:[#allocation2 + $0x30] sm:$0xff]  ;;  %v1239_v51 = vadd.f32 %v2293_v45, %v1203_v43  ;;  %v1240_v53 = vadd.f32 %v2293_v45, %v1204_v44  ;;  %v1241_v54 = vadd.f32 %v2293_v45, %v1205_v46  ;;  %v1242_v55 = vadd.f32 %v2293_v45, %v1206_v47  ;;  %v1211_v60 = vld [vmem:[#allocation2 + $0x80] sm:$0xff] }
 0x314   : > { %v1210_v57 = vld [vmem:[#allocation2 + $0x48] sm:$0xff]  ;;  %v1243_v58 = vadd.f32 %v2293_v45, %v1207_v48  ;;  %v1244_v28 = vadd.f32 %v2293_v45, %v1208_v21  ;;  %v1245_v49 = vadd.f32 %v2293_v45, %v1209_v50  ;;  %v1214_v4 = vld [vmem:[#allocation2 + $0xb8] sm:$0xff]  ;;  %v1215_v9 = vld [vmem:[#allocation2 + $0x60] sm:$0xff]  ;;  %v1247_v14 = vadd.f32 %v2293_v45, %v1211_v60 }
 0x315   : > { %v1246_v59 = vadd.f32 %v2293_v45, %v1210_v57  ;;  %v1212_v61 = vld [vmem:[#allocation2 + $0x88] sm:$0xff]  ;;  %v1271_v63 = vmax.f32 %v1239_v51, 0.0  ;;  %v1272_v0 = vmax.f32 %v1240_v53, 0.0  ;;  %v1273_v2 = vmax.f32 %v1241_v54, 0.0  ;;  %v1216_v11 = vld [vmem:[#allocation2 + $0xf0] sm:$0xff]  ;;  %v1218_v56 = vld [vmem:[#allocation2 + $0x78] sm:$0xff] }
 0x316   : > { %v1274_v52 = vmax.f32 %v1242_v55, 0.0  ;;  %v1213_v3 = vld [vmem:[#allocation2 + $0xe8] sm:$0xff]  ;;  %v1275_v5 = vmax.f32 %v1243_v58, 0.0  ;;  %v1276_v6 = vmax.f32 %v1244_v28, 0.0  ;;  %v1277_v7 = vmax.f32 %v1245_v49, 0.0  ;;  %v1219_v22 = vld [vmem:[#allocation2 + $0x38] sm:$0xff] }
 0x317   : > { %v1278_v8 = vmax.f32 %v1246_v59, 0.0  ;;  %v1759_v12 = vpack.c.bf16 %v1272_v0, %v1271_v63  ;;  %v1248_v15 = vadd.f32 %v2293_v45, %v1212_v61  ;;  %v1217_v16 = vld [vmem:[#allocation2 + $0x8] sm:$0xff]  ;;  %v1249_v19 = vadd.f32 %v2293_v45, %v1213_v3  ;;  %v1220_v26 = vld [vmem:[#allocation2 + $0x58] sm:$0xff]  ;;  %v1221_v32 = vld [vmem:[#allocation2 + $0x40] sm:$0xff] }
 0x318   : > { %v1764_v13 = vpack.c.bf16 %v1274_v52, %v1273_v2  ;;  %v1769_v17 = vpack.c.bf16 %v1276_v6, %v1275_v5  ;;  %v1250_v20 = vadd.f32 %v2293_v45, %v1214_v4  ;;  %v1279_v23 = vmax.f32 %v1247_v14, 0.0  ;;  %v1222_v33 = vld [vmem:[#allocation2 + $0xc8] sm:$0xff]  ;;  %v1223_v37 = vld [vmem:[#allocation2 + $0xe0] sm:$0xff]  ;;  %v1224_v38 = vld [vmem:[#allocation2 + $0x90] sm:$0xff] }
 0x319   : > { %v1774_v18 = vpack.c.bf16 %v1278_v8, %v1277_v7  ;;  %1760 = vst [vmem:[%s2156_s8] sm:$0xff] %v1759_v12   ;;  %v1280_v62 = vmax.f32 %v1248_v15, 0.0  ;;  %v1251_v24 = vadd.f32 %v2293_v45, %v1215_v9  ;;  %v1252_v25 = vadd.f32 %v2293_v45, %v1216_v11  ;;  %v1225_v42 = vld [vmem:[#allocation2 + $0x70] sm:$0xff]  ;;  %v1226_v43 = vld [vmem:[#allocation2 + $0xc0] sm:$0xff]  ;;  %v1227_v21 = vld [vmem:[#allocation2 + $0xa8] sm:$0xff] }
 0x31a   : > { %1836 = vst [vmem:[%s2156_s8 + $0x8] sm:$0xff] %v1764_v13   ;;  %v1281_v27 = vmax.f32 %v1249_v19, 0.0  ;;  %v1282_v29 = vmax.f32 %v1250_v20, 0.0  ;;  %v1253_v30 = vadd.f32 %v2293_v45, %v1217_v16  ;;  %v1254_v31 = vadd.f32 %v2293_v45, %v1218_v56  ;;  %v1228_v55 = vld [vmem:[#allocation2 + $0xd0] sm:$0xff]  ;;  %v1230_v60 = vld [vmem:[#allocation2 + $0x28] sm:$0xff]  ;;  %v1231_v52 = vld [vmem:[#allocation2 + $0xa0] sm:$0xff] }
 0x31b   : > { %1837 = vst [vmem:[%s2156_s8 + $0x10] sm:$0xff] %v1769_v17   ;;  %v1779_v1 = vpack.c.bf16 %v1280_v62, %v1279_v23  ;;  %v1283_v34 = vmax.f32 %v1251_v24, 0.0  ;;  %v1284_v35 = vmax.f32 %v1252_v25, 0.0  ;;  %v1255_v36 = vadd.f32 %v2293_v45, %v1219_v22  ;;  %v1229_v59 = vld [vmem:[#allocation2 + $0x10] sm:$0xff]  ;;  %v1232_v3 = vld [vmem:[#allocation2 + $0xf8] sm:$0xff]  ;;  %v1233_v8 = vld [vmem:[#allocation2 + $0x20] sm:$0xff] }
 0x31c   : > { %1838 = vst [vmem:[%s2156_s8 + $0x18] sm:$0xff] %v1774_v18   ;;  %v1784_v39 = vpack.c.bf16 %v1282_v29, %v1281_v27  ;;  %v1285_v10 = vmax.f32 %v1253_v30, 0.0  ;;  %v1286_v40 = vmax.f32 %v1254_v31, 0.0  ;;  %v1256_v41 = vadd.f32 %v2293_v45, %v1220_v26  ;;  %v1234_v9 = vld [vmem:[#allocation2 + $0x98] sm:$0xff] }
 0x31d   : > { %1839 = vst [vmem:[%s2156_s8 + $0x20] sm:$0xff] %v1779_v1   ;;  %v1789_v44 = vpack.c.bf16 %v1284_v35, %v1283_v34  ;;  %v1287_v46 = vmax.f32 %v1255_v36, 0.0  ;;  %v1257_v47 = vadd.f32 %v2293_v45, %v1221_v32  ;;  %v1258_v48 = vadd.f32 %v2293_v45, %v1222_v33 }
 0x31e   : > { %1840 = vst [vmem:[%s2156_s8 + $0x28] sm:$0xff] %v1784_v39   ;;  %v1794_v50 = vpack.c.bf16 %v1286_v40, %v1285_v10  ;;  %v1288_v51 = vmax.f32 %v1256_v41, 0.0  ;;  %v1259_v53 = vadd.f32 %v2293_v45, %v1223_v37  ;;  %v1260_v54 = vadd.f32 %v2293_v45, %v1224_v38 }
 0x31f   : > { %1841 = vst [vmem:[%s2156_s8 + $0x30] sm:$0xff] %v1789_v44   ;;  %v1289_v57 = vmax.f32 %v1257_v47, 0.0  ;;  %v1290_v58 = vmax.f32 %v1258_v48, 0.0  ;;  %v1261_v28 = vadd.f32 %v2293_v45, %v1225_v42  ;;  %v1262_v49 = vadd.f32 %v2293_v45, %v1226_v43 }
 0x320   : > { %1842 = vst [vmem:[%s2156_s8 + $0x38] sm:$0xff] %v1794_v50   ;;  %v1799_v61 = vpack.c.bf16 %v1288_v51, %v1287_v46  ;;  %v1291_v63 = vmax.f32 %v1259_v53, 0.0  ;;  %v1292_v0 = vmax.f32 %v1260_v54, 0.0  ;;  %v1263_v2 = vadd.f32 %v2293_v45, %v1227_v21 }
 0x321   : > { %v1804_v4 = vpack.c.bf16 %v1290_v58, %v1289_v57  ;;  %v1293_v5 = vmax.f32 %v1261_v28, 0.0  ;;  %v1294_v6 = vmax.f32 %v1262_v49, 0.0  ;;  %v1264_v7 = vadd.f32 %v2293_v45, %v1228_v55 }
 0x322   : > { %1843 = vst [vmem:[%s2156_s8 + $0x40] sm:$0xff] %v1799_v61   ;;  %v1809_v11 = vpack.c.bf16 %v1292_v0, %v1291_v63  ;;  %v1295_v12 = vmax.f32 %v1263_v2, 0.0  ;;  %v1265_v13 = vadd.f32 %v2293_v45, %v1229_v59  ;;  %v1266_v14 = vadd.f32 %v2293_v45, %v1230_v60 }
 0x323   : > { %1844 = vst [vmem:[%s2156_s8 + $0x48] sm:$0xff] %v1804_v4   ;;  %v1814_v15 = vpack.c.bf16 %v1294_v6, %v1293_v5  ;;  %v1296_v16 = vmax.f32 %v1264_v7, 0.0  ;;  %v1267_v56 = vadd.f32 %v2293_v45, %v1231_v52  ;;  %v1268_v17 = vadd.f32 %v2293_v45, %v1232_v3 }
 0x324   : > { %1845 = vst [vmem:[%s2156_s8 + $0x50] sm:$0xff] %v1809_v11   ;;  %v1297_v18 = vmax.f32 %v1265_v13, 0.0  ;;  %v1298_v19 = vmax.f32 %v1266_v14, 0.0  ;;  %v1269_v20 = vadd.f32 %v2293_v45, %v1233_v8  ;;  %v1270_v22 = vadd.f32 %v2293_v45, %v1234_v9 }
 0x325   : > { %1846 = vst [vmem:[%s2156_s8 + $0x58] sm:$0xff] %v1814_v15   ;;  %v1819_v23 = vpack.c.bf16 %v1296_v16, %v1295_v12  ;;  %v1299_v62 = vmax.f32 %v1267_v56, 0.0  ;;  %v1300_v24 = vmax.f32 %v1268_v17, 0.0 }
 0x326   : > { %v1824_v25 = vpack.c.bf16 %v1298_v19, %v1297_v18  ;;  %v1301_v26 = vmax.f32 %v1269_v20, 0.0  ;;  %v1302_v27 = vmax.f32 %v1270_v22, 0.0 }
 0x327   : > { %1847 = vst [vmem:[%s2156_s8 + $0x60] sm:$0xff] %v1819_v23   ;;  %v1829_v29 = vpack.c.bf16 %v1300_v24, %v1299_v62 }
 0x328   : > { %1848 = vst [vmem:[%s2156_s8 + $0x68] sm:$0xff] %v1824_v25   ;;  %v1834_v30 = vpack.c.bf16 %v1302_v27, %v1301_v26 }
 0x329   : > { %1849 = vst [vmem:[%s2156_s8 + $0x70] sm:$0xff] %v1829_v29  }
 0x32a   : > { %1850 = vst [vmem:[%s2156_s8 + $0x78] sm:$0xff] %v1834_v30  }
 0x32b PF: > { %s14_s21 = sadd.s32 1, %s1987_s21   ;;  %s2369_s15 = smov %s1967_s16 }
 0x32c   : > { %p11_p0 = scmp.ge.s32.totalorder %s14_s21, 6   ;;  %s2370_s16 = smov %s2066_s28 }
 0x32d   : > { %s2371_s17 = smov %s1979_s19  ;;  %s2372_s18 = smov %s1983_s20 }
 0x32e   : > { %s2373_s19 = smov %s2376_s22  ;;  %s2374_s20 = smov %s2380_s23 }
 0x32f   :  { %13 = sbr.rel (!%p11_p0) target bundleno = 4 (0x4), region = 120 }

</bundles_post_ra>
